<compile_context>
chip_gen: v6e
topology: v6e:2x2x1
jax: 0.10.0
libtpu: 0.0.40
codegen_flags: <defaults>
</compile_context>

<pallas_src>
import functools

import jax
import jax.numpy as jnp
from jax import lax
from jax.experimental import pallas as pl
from jax.experimental.pallas import tpu as pltpu

STEP = 50          # module-level `step` in the PyTorch file
HIDDEN = 32
INPUT_SIZE = 1
OUTPUT_SIZE = 1


def _lstm_fused_kernel(x_ref, wih_ref, bias_ref, alpha_ref, beta_ref,
                       whh_ref, wout_ref, bout_ref, out_ref,
                       xg_ref, hbuf_ref, *, hidden, step):
    """Fused LSTM forward: input projection + recurrence + output Linear.

    x_ref    : (T, B, 1)       f32   time-major inputs
    wih_ref  : (1, 4H)         f32   W_ih^T (I == 1), i/f/o cols pre-scaled 0.5
    bias_ref : (1, 4H)         f32   b_ih + b_hh,     i/f/o cols pre-scaled 0.5
    alpha_ref: (1, 4H)         f32   per-gate affine scale  [.5,.5, 1,.5]
    beta_ref : (1, 4H)         f32   per-gate affine offset [.5,.5, 0,.5]
    whh_ref  : (H, 4H)         bf16/f32  W_hh^T, i/f/o cols pre-scaled 0.5
    wout_ref : (1, H)          f32   out.weight (O == 1)
    bout_ref : (1, 1)          f32   out.bias
    out_ref  : (T-step+1,B,1)  f32   y_t for t >= step-1
    xg_ref   : (T, B, 4H)      f32   VMEM scratch: pre-projected gates
    hbuf_ref : (T-step+1,B,H)  f32   VMEM scratch: surviving hidden states
    """
    T, B, _ = x_ref.shape
    H = hidden

    # Bulk input projection (I == 1 -> broadcast multiply-add). One shot,
    # entirely in VMEM, off the serial chain.
    xg_ref[...] = x_ref[...] * wih_ref[...][None] + bias_ref[...][None]

    whh = whh_ref[...]                       # (H, 4H), loaded once
    alpha = alpha_ref[...]                   # (1, 4H)
    beta = beta_ref[...]                     # (1, 4H)
    cdt = whh.dtype                          # bf16 (default) or f32

    def cell(t, carry):
        h, c = carry
        # One MXU push per step; bf16 inputs keep it single-pass.
        pre = xg_ref[t] + jnp.dot(h.astype(cdt), whh,
                                  preferred_element_type=jnp.float32)
        # Single full-width EUP pass; sigmoid(z) = 0.5*tanh(z/2) + 0.5 with
        # the z/2 pre-folded into the i/f/o columns, recovered by (alpha, beta).
        act = jnp.tanh(pre) * alpha + beta   # [sig(i), sig(f), tanh(g), sig(o)]
        i_g = act[:, 0 * H:1 * H]
        f_g = act[:, 1 * H:2 * H]
        g_g = act[:, 2 * H:3 * H]
        o_g = act[:, 3 * H:4 * H]
        c_new = f_g * c + i_g * g_g
        h_new = o_g * jnp.tanh(c_new)
        return h_new, c_new

    h0 = jnp.zeros((B, H), jnp.float32)
    c0 = jnp.zeros((B, H), jnp.float32)

    # Warm-up: first (step - 1) steps produce no output -> no stores at all.
    carry = lax.fori_loop(0, step - 1, cell, (h0, c0), unroll=True)

    def cell_store(t, carry):
        h_new, c_new = cell(t, carry)
        hbuf_ref[t - (step - 1)] = h_new
        return h_new, c_new

    # Tail: only the T - step + 1 surviving steps keep their hidden state.
    lax.fori_loop(step - 1, T, cell_store, carry, unroll=True)

    # Fused output Linear (H -> 1) over all surviving steps in one bulk
    # lane-reduction, off the serial chain.
    wout = wout_ref[...][None]                                   # (1, 1, H)
    y = jnp.sum(hbuf_ref[...] * wout, axis=-1, keepdims=True) + bout_ref[...]
    out_ref[...] = y.astype(out_ref.dtype)


def _gate_block(vals, H):
    i, f, g, o = vals
    return jnp.concatenate([jnp.full((H,), i, jnp.float32),
                            jnp.full((H,), f, jnp.float32),
                            jnp.full((H,), g, jnp.float32),
                            jnp.full((H,), o, jnp.float32)])


@functools.partial(jax.jit, static_argnames=("step", "use_bf16"))
def rnn_forward(x, params, step=STEP, use_bf16=True):
    """Equivalent of RNN.forward(x, predict_length=0).

    x: (B, T, I) float32, batch-first (PyTorch convention). Requires T >= step,
    I == 1 and O == 1 (as in the PyTorch module).
    Returns (B, T - step + 1, O).
    """
    B, T, I = x.shape
    H = params["w_hh"].shape[1]
    O = params["w_out"].shape[0]
    T_out = T - step + 1

    f32 = jnp.float32
    x_tm = jnp.transpose(x, (1, 0, 2)).astype(f32)               # (T, B, I)

    # sigmoid(z) = 0.5 * tanh(z/2) + 0.5: fold the /2 into the i/f/o gate
    # columns of weights/bias (free, exact) and recover with (alpha, beta).
    scale = _gate_block((0.5, 0.5, 1.0, 0.5), H)                 # (4H,)
    alpha = scale[None, :]                                       # (1, 4H)
    beta = _gate_block((0.5, 0.5, 0.0, 0.5), H)[None, :]         # (1, 4H)

    wih_t = params["w_ih"].T.astype(f32) * scale                 # (I, 4H), I==1
    whh_t = params["w_hh"].T.astype(f32) * scale                 # (H, 4H)
    bias = ((params["b_ih"] + params["b_hh"]).astype(f32) * scale)[None, :]

    # bf16 feed for the serial recurrent dot (0.5 scaling is exact in bf16).
    compute_dtype = jnp.bfloat16 if use_bf16 else f32
    whh_c = whh_t.astype(compute_dtype)

    wout = params["w_out"].astype(f32)                           # (O, H) = (1, H)
    bout = params["b_out"].astype(f32).reshape(1, O)             # (1, 1)

    vmem = pl.BlockSpec(memory_space=pltpu.MemorySpace.VMEM)
    kernel = functools.partial(_lstm_fused_kernel, hidden=H, step=step)

    y_tm = pl.pallas_call(
        kernel,
        out_shape=jax.ShapeDtypeStruct((T_out, B, O), f32),
        in_specs=[vmem] * 8,
        out_specs=vmem,
        scratch_shapes=[
            pltpu.VMEM((T, B, 4 * H), f32),      # pre-projected gates
            pltpu.VMEM((T_out, B, H), f32),      # surviving hidden states
        ],
    )(x_tm, wih_t, bias, alpha, beta, whh_c, wout, bout)          # (T_out, B, O)

    # Only a 56-byte transpose left in the wrapper.
    return jnp.transpose(y_tm, (1, 0, 2))                         # (B, T_out, O)


def init_params(key, input_size=INPUT_SIZE, hidden_size=HIDDEN,
                output_size=OUTPUT_SIZE):
    """Deterministic params matching PyTorch LSTM / Linear shapes & init range."""
    ks = jax.random.split(key, 6)
    bound = 1.0 / jnp.sqrt(hidden_size)

    def u(k, shape):
        return jax.random.uniform(k, shape, jnp.float32, -bound, bound)

    return {
        "w_ih": u(ks[0], (4 * hidden_size, input_size)),   # weight_ih_l0
        "w_hh": u(ks[1], (4 * hidden_size, hidden_size)),  # weight_hh_l0
        "b_ih": u(ks[2], (4 * hidden_size,)),              # bias_ih_l0
        "b_hh": u(ks[3], (4 * hidden_size,)),              # bias_hh_l0
        "w_out": u(ks[4], (output_size, hidden_size)),     # out.weight
        "b_out": u(ks[5], (output_size,)),                 # out.bias
    }


def rnn_forward_reference(x, params, step=STEP):
    """Pure-JAX reference (lax.scan) mirroring torch.nn.LSTM + Linear."""
    H = params["w_hh"].shape[1]
    wih_t = params["w_ih"].T
    whh_t = params["w_hh"].T
    b = params["b_ih"] + params["b_hh"]
    wout_t = params["w_out"].T
    bout = params["b_out"]

    B = x.shape[0]
    x_tm = jnp.transpose(x, (1, 0, 2))

    def cell(carry, x_t):
        h, c = carry
        gates = x_t @ wih_t + h @ whh_t + b
        i = jax.nn.sigmoid(gates[:, 0 * H:1 * H])
        f = jax.nn.sigmoid(gates[:, 1 * H:2 * H])
        g = jnp.tanh(gates[:, 2 * H:3 * H])
        o = jax.nn.sigmoid(gates[:, 3 * H:4 * H])
        c_new = f * c + i * g
        h_new = o * jnp.tanh(c_new)
        return (h_new, c_new), h_new @ wout_t + bout

    h0 = jnp.zeros((B, H), jnp.float32)
    c0 = jnp.zeros((B, H), jnp.float32)
    _, y_tm = lax.scan(cell, (h0, c0), x_tm)
    y = jnp.transpose(y_tm, (1, 0, 2))
    return y[:, step - 1:, :]


if __name__ == "__main__":
    key = jax.random.PRNGKey(0)
    k_param, k_x = jax.random.split(key)

    B, T = 2, 56            # T >= STEP so the [:, step-1:, :] slice is non-empty
    params = init_params(k_param)
    x = jax.random.normal(k_x, (B, T, INPUT_SIZE), jnp.float32)

    ref = jax.block_until_ready(rnn_forward_reference(x, params))

    # f32 MXU path: tight agreement with the f32 reference.
    out_f32 = jax.block_until_ready(rnn_forward(x, params, use_bf16=False))
    assert out_f32.shape == (B, T - STEP + 1, OUTPUT_SIZE), out_f32.shape
    assert jnp.allclose(out_f32, ref, atol=2e-4, rtol=2e-4), float(
        jnp.max(jnp.abs(out_f32 - ref)))

    # bf16-fed MXU path (default / fastest): looser tolerance as expected.
    out_bf16 = jax.block_until_ready(rnn_forward(x, params, use_bf16=True))
    assert out_bf16.shape == (B, T - STEP + 1, OUTPUT_SIZE), out_bf16.shape
    assert jnp.allclose(out_bf16, ref, atol=3e-2, rtol=3e-2), float(
        jnp.max(jnp.abs(out_bf16 - ref)))

    print("KERNEL_OK")
</pallas_src>

<mosaic_0001>
module attributes {stable_mosaic.version = 11 : i64} {
  func.func @_lstm_fused_kernel(%arg0: memref<56x2x1xf32, #tpu.memory_space<vmem>>, %arg1: memref<1x128xf32, #tpu.memory_space<vmem>>, %arg2: memref<1x128xf32, #tpu.memory_space<vmem>>, %arg3: memref<1x128xf32, #tpu.memory_space<vmem>>, %arg4: memref<1x128xf32, #tpu.memory_space<vmem>>, %arg5: memref<32x128xf32, #tpu.memory_space<vmem>>, %arg6: memref<1x32xf32, #tpu.memory_space<vmem>>, %arg7: memref<1x1xf32, #tpu.memory_space<vmem>>, %arg8: memref<7x2x1xf32, #tpu.memory_space<vmem>>, %arg9: memref<56x2x128xf32, #tpu.memory_space<vmem>>, %arg10: memref<7x2x32xf32, #tpu.memory_space<vmem>>) attributes {dimension_semantics = [], scalar_prefetch = 0 : i64, scratch_operands = 2 : i64, tpu.core_type = #tpu.core_type<tc>} {
    %c0 = arith.constant 0 : index
    %c0_0 = arith.constant 0 : index
    %c0_1 = arith.constant 0 : index
    %0 = vector.load %arg0[%c0, %c0_0, %c0_1] : memref<56x2x1xf32, #tpu.memory_space<vmem>>, vector<56x2x1xf32>
    %c0_2 = arith.constant 0 : index
    %c0_3 = arith.constant 0 : index
    %1 = vector.load %arg1[%c0_2, %c0_3] : memref<1x128xf32, #tpu.memory_space<vmem>>, vector<1x128xf32>
    %2 = vector.shape_cast %1 : vector<1x128xf32> to vector<1x1x128xf32>
    %3 = vector.broadcast %0 : vector<56x2x1xf32> to vector<56x2x128xf32>
    %4 = vector.broadcast %2 : vector<1x1x128xf32> to vector<56x2x128xf32>
    %5 = arith.mulf %3, %4 : vector<56x2x128xf32>
    %c0_4 = arith.constant 0 : index
    %c0_5 = arith.constant 0 : index
    %6 = vector.load %arg2[%c0_4, %c0_5] : memref<1x128xf32, #tpu.memory_space<vmem>>, vector<1x128xf32>
    %7 = vector.shape_cast %6 : vector<1x128xf32> to vector<1x1x128xf32>
    %8 = vector.broadcast %7 : vector<1x1x128xf32> to vector<56x2x128xf32>
    %9 = arith.addf %5, %8 : vector<56x2x128xf32>
    %c0_6 = arith.constant 0 : index
    %c0_7 = arith.constant 0 : index
    %c0_8 = arith.constant 0 : index
    %10 = vector.load %arg9[%c0_6, %c0_7, %c0_8] : memref<56x2x128xf32, #tpu.memory_space<vmem>>, vector<56x2x128xf32>
    tpu.vector_store %arg9[%c0_6, %c0_7, %c0_8], %9 {strides = array<i32>} : memref<56x2x128xf32, #tpu.memory_space<vmem>>, vector<56x2x128xf32>,
    %c0_9 = arith.constant 0 : index
    %c0_10 = arith.constant 0 : index
    %11 = vector.load %arg5[%c0_9, %c0_10] : memref<32x128xf32, #tpu.memory_space<vmem>>, vector<32x128xf32>
    %c0_11 = arith.constant 0 : index
    %c0_12 = arith.constant 0 : index
    %12 = vector.load %arg3[%c0_11, %c0_12] : memref<1x128xf32, #tpu.memory_space<vmem>>, vector<1x128xf32>
    %c0_13 = arith.constant 0 : index
    %c0_14 = arith.constant 0 : index
    %13 = vector.load %arg4[%c0_13, %c0_14] : memref<1x128xf32, #tpu.memory_space<vmem>>, vector<1x128xf32>
    %cst = arith.constant 0.000000e+00 : f32
    %14 = vector.broadcast %cst : f32 to vector<2x32xf32>
    %cst_15 = arith.constant 0.000000e+00 : f32
    %15 = vector.broadcast %cst_15 : f32 to vector<2x32xf32>
    %c0_i32 = arith.constant 0 : i32
    %16 = arith.index_cast %c0_i32 : i32 to index
    %c0_16 = arith.constant 0 : index
    %c0_17 = arith.constant 0 : index
    %17 = vector.load %arg9[%16, %c0_16, %c0_17] : memref<56x2x128xf32, #tpu.memory_space<vmem>>, vector<1x2x128xf32>
    %18 = vector.shape_cast %17 : vector<1x2x128xf32> to vector<2x128xf32>
    %cst_18 = arith.constant dense<0.000000e+00> : vector<2x128xf32>
    %19 = tpu.matmul %14, %11, %cst_18 {dimension_numbers = #tpu.dot_dimension_numbers<[1], [0], [0], [1], [0, 0, 1, 1], [], []>} : vector<2x32xf32>, vector<32x128xf32>, vector<2x128xf32> -> vector<2x128xf32>
    %20 = arith.addf %18, %19 : vector<2x128xf32>
    %21 = math.tanh %20 : vector<2x128xf32>
    %22 = vector.broadcast %12 : vector<1x128xf32> to vector<2x128xf32>
    %23 = arith.mulf %21, %22 : vector<2x128xf32>
    %24 = vector.broadcast %13 : vector<1x128xf32> to vector<2x128xf32>
    %25 = arith.addf %23, %24 : vector<2x128xf32>
    %26 = vector.extract_strided_slice %25 {offsets = [0, 0], sizes = [2, 32], strides = [1, 1]} : vector<2x128xf32> to vector<2x32xf32>
    %27 = vector.extract_strided_slice %25 {offsets = [0, 32], sizes = [2, 32], strides = [1, 1]} : vector<2x128xf32> to vector<2x32xf32>
    %28 = vector.extract_strided_slice %25 {offsets = [0, 64], sizes = [2, 32], strides = [1, 1]} : vector<2x128xf32> to vector<2x32xf32>
    %29 = vector.extract_strided_slice %25 {offsets = [0, 96], sizes = [2, 32], strides = [1, 1]} : vector<2x128xf32> to vector<2x32xf32>
    %30 = arith.mulf %27, %15 : vector<2x32xf32>
    %31 = arith.mulf %26, %28 : vector<2x32xf32>
    %32 = arith.addf %30, %31 : vector<2x32xf32>
    %33 = math.tanh %32 : vector<2x32xf32>
    %34 = arith.mulf %29, %33 : vector<2x32xf32>
    %c1_i32 = arith.constant 1 : i32
    %35 = arith.index_cast %c1_i32 : i32 to index
    %c0_19 = arith.constant 0 : index
    %c0_20 = arith.constant 0 : index
    %36 = vector.load %arg9[%35, %c0_19, %c0_20] : memref<56x2x128xf32, #tpu.memory_space<vmem>>, vector<1x2x128xf32>
    %37 = vector.shape_cast %36 : vector<1x2x128xf32> to vector<2x128xf32>
    %cst_21 = arith.constant dense<0.000000e+00> : vector<2x128xf32>
    %38 = tpu.matmul %34, %11, %cst_21 {dimension_numbers = #tpu.dot_dimension_numbers<[1], [0], [0], [1], [0, 0, 1, 1], [], []>} : vector<2x32xf32>, vector<32x128xf32>, vector<2x128xf32> -> vector<2x128xf32>
    %39 = arith.addf %37, %38 : vector<2x128xf32>
    %40 = math.tanh %39 : vector<2x128xf32>
    %41 = vector.broadcast %12 : vector<1x128xf32> to vector<2x128xf32>
    %42 = arith.mulf %40, %41 : vector<2x128xf32>
    %43 = vector.broadcast %13 : vector<1x128xf32> to vector<2x128xf32>
    %44 = arith.addf %42, %43 : vector<2x128xf32>
    %45 = vector.extract_strided_slice %44 {offsets = [0, 0], sizes = [2, 32], strides = [1, 1]} : vector<2x128xf32> to vector<2x32xf32>
    %46 = vector.extract_strided_slice %44 {offsets = [0, 32], sizes = [2, 32], strides = [1, 1]} : vector<2x128xf32> to vector<2x32xf32>
    %47 = vector.extract_strided_slice %44 {offsets = [0, 64], sizes = [2, 32], strides = [1, 1]} : vector<2x128xf32> to vector<2x32xf32>
    %48 = vector.extract_strided_slice %44 {offsets = [0, 96], sizes = [2, 32], strides = [1, 1]} : vector<2x128xf32> to vector<2x32xf32>
    %49 = arith.mulf %46, %32 : vector<2x32xf32>
    %50 = arith.mulf %45, %47 : vector<2x32xf32>
    %51 = arith.addf %49, %50 : vector<2x32xf32>
    %52 = math.tanh %51 : vector<2x32xf32>
    %53 = arith.mulf %48, %52 : vector<2x32xf32>
    %c2_i32 = arith.constant 2 : i32
    %54 = arith.index_cast %c2_i32 : i32 to index
    %c0_22 = arith.constant 0 : index
    %c0_23 = arith.constant 0 : index
    %55 = vector.load %arg9[%54, %c0_22, %c0_23] : memref<56x2x128xf32, #tpu.memory_space<vmem>>, vector<1x2x128xf32>
    %56 = vector.shape_cast %55 : vector<1x2x128xf32> to vector<2x128xf32>
    %cst_24 = arith.constant dense<0.000000e+00> : vector<2x128xf32>
    %57 = tpu.matmul %53, %11, %cst_24 {dimension_numbers = #tpu.dot_dimension_numbers<[1], [0], [0], [1], [0, 0, 1, 1], [], []>} : vector<2x32xf32>, vector<32x128xf32>, vector<2x128xf32> -> vector<2x128xf32>
    %58 = arith.addf %56, %57 : vector<2x128xf32>
    %59 = math.tanh %58 : vector<2x128xf32>
    %60 = vector.broadcast %12 : vector<1x128xf32> to vector<2x128xf32>
    %61 = arith.mulf %59, %60 : vector<2x128xf32>
    %62 = vector.broadcast %13 : vector<1x128xf32> to vector<2x128xf32>
    %63 = arith.addf %61, %62 : vector<2x128xf32>
    %64 = vector.extract_strided_slice %63 {offsets = [0, 0], sizes = [2, 32], strides = [1, 1]} : vector<2x128xf32> to vector<2x32xf32>
    %65 = vector.extract_strided_slice %63 {offsets = [0, 32], sizes = [2, 32], strides = [1, 1]} : vector<2x128xf32> to vector<2x32xf32>
    %66 = vector.extract_strided_slice %63 {offsets = [0, 64], sizes = [2, 32], strides = [1, 1]} : vector<2x128xf32> to vector<2x32xf32>
    %67 = vector.extract_strided_slice %63 {offsets = [0, 96], sizes = [2, 32], strides = [1, 1]} : vector<2x128xf32> to vector<2x32xf32>
    %68 = arith.mulf %65, %51 : vector<2x32xf32>
    %69 = arith.mulf %64, %66 : vector<2x32xf32>
    %70 = arith.addf %68, %69 : vector<2x32xf32>
    %71 = math.tanh %70 : vector<2x32xf32>
    %72 = arith.mulf %67, %71 : vector<2x32xf32>
    %c3_i32 = arith.constant 3 : i32
    %73 = arith.index_cast %c3_i32 : i32 to index
    %c0_25 = arith.constant 0 : index
    %c0_26 = arith.constant 0 : index
    %74 = vector.load %arg9[%73, %c0_25, %c0_26] : memref<56x2x128xf32, #tpu.memory_space<vmem>>, vector<1x2x128xf32>
    %75 = vector.shape_cast %74 : vector<1x2x128xf32> to vector<2x128xf32>
    %cst_27 = arith.constant dense<0.000000e+00> : vector<2x128xf32>
    %76 = tpu.matmul %72, %11, %cst_27 {dimension_numbers = #tpu.dot_dimension_numbers<[1], [0], [0], [1], [0, 0, 1, 1], [], []>} : vector<2x32xf32>, vector<32x128xf32>, vector<2x128xf32> -> vector<2x128xf32>
    %77 = arith.addf %75, %76 : vector<2x128xf32>
    %78 = math.tanh %77 : vector<2x128xf32>
    %79 = vector.broadcast %12 : vector<1x128xf32> to vector<2x128xf32>
    %80 = arith.mulf %78, %79 : vector<2x128xf32>
    %81 = vector.broadcast %13 : vector<1x128xf32> to vector<2x128xf32>
    %82 = arith.addf %80, %81 : vector<2x128xf32>
    %83 = vector.extract_strided_slice %82 {offsets = [0, 0], sizes = [2, 32], strides = [1, 1]} : vector<2x128xf32> to vector<2x32xf32>
    %84 = vector.extract_strided_slice %82 {offsets = [0, 32], sizes = [2, 32], strides = [1, 1]} : vector<2x128xf32> to vector<2x32xf32>
    %85 = vector.extract_strided_slice %82 {offsets = [0, 64], sizes = [2, 32], strides = [1, 1]} : vector<2x128xf32> to vector<2x32xf32>
    %86 = vector.extract_strided_slice %82 {offsets = [0, 96], sizes = [2, 32], strides = [1, 1]} : vector<2x128xf32> to vector<2x32xf32>
    %87 = arith.mulf %84, %70 : vector<2x32xf32>
    %88 = arith.mulf %83, %85 : vector<2x32xf32>
    %89 = arith.addf %87, %88 : vector<2x32xf32>
    %90 = math.tanh %89 : vector<2x32xf32>
    %91 = arith.mulf %86, %90 : vector<2x32xf32>
    %c4_i32 = arith.constant 4 : i32
    %92 = arith.index_cast %c4_i32 : i32 to index
    %c0_28 = arith.constant 0 : index
    %c0_29 = arith.constant 0 : index
    %93 = vector.load %arg9[%92, %c0_28, %c0_29] : memref<56x2x128xf32, #tpu.memory_space<vmem>>, vector<1x2x128xf32>
    %94 = vector.shape_cast %93 : vector<1x2x128xf32> to vector<2x128xf32>
    %cst_30 = arith.constant dense<0.000000e+00> : vector<2x128xf32>
    %95 = tpu.matmul %91, %11, %cst_30 {dimension_numbers = #tpu.dot_dimension_numbers<[1], [0], [0], [1], [0, 0, 1, 1], [], []>} : vector<2x32xf32>, vector<32x128xf32>, vector<2x128xf32> -> vector<2x128xf32>
    %96 = arith.addf %94, %95 : vector<2x128xf32>
    %97 = math.tanh %96 : vector<2x128xf32>
    %98 = vector.broadcast %12 : vector<1x128xf32> to vector<2x128xf32>
    %99 = arith.mulf %97, %98 : vector<2x128xf32>
    %100 = vector.broadcast %13 : vector<1x128xf32> to vector<2x128xf32>
    %101 = arith.addf %99, %100 : vector<2x128xf32>
    %102 = vector.extract_strided_slice %101 {offsets = [0, 0], sizes = [2, 32], strides = [1, 1]} : vector<2x128xf32> to vector<2x32xf32>
    %103 = vector.extract_strided_slice %101 {offsets = [0, 32], sizes = [2, 32], strides = [1, 1]} : vector<2x128xf32> to vector<2x32xf32>
    %104 = vector.extract_strided_slice %101 {offsets = [0, 64], sizes = [2, 32], strides = [1, 1]} : vector<2x128xf32> to vector<2x32xf32>
    %105 = vector.extract_strided_slice %101 {offsets = [0, 96], sizes = [2, 32], strides = [1, 1]} : vector<2x128xf32> to vector<2x32xf32>
    %106 = arith.mulf %103, %89 : vector<2x32xf32>
    %107 = arith.mulf %102, %104 : vector<2x32xf32>
    %108 = arith.addf %106, %107 : vector<2x32xf32>
    %109 = math.tanh %108 : vector<2x32xf32>
    %110 = arith.mulf %105, %109 : vector<2x32xf32>
    %c5_i32 = arith.constant 5 : i32
    %111 = arith.index_cast %c5_i32 : i32 to index
    %c0_31 = arith.constant 0 : index
    %c0_32 = arith.constant 0 : index
    %112 = vector.load %arg9[%111, %c0_31, %c0_32] : memref<56x2x128xf32, #tpu.memory_space<vmem>>, vector<1x2x128xf32>
    %113 = vector.shape_cast %112 : vector<1x2x128xf32> to vector<2x128xf32>
    %cst_33 = arith.constant dense<0.000000e+00> : vector<2x128xf32>
    %114 = tpu.matmul %110, %11, %cst_33 {dimension_numbers = #tpu.dot_dimension_numbers<[1], [0], [0], [1], [0, 0, 1, 1], [], []>} : vector<2x32xf32>, vector<32x128xf32>, vector<2x128xf32> -> vector<2x128xf32>
    %115 = arith.addf %113, %114 : vector<2x128xf32>
    %116 = math.tanh %115 : vector<2x128xf32>
    %117 = vector.broadcast %12 : vector<1x128xf32> to vector<2x128xf32>
    %118 = arith.mulf %116, %117 : vector<2x128xf32>
    %119 = vector.broadcast %13 : vector<1x128xf32> to vector<2x128xf32>
    %120 = arith.addf %118, %119 : vector<2x128xf32>
    %121 = vector.extract_strided_slice %120 {offsets = [0, 0], sizes = [2, 32], strides = [1, 1]} : vector<2x128xf32> to vector<2x32xf32>
    %122 = vector.extract_strided_slice %120 {offsets = [0, 32], sizes = [2, 32], strides = [1, 1]} : vector<2x128xf32> to vector<2x32xf32>
    %123 = vector.extract_strided_slice %120 {offsets = [0, 64], sizes = [2, 32], strides = [1, 1]} : vector<2x128xf32> to vector<2x32xf32>
    %124 = vector.extract_strided_slice %120 {offsets = [0, 96], sizes = [2, 32], strides = [1, 1]} : vector<2x128xf32> to vector<2x32xf32>
    %125 = arith.mulf %122, %108 : vector<2x32xf32>
    %126 = arith.mulf %121, %123 : vector<2x32xf32>
    %127 = arith.addf %125, %126 : vector<2x32xf32>
    %128 = math.tanh %127 : vector<2x32xf32>
    %129 = arith.mulf %124, %128 : vector<2x32xf32>
    %c6_i32 = arith.constant 6 : i32
    %130 = arith.index_cast %c6_i32 : i32 to index
    %c0_34 = arith.constant 0 : index
    %c0_35 = arith.constant 0 : index
    %131 = vector.load %arg9[%130, %c0_34, %c0_35] : memref<56x2x128xf32, #tpu.memory_space<vmem>>, vector<1x2x128xf32>
    %132 = vector.shape_cast %131 : vector<1x2x128xf32> to vector<2x128xf32>
    %cst_36 = arith.constant dense<0.000000e+00> : vector<2x128xf32>
    %133 = tpu.matmul %129, %11, %cst_36 {dimension_numbers = #tpu.dot_dimension_numbers<[1], [0], [0], [1], [0, 0, 1, 1], [], []>} : vector<2x32xf32>, vector<32x128xf32>, vector<2x128xf32> -> vector<2x128xf32>
    %134 = arith.addf %132, %133 : vector<2x128xf32>
    %135 = math.tanh %134 : vector<2x128xf32>
    %136 = vector.broadcast %12 : vector<1x128xf32> to vector<2x128xf32>
    %137 = arith.mulf %135, %136 : vector<2x128xf32>
    %138 = vector.broadcast %13 : vector<1x128xf32> to vector<2x128xf32>
    %139 = arith.addf %137, %138 : vector<2x128xf32>
    %140 = vector.extract_strided_slice %139 {offsets = [0, 0], sizes = [2, 32], strides = [1, 1]} : vector<2x128xf32> to vector<2x32xf32>
    %141 = vector.extract_strided_slice %139 {offsets = [0, 32], sizes = [2, 32], strides = [1, 1]} : vector<2x128xf32> to vector<2x32xf32>
    %142 = vector.extract_strided_slice %139 {offsets = [0, 64], sizes = [2, 32], strides = [1, 1]} : vector<2x128xf32> to vector<2x32xf32>
    %143 = vector.extract_strided_slice %139 {offsets = [0, 96], sizes = [2, 32], strides = [1, 1]} : vector<2x128xf32> to vector<2x32xf32>
    %144 = arith.mulf %141, %127 : vector<2x32xf32>
    %145 = arith.mulf %140, %142 : vector<2x32xf32>
    %146 = arith.addf %144, %145 : vector<2x32xf32>
    %147 = math.tanh %146 : vector<2x32xf32>
    %148 = arith.mulf %143, %147 : vector<2x32xf32>
    %c7_i32 = arith.constant 7 : i32
    %149 = arith.index_cast %c7_i32 : i32 to index
    %c0_37 = arith.constant 0 : index
    %c0_38 = arith.constant 0 : index
    %150 = vector.load %arg9[%149, %c0_37, %c0_38] : memref<56x2x128xf32, #tpu.memory_space<vmem>>, vector<1x2x128xf32>
    %151 = vector.shape_cast %150 : vector<1x2x128xf32> to vector<2x128xf32>
    %cst_39 = arith.constant dense<0.000000e+00> : vector<2x128xf32>
    %152 = tpu.matmul %148, %11, %cst_39 {dimension_numbers = #tpu.dot_dimension_numbers<[1], [0], [0], [1], [0, 0, 1, 1], [], []>} : vector<2x32xf32>, vector<32x128xf32>, vector<2x128xf32> -> vector<2x128xf32>
    %153 = arith.addf %151, %152 : vector<2x128xf32>
    %154 = math.tanh %153 : vector<2x128xf32>
    %155 = vector.broadcast %12 : vector<1x128xf32> to vector<2x128xf32>
    %156 = arith.mulf %154, %155 : vector<2x128xf32>
    %157 = vector.broadcast %13 : vector<1x128xf32> to vector<2x128xf32>
    %158 = arith.addf %156, %157 : vector<2x128xf32>
    %159 = vector.extract_strided_slice %158 {offsets = [0, 0], sizes = [2, 32], strides = [1, 1]} : vector<2x128xf32> to vector<2x32xf32>
    %160 = vector.extract_strided_slice %158 {offsets = [0, 32], sizes = [2, 32], strides = [1, 1]} : vector<2x128xf32> to vector<2x32xf32>
    %161 = vector.extract_strided_slice %158 {offsets = [0, 64], sizes = [2, 32], strides = [1, 1]} : vector<2x128xf32> to vector<2x32xf32>
    %162 = vector.extract_strided_slice %158 {offsets = [0, 96], sizes = [2, 32], strides = [1, 1]} : vector<2x128xf32> to vector<2x32xf32>
    %163 = arith.mulf %160, %146 : vector<2x32xf32>
    %164 = arith.mulf %159, %161 : vector<2x32xf32>
    %165 = arith.addf %163, %164 : vector<2x32xf32>
    %166 = math.tanh %165 : vector<2x32xf32>
    %167 = arith.mulf %162, %166 : vector<2x32xf32>
    %c8_i32 = arith.constant 8 : i32
    %168 = arith.index_cast %c8_i32 : i32 to index
    %c0_40 = arith.constant 0 : index
    %c0_41 = arith.constant 0 : index
    %169 = vector.load %arg9[%168, %c0_40, %c0_41] : memref<56x2x128xf32, #tpu.memory_space<vmem>>, vector<1x2x128xf32>
    %170 = vector.shape_cast %169 : vector<1x2x128xf32> to vector<2x128xf32>
    %cst_42 = arith.constant dense<0.000000e+00> : vector<2x128xf32>
    %171 = tpu.matmul %167, %11, %cst_42 {dimension_numbers = #tpu.dot_dimension_numbers<[1], [0], [0], [1], [0, 0, 1, 1], [], []>} : vector<2x32xf32>, vector<32x128xf32>, vector<2x128xf32> -> vector<2x128xf32>
    %172 = arith.addf %170, %171 : vector<2x128xf32>
    %173 = math.tanh %172 : vector<2x128xf32>
    %174 = vector.broadcast %12 : vector<1x128xf32> to vector<2x128xf32>
    %175 = arith.mulf %173, %174 : vector<2x128xf32>
    %176 = vector.broadcast %13 : vector<1x128xf32> to vector<2x128xf32>
    %177 = arith.addf %175, %176 : vector<2x128xf32>
    %178 = vector.extract_strided_slice %177 {offsets = [0, 0], sizes = [2, 32], strides = [1, 1]} : vector<2x128xf32> to vector<2x32xf32>
    %179 = vector.extract_strided_slice %177 {offsets = [0, 32], sizes = [2, 32], strides = [1, 1]} : vector<2x128xf32> to vector<2x32xf32>
    %180 = vector.extract_strided_slice %177 {offsets = [0, 64], sizes = [2, 32], strides = [1, 1]} : vector<2x128xf32> to vector<2x32xf32>
    %181 = vector.extract_strided_slice %177 {offsets = [0, 96], sizes = [2, 32], strides = [1, 1]} : vector<2x128xf32> to vector<2x32xf32>
    %182 = arith.mulf %179, %165 : vector<2x32xf32>
    %183 = arith.mulf %178, %180 : vector<2x32xf32>
    %184 = arith.addf %182, %183 : vector<2x32xf32>
    %185 = math.tanh %184 : vector<2x32xf32>
    %186 = arith.mulf %181, %185 : vector<2x32xf32>
    %c9_i32 = arith.constant 9 : i32
    %187 = arith.index_cast %c9_i32 : i32 to index
    %c0_43 = arith.constant 0 : index
    %c0_44 = arith.constant 0 : index
    %188 = vector.load %arg9[%187, %c0_43, %c0_44] : memref<56x2x128xf32, #tpu.memory_space<vmem>>, vector<1x2x128xf32>
    %189 = vector.shape_cast %188 : vector<1x2x128xf32> to vector<2x128xf32>
    %cst_45 = arith.constant dense<0.000000e+00> : vector<2x128xf32>
    %190 = tpu.matmul %186, %11, %cst_45 {dimension_numbers = #tpu.dot_dimension_numbers<[1], [0], [0], [1], [0, 0, 1, 1], [], []>} : vector<2x32xf32>, vector<32x128xf32>, vector<2x128xf32> -> vector<2x128xf32>
    %191 = arith.addf %189, %190 : vector<2x128xf32>
    %192 = math.tanh %191 : vector<2x128xf32>
    %193 = vector.broadcast %12 : vector<1x128xf32> to vector<2x128xf32>
    %194 = arith.mulf %192, %193 : vector<2x128xf32>
    %195 = vector.broadcast %13 : vector<1x128xf32> to vector<2x128xf32>
    %196 = arith.addf %194, %195 : vector<2x128xf32>
    %197 = vector.extract_strided_slice %196 {offsets = [0, 0], sizes = [2, 32], strides = [1, 1]} : vector<2x128xf32> to vector<2x32xf32>
    %198 = vector.extract_strided_slice %196 {offsets = [0, 32], sizes = [2, 32], strides = [1, 1]} : vector<2x128xf32> to vector<2x32xf32>
    %199 = vector.extract_strided_slice %196 {offsets = [0, 64], sizes = [2, 32], strides = [1, 1]} : vector<2x128xf32> to vector<2x32xf32>
    %200 = vector.extract_strided_slice %196 {offsets = [0, 96], sizes = [2, 32], strides = [1, 1]} : vector<2x128xf32> to vector<2x32xf32>
    %201 = arith.mulf %198, %184 : vector<2x32xf32>
    %202 = arith.mulf %197, %199 : vector<2x32xf32>
    %203 = arith.addf %201, %202 : vector<2x32xf32>
    %204 = math.tanh %203 : vector<2x32xf32>
    %205 = arith.mulf %200, %204 : vector<2x32xf32>
    %c10_i32 = arith.constant 10 : i32
    %206 = arith.index_cast %c10_i32 : i32 to index
    %c0_46 = arith.constant 0 : index
    %c0_47 = arith.constant 0 : index
    %207 = vector.load %arg9[%206, %c0_46, %c0_47] : memref<56x2x128xf32, #tpu.memory_space<vmem>>, vector<1x2x128xf32>
    %208 = vector.shape_cast %207 : vector<1x2x128xf32> to vector<2x128xf32>
    %cst_48 = arith.constant dense<0.000000e+00> : vector<2x128xf32>
    %209 = tpu.matmul %205, %11, %cst_48 {dimension_numbers = #tpu.dot_dimension_numbers<[1], [0], [0], [1], [0, 0, 1, 1], [], []>} : vector<2x32xf32>, vector<32x128xf32>, vector<2x128xf32> -> vector<2x128xf32>
    %210 = arith.addf %208, %209 : vector<2x128xf32>
    %211 = math.tanh %210 : vector<2x128xf32>
    %212 = vector.broadcast %12 : vector<1x128xf32> to vector<2x128xf32>
    %213 = arith.mulf %211, %212 : vector<2x128xf32>
    %214 = vector.broadcast %13 : vector<1x128xf32> to vector<2x128xf32>
    %215 = arith.addf %213, %214 : vector<2x128xf32>
    %216 = vector.extract_strided_slice %215 {offsets = [0, 0], sizes = [2, 32], strides = [1, 1]} : vector<2x128xf32> to vector<2x32xf32>
    %217 = vector.extract_strided_slice %215 {offsets = [0, 32], sizes = [2, 32], strides = [1, 1]} : vector<2x128xf32> to vector<2x32xf32>
    %218 = vector.extract_strided_slice %215 {offsets = [0, 64], sizes = [2, 32], strides = [1, 1]} : vector<2x128xf32> to vector<2x32xf32>
    %219 = vector.extract_strided_slice %215 {offsets = [0, 96], sizes = [2, 32], strides = [1, 1]} : vector<2x128xf32> to vector<2x32xf32>
    %220 = arith.mulf %217, %203 : vector<2x32xf32>
    %221 = arith.mulf %216, %218 : vector<2x32xf32>
    %222 = arith.addf %220, %221 : vector<2x32xf32>
    %223 = math.tanh %222 : vector<2x32xf32>
    %224 = arith.mulf %219, %223 : vector<2x32xf32>
    %c11_i32 = arith.constant 11 : i32
    %225 = arith.index_cast %c11_i32 : i32 to index
    %c0_49 = arith.constant 0 : index
    %c0_50 = arith.constant 0 : index
    %226 = vector.load %arg9[%225, %c0_49, %c0_50] : memref<56x2x128xf32, #tpu.memory_space<vmem>>, vector<1x2x128xf32>
    %227 = vector.shape_cast %226 : vector<1x2x128xf32> to vector<2x128xf32>
    %cst_51 = arith.constant dense<0.000000e+00> : vector<2x128xf32>
    %228 = tpu.matmul %224, %11, %cst_51 {dimension_numbers = #tpu.dot_dimension_numbers<[1], [0], [0], [1], [0, 0, 1, 1], [], []>} : vector<2x32xf32>, vector<32x128xf32>, vector<2x128xf32> -> vector<2x128xf32>
    %229 = arith.addf %227, %228 : vector<2x128xf32>
    %230 = math.tanh %229 : vector<2x128xf32>
    %231 = vector.broadcast %12 : vector<1x128xf32> to vector<2x128xf32>
    %232 = arith.mulf %230, %231 : vector<2x128xf32>
    %233 = vector.broadcast %13 : vector<1x128xf32> to vector<2x128xf32>
    %234 = arith.addf %232, %233 : vector<2x128xf32>
    %235 = vector.extract_strided_slice %234 {offsets = [0, 0], sizes = [2, 32], strides = [1, 1]} : vector<2x128xf32> to vector<2x32xf32>
    %236 = vector.extract_strided_slice %234 {offsets = [0, 32], sizes = [2, 32], strides = [1, 1]} : vector<2x128xf32> to vector<2x32xf32>
    %237 = vector.extract_strided_slice %234 {offsets = [0, 64], sizes = [2, 32], strides = [1, 1]} : vector<2x128xf32> to vector<2x32xf32>
    %238 = vector.extract_strided_slice %234 {offsets = [0, 96], sizes = [2, 32], strides = [1, 1]} : vector<2x128xf32> to vector<2x32xf32>
    %239 = arith.mulf %236, %222 : vector<2x32xf32>
    %240 = arith.mulf %235, %237 : vector<2x32xf32>
    %241 = arith.addf %239, %240 : vector<2x32xf32>
    %242 = math.tanh %241 : vector<2x32xf32>
    %243 = arith.mulf %238, %242 : vector<2x32xf32>
    %c12_i32 = arith.constant 12 : i32
    %244 = arith.index_cast %c12_i32 : i32 to index
    %c0_52 = arith.constant 0 : index
    %c0_53 = arith.constant 0 : index
    %245 = vector.load %arg9[%244, %c0_52, %c0_53] : memref<56x2x128xf32, #tpu.memory_space<vmem>>, vector<1x2x128xf32>
    %246 = vector.shape_cast %245 : vector<1x2x128xf32> to vector<2x128xf32>
    %cst_54 = arith.constant dense<0.000000e+00> : vector<2x128xf32>
    %247 = tpu.matmul %243, %11, %cst_54 {dimension_numbers = #tpu.dot_dimension_numbers<[1], [0], [0], [1], [0, 0, 1, 1], [], []>} : vector<2x32xf32>, vector<32x128xf32>, vector<2x128xf32> -> vector<2x128xf32>
    %248 = arith.addf %246, %247 : vector<2x128xf32>
    %249 = math.tanh %248 : vector<2x128xf32>
    %250 = vector.broadcast %12 : vector<1x128xf32> to vector<2x128xf32>
    %251 = arith.mulf %249, %250 : vector<2x128xf32>
    %252 = vector.broadcast %13 : vector<1x128xf32> to vector<2x128xf32>
    %253 = arith.addf %251, %252 : vector<2x128xf32>
    %254 = vector.extract_strided_slice %253 {offsets = [0, 0], sizes = [2, 32], strides = [1, 1]} : vector<2x128xf32> to vector<2x32xf32>
    %255 = vector.extract_strided_slice %253 {offsets = [0, 32], sizes = [2, 32], strides = [1, 1]} : vector<2x128xf32> to vector<2x32xf32>
    %256 = vector.extract_strided_slice %253 {offsets = [0, 64], sizes = [2, 32], strides = [1, 1]} : vector<2x128xf32> to vector<2x32xf32>
    %257 = vector.extract_strided_slice %253 {offsets = [0, 96], sizes = [2, 32], strides = [1, 1]} : vector<2x128xf32> to vector<2x32xf32>
    %258 = arith.mulf %255, %241 : vector<2x32xf32>
    %259 = arith.mulf %254, %256 : vector<2x32xf32>
    %260 = arith.addf %258, %259 : vector<2x32xf32>
    %261 = math.tanh %260 : vector<2x32xf32>
    %262 = arith.mulf %257, %261 : vector<2x32xf32>
    %c13_i32 = arith.constant 13 : i32
    %263 = arith.index_cast %c13_i32 : i32 to index
    %c0_55 = arith.constant 0 : index
    %c0_56 = arith.constant 0 : index
    %264 = vector.load %arg9[%263, %c0_55, %c0_56] : memref<56x2x128xf32, #tpu.memory_space<vmem>>, vector<1x2x128xf32>
    %265 = vector.shape_cast %264 : vector<1x2x128xf32> to vector<2x128xf32>
    %cst_57 = arith.constant dense<0.000000e+00> : vector<2x128xf32>
    %266 = tpu.matmul %262, %11, %cst_57 {dimension_numbers = #tpu.dot_dimension_numbers<[1], [0], [0], [1], [0, 0, 1, 1], [], []>} : vector<2x32xf32>, vector<32x128xf32>, vector<2x128xf32> -> vector<2x128xf32>
    %267 = arith.addf %265, %266 : vector<2x128xf32>
    %268 = math.tanh %267 : vector<2x128xf32>
    %269 = vector.broadcast %12 : vector<1x128xf32> to vector<2x128xf32>
    %270 = arith.mulf %268, %269 : vector<2x128xf32>
    %271 = vector.broadcast %13 : vector<1x128xf32> to vector<2x128xf32>
    %272 = arith.addf %270, %271 : vector<2x128xf32>
    %273 = vector.extract_strided_slice %272 {offsets = [0, 0], sizes = [2, 32], strides = [1, 1]} : vector<2x128xf32> to vector<2x32xf32>
    %274 = vector.extract_strided_slice %272 {offsets = [0, 32], sizes = [2, 32], strides = [1, 1]} : vector<2x128xf32> to vector<2x32xf32>
    %275 = vector.extract_strided_slice %272 {offsets = [0, 64], sizes = [2, 32], strides = [1, 1]} : vector<2x128xf32> to vector<2x32xf32>
    %276 = vector.extract_strided_slice %272 {offsets = [0, 96], sizes = [2, 32], strides = [1, 1]} : vector<2x128xf32> to vector<2x32xf32>
    %277 = arith.mulf %274, %260 : vector<2x32xf32>
    %278 = arith.mulf %273, %275 : vector<2x32xf32>
    %279 = arith.addf %277, %278 : vector<2x32xf32>
    %280 = math.tanh %279 : vector<2x32xf32>
    %281 = arith.mulf %276, %280 : vector<2x32xf32>
    %c14_i32 = arith.constant 14 : i32
    %282 = arith.index_cast %c14_i32 : i32 to index
    %c0_58 = arith.constant 0 : index
    %c0_59 = arith.constant 0 : index
    %283 = vector.load %arg9[%282, %c0_58, %c0_59] : memref<56x2x128xf32, #tpu.memory_space<vmem>>, vector<1x2x128xf32>
    %284 = vector.shape_cast %283 : vector<1x2x128xf32> to vector<2x128xf32>
    %cst_60 = arith.constant dense<0.000000e+00> : vector<2x128xf32>
    %285 = tpu.matmul %281, %11, %cst_60 {dimension_numbers = #tpu.dot_dimension_numbers<[1], [0], [0], [1], [0, 0, 1, 1], [], []>} : vector<2x32xf32>, vector<32x128xf32>, vector<2x128xf32> -> vector<2x128xf32>
    %286 = arith.addf %284, %285 : vector<2x128xf32>
    %287 = math.tanh %286 : vector<2x128xf32>
    %288 = vector.broadcast %12 : vector<1x128xf32> to vector<2x128xf32>
    %289 = arith.mulf %287, %288 : vector<2x128xf32>
    %290 = vector.broadcast %13 : vector<1x128xf32> to vector<2x128xf32>
    %291 = arith.addf %289, %290 : vector<2x128xf32>
    %292 = vector.extract_strided_slice %291 {offsets = [0, 0], sizes = [2, 32], strides = [1, 1]} : vector<2x128xf32> to vector<2x32xf32>
    %293 = vector.extract_strided_slice %291 {offsets = [0, 32], sizes = [2, 32], strides = [1, 1]} : vector<2x128xf32> to vector<2x32xf32>
    %294 = vector.extract_strided_slice %291 {offsets = [0, 64], sizes = [2, 32], strides = [1, 1]} : vector<2x128xf32> to vector<2x32xf32>
    %295 = vector.extract_strided_slice %291 {offsets = [0, 96], sizes = [2, 32], strides = [1, 1]} : vector<2x128xf32> to vector<2x32xf32>
    %296 = arith.mulf %293, %279 : vector<2x32xf32>
    %297 = arith.mulf %292, %294 : vector<2x32xf32>
    %298 = arith.addf %296, %297 : vector<2x32xf32>
    %299 = math.tanh %298 : vector<2x32xf32>
    %300 = arith.mulf %295, %299 : vector<2x32xf32>
    %c15_i32 = arith.constant 15 : i32
    %301 = arith.index_cast %c15_i32 : i32 to index
    %c0_61 = arith.constant 0 : index
    %c0_62 = arith.constant 0 : index
    %302 = vector.load %arg9[%301, %c0_61, %c0_62] : memref<56x2x128xf32, #tpu.memory_space<vmem>>, vector<1x2x128xf32>
    %303 = vector.shape_cast %302 : vector<1x2x128xf32> to vector<2x128xf32>
    %cst_63 = arith.constant dense<0.000000e+00> : vector<2x128xf32>
    %304 = tpu.matmul %300, %11, %cst_63 {dimension_numbers = #tpu.dot_dimension_numbers<[1], [0], [0], [1], [0, 0, 1, 1], [], []>} : vector<2x32xf32>, vector<32x128xf32>, vector<2x128xf32> -> vector<2x128xf32>
    %305 = arith.addf %303, %304 : vector<2x128xf32>
    %306 = math.tanh %305 : vector<2x128xf32>
    %307 = vector.broadcast %12 : vector<1x128xf32> to vector<2x128xf32>
    %308 = arith.mulf %306, %307 : vector<2x128xf32>
    %309 = vector.broadcast %13 : vector<1x128xf32> to vector<2x128xf32>
    %310 = arith.addf %308, %309 : vector<2x128xf32>
    %311 = vector.extract_strided_slice %310 {offsets = [0, 0], sizes = [2, 32], strides = [1, 1]} : vector<2x128xf32> to vector<2x32xf32>
    %312 = vector.extract_strided_slice %310 {offsets = [0, 32], sizes = [2, 32], strides = [1, 1]} : vector<2x128xf32> to vector<2x32xf32>
    %313 = vector.extract_strided_slice %310 {offsets = [0, 64], sizes = [2, 32], strides = [1, 1]} : vector<2x128xf32> to vector<2x32xf32>
    %314 = vector.extract_strided_slice %310 {offsets = [0, 96], sizes = [2, 32], strides = [1, 1]} : vector<2x128xf32> to vector<2x32xf32>
    %315 = arith.mulf %312, %298 : vector<2x32xf32>
    %316 = arith.mulf %311, %313 : vector<2x32xf32>
    %317 = arith.addf %315, %316 : vector<2x32xf32>
    %318 = math.tanh %317 : vector<2x32xf32>
    %319 = arith.mulf %314, %318 : vector<2x32xf32>
    %c16_i32 = arith.constant 16 : i32
    %320 = arith.index_cast %c16_i32 : i32 to index
    %c0_64 = arith.constant 0 : index
    %c0_65 = arith.constant 0 : index
    %321 = vector.load %arg9[%320, %c0_64, %c0_65] : memref<56x2x128xf32, #tpu.memory_space<vmem>>, vector<1x2x128xf32>
    %322 = vector.shape_cast %321 : vector<1x2x128xf32> to vector<2x128xf32>
    %cst_66 = arith.constant dense<0.000000e+00> : vector<2x128xf32>
    %323 = tpu.matmul %319, %11, %cst_66 {dimension_numbers = #tpu.dot_dimension_numbers<[1], [0], [0], [1], [0, 0, 1, 1], [], []>} : vector<2x32xf32>, vector<32x128xf32>, vector<2x128xf32> -> vector<2x128xf32>
    %324 = arith.addf %322, %323 : vector<2x128xf32>
    %325 = math.tanh %324 : vector<2x128xf32>
    %326 = vector.broadcast %12 : vector<1x128xf32> to vector<2x128xf32>
    %327 = arith.mulf %325, %326 : vector<2x128xf32>
    %328 = vector.broadcast %13 : vector<1x128xf32> to vector<2x128xf32>
    %329 = arith.addf %327, %328 : vector<2x128xf32>
    %330 = vector.extract_strided_slice %329 {offsets = [0, 0], sizes = [2, 32], strides = [1, 1]} : vector<2x128xf32> to vector<2x32xf32>
    %331 = vector.extract_strided_slice %329 {offsets = [0, 32], sizes = [2, 32], strides = [1, 1]} : vector<2x128xf32> to vector<2x32xf32>
    %332 = vector.extract_strided_slice %329 {offsets = [0, 64], sizes = [2, 32], strides = [1, 1]} : vector<2x128xf32> to vector<2x32xf32>
    %333 = vector.extract_strided_slice %329 {offsets = [0, 96], sizes = [2, 32], strides = [1, 1]} : vector<2x128xf32> to vector<2x32xf32>
    %334 = arith.mulf %331, %317 : vector<2x32xf32>
    %335 = arith.mulf %330, %332 : vector<2x32xf32>
    %336 = arith.addf %334, %335 : vector<2x32xf32>
    %337 = math.tanh %336 : vector<2x32xf32>
    %338 = arith.mulf %333, %337 : vector<2x32xf32>
    %c17_i32 = arith.constant 17 : i32
    %339 = arith.index_cast %c17_i32 : i32 to index
    %c0_67 = arith.constant 0 : index
    %c0_68 = arith.constant 0 : index
    %340 = vector.load %arg9[%339, %c0_67, %c0_68] : memref<56x2x128xf32, #tpu.memory_space<vmem>>, vector<1x2x128xf32>
    %341 = vector.shape_cast %340 : vector<1x2x128xf32> to vector<2x128xf32>
    %cst_69 = arith.constant dense<0.000000e+00> : vector<2x128xf32>
    %342 = tpu.matmul %338, %11, %cst_69 {dimension_numbers = #tpu.dot_dimension_numbers<[1], [0], [0], [1], [0, 0, 1, 1], [], []>} : vector<2x32xf32>, vector<32x128xf32>, vector<2x128xf32> -> vector<2x128xf32>
    %343 = arith.addf %341, %342 : vector<2x128xf32>
    %344 = math.tanh %343 : vector<2x128xf32>
    %345 = vector.broadcast %12 : vector<1x128xf32> to vector<2x128xf32>
    %346 = arith.mulf %344, %345 : vector<2x128xf32>
    %347 = vector.broadcast %13 : vector<1x128xf32> to vector<2x128xf32>
    %348 = arith.addf %346, %347 : vector<2x128xf32>
    %349 = vector.extract_strided_slice %348 {offsets = [0, 0], sizes = [2, 32], strides = [1, 1]} : vector<2x128xf32> to vector<2x32xf32>
    %350 = vector.extract_strided_slice %348 {offsets = [0, 32], sizes = [2, 32], strides = [1, 1]} : vector<2x128xf32> to vector<2x32xf32>
    %351 = vector.extract_strided_slice %348 {offsets = [0, 64], sizes = [2, 32], strides = [1, 1]} : vector<2x128xf32> to vector<2x32xf32>
    %352 = vector.extract_strided_slice %348 {offsets = [0, 96], sizes = [2, 32], strides = [1, 1]} : vector<2x128xf32> to vector<2x32xf32>
    %353 = arith.mulf %350, %336 : vector<2x32xf32>
    %354 = arith.mulf %349, %351 : vector<2x32xf32>
    %355 = arith.addf %353, %354 : vector<2x32xf32>
    %356 = math.tanh %355 : vector<2x32xf32>
    %357 = arith.mulf %352, %356 : vector<2x32xf32>
    %c18_i32 = arith.constant 18 : i32
    %358 = arith.index_cast %c18_i32 : i32 to index
    %c0_70 = arith.constant 0 : index
    %c0_71 = arith.constant 0 : index
    %359 = vector.load %arg9[%358, %c0_70, %c0_71] : memref<56x2x128xf32, #tpu.memory_space<vmem>>, vector<1x2x128xf32>
    %360 = vector.shape_cast %359 : vector<1x2x128xf32> to vector<2x128xf32>
    %cst_72 = arith.constant dense<0.000000e+00> : vector<2x128xf32>
    %361 = tpu.matmul %357, %11, %cst_72 {dimension_numbers = #tpu.dot_dimension_numbers<[1], [0], [0], [1], [0, 0, 1, 1], [], []>} : vector<2x32xf32>, vector<32x128xf32>, vector<2x128xf32> -> vector<2x128xf32>
    %362 = arith.addf %360, %361 : vector<2x128xf32>
    %363 = math.tanh %362 : vector<2x128xf32>
    %364 = vector.broadcast %12 : vector<1x128xf32> to vector<2x128xf32>
    %365 = arith.mulf %363, %364 : vector<2x128xf32>
    %366 = vector.broadcast %13 : vector<1x128xf32> to vector<2x128xf32>
    %367 = arith.addf %365, %366 : vector<2x128xf32>
    %368 = vector.extract_strided_slice %367 {offsets = [0, 0], sizes = [2, 32], strides = [1, 1]} : vector<2x128xf32> to vector<2x32xf32>
    %369 = vector.extract_strided_slice %367 {offsets = [0, 32], sizes = [2, 32], strides = [1, 1]} : vector<2x128xf32> to vector<2x32xf32>
    %370 = vector.extract_strided_slice %367 {offsets = [0, 64], sizes = [2, 32], strides = [1, 1]} : vector<2x128xf32> to vector<2x32xf32>
    %371 = vector.extract_strided_slice %367 {offsets = [0, 96], sizes = [2, 32], strides = [1, 1]} : vector<2x128xf32> to vector<2x32xf32>
    %372 = arith.mulf %369, %355 : vector<2x32xf32>
    %373 = arith.mulf %368, %370 : vector<2x32xf32>
    %374 = arith.addf %372, %373 : vector<2x32xf32>
    %375 = math.tanh %374 : vector<2x32xf32>
    %376 = arith.mulf %371, %375 : vector<2x32xf32>
    %c19_i32 = arith.constant 19 : i32
    %377 = arith.index_cast %c19_i32 : i32 to index
    %c0_73 = arith.constant 0 : index
    %c0_74 = arith.constant 0 : index
    %378 = vector.load %arg9[%377, %c0_73, %c0_74] : memref<56x2x128xf32, #tpu.memory_space<vmem>>, vector<1x2x128xf32>
    %379 = vector.shape_cast %378 : vector<1x2x128xf32> to vector<2x128xf32>
    %cst_75 = arith.constant dense<0.000000e+00> : vector<2x128xf32>
    %380 = tpu.matmul %376, %11, %cst_75 {dimension_numbers = #tpu.dot_dimension_numbers<[1], [0], [0], [1], [0, 0, 1, 1], [], []>} : vector<2x32xf32>, vector<32x128xf32>, vector<2x128xf32> -> vector<2x128xf32>
    %381 = arith.addf %379, %380 : vector<2x128xf32>
    %382 = math.tanh %381 : vector<2x128xf32>
    %383 = vector.broadcast %12 : vector<1x128xf32> to vector<2x128xf32>
    %384 = arith.mulf %382, %383 : vector<2x128xf32>
    %385 = vector.broadcast %13 : vector<1x128xf32> to vector<2x128xf32>
    %386 = arith.addf %384, %385 : vector<2x128xf32>
    %387 = vector.extract_strided_slice %386 {offsets = [0, 0], sizes = [2, 32], strides = [1, 1]} : vector<2x128xf32> to vector<2x32xf32>
    %388 = vector.extract_strided_slice %386 {offsets = [0, 32], sizes = [2, 32], strides = [1, 1]} : vector<2x128xf32> to vector<2x32xf32>
    %389 = vector.extract_strided_slice %386 {offsets = [0, 64], sizes = [2, 32], strides = [1, 1]} : vector<2x128xf32> to vector<2x32xf32>
    %390 = vector.extract_strided_slice %386 {offsets = [0, 96], sizes = [2, 32], strides = [1, 1]} : vector<2x128xf32> to vector<2x32xf32>
    %391 = arith.mulf %388, %374 : vector<2x32xf32>
    %392 = arith.mulf %387, %389 : vector<2x32xf32>
    %393 = arith.addf %391, %392 : vector<2x32xf32>
    %394 = math.tanh %393 : vector<2x32xf32>
    %395 = arith.mulf %390, %394 : vector<2x32xf32>
    %c20_i32 = arith.constant 20 : i32
    %396 = arith.index_cast %c20_i32 : i32 to index
    %c0_76 = arith.constant 0 : index
    %c0_77 = arith.constant 0 : index
    %397 = vector.load %arg9[%396, %c0_76, %c0_77] : memref<56x2x128xf32, #tpu.memory_space<vmem>>, vector<1x2x128xf32>
    %398 = vector.shape_cast %397 : vector<1x2x128xf32> to vector<2x128xf32>
    %cst_78 = arith.constant dense<0.000000e+00> : vector<2x128xf32>
    %399 = tpu.matmul %395, %11, %cst_78 {dimension_numbers = #tpu.dot_dimension_numbers<[1], [0], [0], [1], [0, 0, 1, 1], [], []>} : vector<2x32xf32>, vector<32x128xf32>, vector<2x128xf32> -> vector<2x128xf32>
    %400 = arith.addf %398, %399 : vector<2x128xf32>
    %401 = math.tanh %400 : vector<2x128xf32>
    %402 = vector.broadcast %12 : vector<1x128xf32> to vector<2x128xf32>
    %403 = arith.mulf %401, %402 : vector<2x128xf32>
    %404 = vector.broadcast %13 : vector<1x128xf32> to vector<2x128xf32>
    %405 = arith.addf %403, %404 : vector<2x128xf32>
    %406 = vector.extract_strided_slice %405 {offsets = [0, 0], sizes = [2, 32], strides = [1, 1]} : vector<2x128xf32> to vector<2x32xf32>
    %407 = vector.extract_strided_slice %405 {offsets = [0, 32], sizes = [2, 32], strides = [1, 1]} : vector<2x128xf32> to vector<2x32xf32>
    %408 = vector.extract_strided_slice %405 {offsets = [0, 64], sizes = [2, 32], strides = [1, 1]} : vector<2x128xf32> to vector<2x32xf32>
    %409 = vector.extract_strided_slice %405 {offsets = [0, 96], sizes = [2, 32], strides = [1, 1]} : vector<2x128xf32> to vector<2x32xf32>
    %410 = arith.mulf %407, %393 : vector<2x32xf32>
    %411 = arith.mulf %406, %408 : vector<2x32xf32>
    %412 = arith.addf %410, %411 : vector<2x32xf32>
    %413 = math.tanh %412 : vector<2x32xf32>
    %414 = arith.mulf %409, %413 : vector<2x32xf32>
    %c21_i32 = arith.constant 21 : i32
    %415 = arith.index_cast %c21_i32 : i32 to index
    %c0_79 = arith.constant 0 : index
    %c0_80 = arith.constant 0 : index
    %416 = vector.load %arg9[%415, %c0_79, %c0_80] : memref<56x2x128xf32, #tpu.memory_space<vmem>>, vector<1x2x128xf32>
    %417 = vector.shape_cast %416 : vector<1x2x128xf32> to vector<2x128xf32>
    %cst_81 = arith.constant dense<0.000000e+00> : vector<2x128xf32>
    %418 = tpu.matmul %414, %11, %cst_81 {dimension_numbers = #tpu.dot_dimension_numbers<[1], [0], [0], [1], [0, 0, 1, 1], [], []>} : vector<2x32xf32>, vector<32x128xf32>, vector<2x128xf32> -> vector<2x128xf32>
    %419 = arith.addf %417, %418 : vector<2x128xf32>
    %420 = math.tanh %419 : vector<2x128xf32>
    %421 = vector.broadcast %12 : vector<1x128xf32> to vector<2x128xf32>
    %422 = arith.mulf %420, %421 : vector<2x128xf32>
    %423 = vector.broadcast %13 : vector<1x128xf32> to vector<2x128xf32>
    %424 = arith.addf %422, %423 : vector<2x128xf32>
    %425 = vector.extract_strided_slice %424 {offsets = [0, 0], sizes = [2, 32], strides = [1, 1]} : vector<2x128xf32> to vector<2x32xf32>
    %426 = vector.extract_strided_slice %424 {offsets = [0, 32], sizes = [2, 32], strides = [1, 1]} : vector<2x128xf32> to vector<2x32xf32>
    %427 = vector.extract_strided_slice %424 {offsets = [0, 64], sizes = [2, 32], strides = [1, 1]} : vector<2x128xf32> to vector<2x32xf32>
    %428 = vector.extract_strided_slice %424 {offsets = [0, 96], sizes = [2, 32], strides = [1, 1]} : vector<2x128xf32> to vector<2x32xf32>
    %429 = arith.mulf %426, %412 : vector<2x32xf32>
    %430 = arith.mulf %425, %427 : vector<2x32xf32>
    %431 = arith.addf %429, %430 : vector<2x32xf32>
    %432 = math.tanh %431 : vector<2x32xf32>
    %433 = arith.mulf %428, %432 : vector<2x32xf32>
    %c22_i32 = arith.constant 22 : i32
    %434 = arith.index_cast %c22_i32 : i32 to index
    %c0_82 = arith.constant 0 : index
    %c0_83 = arith.constant 0 : index
    %435 = vector.load %arg9[%434, %c0_82, %c0_83] : memref<56x2x128xf32, #tpu.memory_space<vmem>>, vector<1x2x128xf32>
    %436 = vector.shape_cast %435 : vector<1x2x128xf32> to vector<2x128xf32>
    %cst_84 = arith.constant dense<0.000000e+00> : vector<2x128xf32>
    %437 = tpu.matmul %433, %11, %cst_84 {dimension_numbers = #tpu.dot_dimension_numbers<[1], [0], [0], [1], [0, 0, 1, 1], [], []>} : vector<2x32xf32>, vector<32x128xf32>, vector<2x128xf32> -> vector<2x128xf32>
    %438 = arith.addf %436, %437 : vector<2x128xf32>
    %439 = math.tanh %438 : vector<2x128xf32>
    %440 = vector.broadcast %12 : vector<1x128xf32> to vector<2x128xf32>
    %441 = arith.mulf %439, %440 : vector<2x128xf32>
    %442 = vector.broadcast %13 : vector<1x128xf32> to vector<2x128xf32>
    %443 = arith.addf %441, %442 : vector<2x128xf32>
    %444 = vector.extract_strided_slice %443 {offsets = [0, 0], sizes = [2, 32], strides = [1, 1]} : vector<2x128xf32> to vector<2x32xf32>
    %445 = vector.extract_strided_slice %443 {offsets = [0, 32], sizes = [2, 32], strides = [1, 1]} : vector<2x128xf32> to vector<2x32xf32>
    %446 = vector.extract_strided_slice %443 {offsets = [0, 64], sizes = [2, 32], strides = [1, 1]} : vector<2x128xf32> to vector<2x32xf32>
    %447 = vector.extract_strided_slice %443 {offsets = [0, 96], sizes = [2, 32], strides = [1, 1]} : vector<2x128xf32> to vector<2x32xf32>
    %448 = arith.mulf %445, %431 : vector<2x32xf32>
    %449 = arith.mulf %444, %446 : vector<2x32xf32>
    %450 = arith.addf %448, %449 : vector<2x32xf32>
    %451 = math.tanh %450 : vector<2x32xf32>
    %452 = arith.mulf %447, %451 : vector<2x32xf32>
    %c23_i32 = arith.constant 23 : i32
    %453 = arith.index_cast %c23_i32 : i32 to index
    %c0_85 = arith.constant 0 : index
    %c0_86 = arith.constant 0 : index
    %454 = vector.load %arg9[%453, %c0_85, %c0_86] : memref<56x2x128xf32, #tpu.memory_space<vmem>>, vector<1x2x128xf32>
    %455 = vector.shape_cast %454 : vector<1x2x128xf32> to vector<2x128xf32>
    %cst_87 = arith.constant dense<0.000000e+00> : vector<2x128xf32>
    %456 = tpu.matmul %452, %11, %cst_87 {dimension_numbers = #tpu.dot_dimension_numbers<[1], [0], [0], [1], [0, 0, 1, 1], [], []>} : vector<2x32xf32>, vector<32x128xf32>, vector<2x128xf32> -> vector<2x128xf32>
    %457 = arith.addf %455, %456 : vector<2x128xf32>
    %458 = math.tanh %457 : vector<2x128xf32>
    %459 = vector.broadcast %12 : vector<1x128xf32> to vector<2x128xf32>
    %460 = arith.mulf %458, %459 : vector<2x128xf32>
    %461 = vector.broadcast %13 : vector<1x128xf32> to vector<2x128xf32>
    %462 = arith.addf %460, %461 : vector<2x128xf32>
    %463 = vector.extract_strided_slice %462 {offsets = [0, 0], sizes = [2, 32], strides = [1, 1]} : vector<2x128xf32> to vector<2x32xf32>
    %464 = vector.extract_strided_slice %462 {offsets = [0, 32], sizes = [2, 32], strides = [1, 1]} : vector<2x128xf32> to vector<2x32xf32>
    %465 = vector.extract_strided_slice %462 {offsets = [0, 64], sizes = [2, 32], strides = [1, 1]} : vector<2x128xf32> to vector<2x32xf32>
    %466 = vector.extract_strided_slice %462 {offsets = [0, 96], sizes = [2, 32], strides = [1, 1]} : vector<2x128xf32> to vector<2x32xf32>
    %467 = arith.mulf %464, %450 : vector<2x32xf32>
    %468 = arith.mulf %463, %465 : vector<2x32xf32>
    %469 = arith.addf %467, %468 : vector<2x32xf32>
    %470 = math.tanh %469 : vector<2x32xf32>
    %471 = arith.mulf %466, %470 : vector<2x32xf32>
    %c24_i32 = arith.constant 24 : i32
    %472 = arith.index_cast %c24_i32 : i32 to index
    %c0_88 = arith.constant 0 : index
    %c0_89 = arith.constant 0 : index
    %473 = vector.load %arg9[%472, %c0_88, %c0_89] : memref<56x2x128xf32, #tpu.memory_space<vmem>>, vector<1x2x128xf32>
    %474 = vector.shape_cast %473 : vector<1x2x128xf32> to vector<2x128xf32>
    %cst_90 = arith.constant dense<0.000000e+00> : vector<2x128xf32>
    %475 = tpu.matmul %471, %11, %cst_90 {dimension_numbers = #tpu.dot_dimension_numbers<[1], [0], [0], [1], [0, 0, 1, 1], [], []>} : vector<2x32xf32>, vector<32x128xf32>, vector<2x128xf32> -> vector<2x128xf32>
    %476 = arith.addf %474, %475 : vector<2x128xf32>
    %477 = math.tanh %476 : vector<2x128xf32>
    %478 = vector.broadcast %12 : vector<1x128xf32> to vector<2x128xf32>
    %479 = arith.mulf %477, %478 : vector<2x128xf32>
    %480 = vector.broadcast %13 : vector<1x128xf32> to vector<2x128xf32>
    %481 = arith.addf %479, %480 : vector<2x128xf32>
    %482 = vector.extract_strided_slice %481 {offsets = [0, 0], sizes = [2, 32], strides = [1, 1]} : vector<2x128xf32> to vector<2x32xf32>
    %483 = vector.extract_strided_slice %481 {offsets = [0, 32], sizes = [2, 32], strides = [1, 1]} : vector<2x128xf32> to vector<2x32xf32>
    %484 = vector.extract_strided_slice %481 {offsets = [0, 64], sizes = [2, 32], strides = [1, 1]} : vector<2x128xf32> to vector<2x32xf32>
    %485 = vector.extract_strided_slice %481 {offsets = [0, 96], sizes = [2, 32], strides = [1, 1]} : vector<2x128xf32> to vector<2x32xf32>
    %486 = arith.mulf %483, %469 : vector<2x32xf32>
    %487 = arith.mulf %482, %484 : vector<2x32xf32>
    %488 = arith.addf %486, %487 : vector<2x32xf32>
    %489 = math.tanh %488 : vector<2x32xf32>
    %490 = arith.mulf %485, %489 : vector<2x32xf32>
    %c25_i32 = arith.constant 25 : i32
    %491 = arith.index_cast %c25_i32 : i32 to index
    %c0_91 = arith.constant 0 : index
    %c0_92 = arith.constant 0 : index
    %492 = vector.load %arg9[%491, %c0_91, %c0_92] : memref<56x2x128xf32, #tpu.memory_space<vmem>>, vector<1x2x128xf32>
    %493 = vector.shape_cast %492 : vector<1x2x128xf32> to vector<2x128xf32>
    %cst_93 = arith.constant dense<0.000000e+00> : vector<2x128xf32>
    %494 = tpu.matmul %490, %11, %cst_93 {dimension_numbers = #tpu.dot_dimension_numbers<[1], [0], [0], [1], [0, 0, 1, 1], [], []>} : vector<2x32xf32>, vector<32x128xf32>, vector<2x128xf32> -> vector<2x128xf32>
    %495 = arith.addf %493, %494 : vector<2x128xf32>
    %496 = math.tanh %495 : vector<2x128xf32>
    %497 = vector.broadcast %12 : vector<1x128xf32> to vector<2x128xf32>
    %498 = arith.mulf %496, %497 : vector<2x128xf32>
    %499 = vector.broadcast %13 : vector<1x128xf32> to vector<2x128xf32>
    %500 = arith.addf %498, %499 : vector<2x128xf32>
    %501 = vector.extract_strided_slice %500 {offsets = [0, 0], sizes = [2, 32], strides = [1, 1]} : vector<2x128xf32> to vector<2x32xf32>
    %502 = vector.extract_strided_slice %500 {offsets = [0, 32], sizes = [2, 32], strides = [1, 1]} : vector<2x128xf32> to vector<2x32xf32>
    %503 = vector.extract_strided_slice %500 {offsets = [0, 64], sizes = [2, 32], strides = [1, 1]} : vector<2x128xf32> to vector<2x32xf32>
    %504 = vector.extract_strided_slice %500 {offsets = [0, 96], sizes = [2, 32], strides = [1, 1]} : vector<2x128xf32> to vector<2x32xf32>
    %505 = arith.mulf %502, %488 : vector<2x32xf32>
    %506 = arith.mulf %501, %503 : vector<2x32xf32>
    %507 = arith.addf %505, %506 : vector<2x32xf32>
    %508 = math.tanh %507 : vector<2x32xf32>
    %509 = arith.mulf %504, %508 : vector<2x32xf32>
    %c26_i32 = arith.constant 26 : i32
    %510 = arith.index_cast %c26_i32 : i32 to index
    %c0_94 = arith.constant 0 : index
    %c0_95 = arith.constant 0 : index
    %511 = vector.load %arg9[%510, %c0_94, %c0_95] : memref<56x2x128xf32, #tpu.memory_space<vmem>>, vector<1x2x128xf32>
    %512 = vector.shape_cast %511 : vector<1x2x128xf32> to vector<2x128xf32>
    %cst_96 = arith.constant dense<0.000000e+00> : vector<2x128xf32>
    %513 = tpu.matmul %509, %11, %cst_96 {dimension_numbers = #tpu.dot_dimension_numbers<[1], [0], [0], [1], [0, 0, 1, 1], [], []>} : vector<2x32xf32>, vector<32x128xf32>, vector<2x128xf32> -> vector<2x128xf32>
    %514 = arith.addf %512, %513 : vector<2x128xf32>
    %515 = math.tanh %514 : vector<2x128xf32>
    %516 = vector.broadcast %12 : vector<1x128xf32> to vector<2x128xf32>
    %517 = arith.mulf %515, %516 : vector<2x128xf32>
    %518 = vector.broadcast %13 : vector<1x128xf32> to vector<2x128xf32>
    %519 = arith.addf %517, %518 : vector<2x128xf32>
    %520 = vector.extract_strided_slice %519 {offsets = [0, 0], sizes = [2, 32], strides = [1, 1]} : vector<2x128xf32> to vector<2x32xf32>
    %521 = vector.extract_strided_slice %519 {offsets = [0, 32], sizes = [2, 32], strides = [1, 1]} : vector<2x128xf32> to vector<2x32xf32>
    %522 = vector.extract_strided_slice %519 {offsets = [0, 64], sizes = [2, 32], strides = [1, 1]} : vector<2x128xf32> to vector<2x32xf32>
    %523 = vector.extract_strided_slice %519 {offsets = [0, 96], sizes = [2, 32], strides = [1, 1]} : vector<2x128xf32> to vector<2x32xf32>
    %524 = arith.mulf %521, %507 : vector<2x32xf32>
    %525 = arith.mulf %520, %522 : vector<2x32xf32>
    %526 = arith.addf %524, %525 : vector<2x32xf32>
    %527 = math.tanh %526 : vector<2x32xf32>
    %528 = arith.mulf %523, %527 : vector<2x32xf32>
    %c27_i32 = arith.constant 27 : i32
    %529 = arith.index_cast %c27_i32 : i32 to index
    %c0_97 = arith.constant 0 : index
    %c0_98 = arith.constant 0 : index
    %530 = vector.load %arg9[%529, %c0_97, %c0_98] : memref<56x2x128xf32, #tpu.memory_space<vmem>>, vector<1x2x128xf32>
    %531 = vector.shape_cast %530 : vector<1x2x128xf32> to vector<2x128xf32>
    %cst_99 = arith.constant dense<0.000000e+00> : vector<2x128xf32>
    %532 = tpu.matmul %528, %11, %cst_99 {dimension_numbers = #tpu.dot_dimension_numbers<[1], [0], [0], [1], [0, 0, 1, 1], [], []>} : vector<2x32xf32>, vector<32x128xf32>, vector<2x128xf32> -> vector<2x128xf32>
    %533 = arith.addf %531, %532 : vector<2x128xf32>
    %534 = math.tanh %533 : vector<2x128xf32>
    %535 = vector.broadcast %12 : vector<1x128xf32> to vector<2x128xf32>
    %536 = arith.mulf %534, %535 : vector<2x128xf32>
    %537 = vector.broadcast %13 : vector<1x128xf32> to vector<2x128xf32>
    %538 = arith.addf %536, %537 : vector<2x128xf32>
    %539 = vector.extract_strided_slice %538 {offsets = [0, 0], sizes = [2, 32], strides = [1, 1]} : vector<2x128xf32> to vector<2x32xf32>
    %540 = vector.extract_strided_slice %538 {offsets = [0, 32], sizes = [2, 32], strides = [1, 1]} : vector<2x128xf32> to vector<2x32xf32>
    %541 = vector.extract_strided_slice %538 {offsets = [0, 64], sizes = [2, 32], strides = [1, 1]} : vector<2x128xf32> to vector<2x32xf32>
    %542 = vector.extract_strided_slice %538 {offsets = [0, 96], sizes = [2, 32], strides = [1, 1]} : vector<2x128xf32> to vector<2x32xf32>
    %543 = arith.mulf %540, %526 : vector<2x32xf32>
    %544 = arith.mulf %539, %541 : vector<2x32xf32>
    %545 = arith.addf %543, %544 : vector<2x32xf32>
    %546 = math.tanh %545 : vector<2x32xf32>
    %547 = arith.mulf %542, %546 : vector<2x32xf32>
    %c28_i32 = arith.constant 28 : i32
    %548 = arith.index_cast %c28_i32 : i32 to index
    %c0_100 = arith.constant 0 : index
    %c0_101 = arith.constant 0 : index
    %549 = vector.load %arg9[%548, %c0_100, %c0_101] : memref<56x2x128xf32, #tpu.memory_space<vmem>>, vector<1x2x128xf32>
    %550 = vector.shape_cast %549 : vector<1x2x128xf32> to vector<2x128xf32>
    %cst_102 = arith.constant dense<0.000000e+00> : vector<2x128xf32>
    %551 = tpu.matmul %547, %11, %cst_102 {dimension_numbers = #tpu.dot_dimension_numbers<[1], [0], [0], [1], [0, 0, 1, 1], [], []>} : vector<2x32xf32>, vector<32x128xf32>, vector<2x128xf32> -> vector<2x128xf32>
    %552 = arith.addf %550, %551 : vector<2x128xf32>
    %553 = math.tanh %552 : vector<2x128xf32>
    %554 = vector.broadcast %12 : vector<1x128xf32> to vector<2x128xf32>
    %555 = arith.mulf %553, %554 : vector<2x128xf32>
    %556 = vector.broadcast %13 : vector<1x128xf32> to vector<2x128xf32>
    %557 = arith.addf %555, %556 : vector<2x128xf32>
    %558 = vector.extract_strided_slice %557 {offsets = [0, 0], sizes = [2, 32], strides = [1, 1]} : vector<2x128xf32> to vector<2x32xf32>
    %559 = vector.extract_strided_slice %557 {offsets = [0, 32], sizes = [2, 32], strides = [1, 1]} : vector<2x128xf32> to vector<2x32xf32>
    %560 = vector.extract_strided_slice %557 {offsets = [0, 64], sizes = [2, 32], strides = [1, 1]} : vector<2x128xf32> to vector<2x32xf32>
    %561 = vector.extract_strided_slice %557 {offsets = [0, 96], sizes = [2, 32], strides = [1, 1]} : vector<2x128xf32> to vector<2x32xf32>
    %562 = arith.mulf %559, %545 : vector<2x32xf32>
    %563 = arith.mulf %558, %560 : vector<2x32xf32>
    %564 = arith.addf %562, %563 : vector<2x32xf32>
    %565 = math.tanh %564 : vector<2x32xf32>
    %566 = arith.mulf %561, %565 : vector<2x32xf32>
    %c29_i32 = arith.constant 29 : i32
    %567 = arith.index_cast %c29_i32 : i32 to index
    %c0_103 = arith.constant 0 : index
    %c0_104 = arith.constant 0 : index
    %568 = vector.load %arg9[%567, %c0_103, %c0_104] : memref<56x2x128xf32, #tpu.memory_space<vmem>>, vector<1x2x128xf32>
    %569 = vector.shape_cast %568 : vector<1x2x128xf32> to vector<2x128xf32>
    %cst_105 = arith.constant dense<0.000000e+00> : vector<2x128xf32>
    %570 = tpu.matmul %566, %11, %cst_105 {dimension_numbers = #tpu.dot_dimension_numbers<[1], [0], [0], [1], [0, 0, 1, 1], [], []>} : vector<2x32xf32>, vector<32x128xf32>, vector<2x128xf32> -> vector<2x128xf32>
    %571 = arith.addf %569, %570 : vector<2x128xf32>
    %572 = math.tanh %571 : vector<2x128xf32>
    %573 = vector.broadcast %12 : vector<1x128xf32> to vector<2x128xf32>
    %574 = arith.mulf %572, %573 : vector<2x128xf32>
    %575 = vector.broadcast %13 : vector<1x128xf32> to vector<2x128xf32>
    %576 = arith.addf %574, %575 : vector<2x128xf32>
    %577 = vector.extract_strided_slice %576 {offsets = [0, 0], sizes = [2, 32], strides = [1, 1]} : vector<2x128xf32> to vector<2x32xf32>
    %578 = vector.extract_strided_slice %576 {offsets = [0, 32], sizes = [2, 32], strides = [1, 1]} : vector<2x128xf32> to vector<2x32xf32>
    %579 = vector.extract_strided_slice %576 {offsets = [0, 64], sizes = [2, 32], strides = [1, 1]} : vector<2x128xf32> to vector<2x32xf32>
    %580 = vector.extract_strided_slice %576 {offsets = [0, 96], sizes = [2, 32], strides = [1, 1]} : vector<2x128xf32> to vector<2x32xf32>
    %581 = arith.mulf %578, %564 : vector<2x32xf32>
    %582 = arith.mulf %577, %579 : vector<2x32xf32>
    %583 = arith.addf %581, %582 : vector<2x32xf32>
    %584 = math.tanh %583 : vector<2x32xf32>
    %585 = arith.mulf %580, %584 : vector<2x32xf32>
    %c30_i32 = arith.constant 30 : i32
    %586 = arith.index_cast %c30_i32 : i32 to index
    %c0_106 = arith.constant 0 : index
    %c0_107 = arith.constant 0 : index
    %587 = vector.load %arg9[%586, %c0_106, %c0_107] : memref<56x2x128xf32, #tpu.memory_space<vmem>>, vector<1x2x128xf32>
    %588 = vector.shape_cast %587 : vector<1x2x128xf32> to vector<2x128xf32>
    %cst_108 = arith.constant dense<0.000000e+00> : vector<2x128xf32>
    %589 = tpu.matmul %585, %11, %cst_108 {dimension_numbers = #tpu.dot_dimension_numbers<[1], [0], [0], [1], [0, 0, 1, 1], [], []>} : vector<2x32xf32>, vector<32x128xf32>, vector<2x128xf32> -> vector<2x128xf32>
    %590 = arith.addf %588, %589 : vector<2x128xf32>
    %591 = math.tanh %590 : vector<2x128xf32>
    %592 = vector.broadcast %12 : vector<1x128xf32> to vector<2x128xf32>
    %593 = arith.mulf %591, %592 : vector<2x128xf32>
    %594 = vector.broadcast %13 : vector<1x128xf32> to vector<2x128xf32>
    %595 = arith.addf %593, %594 : vector<2x128xf32>
    %596 = vector.extract_strided_slice %595 {offsets = [0, 0], sizes = [2, 32], strides = [1, 1]} : vector<2x128xf32> to vector<2x32xf32>
    %597 = vector.extract_strided_slice %595 {offsets = [0, 32], sizes = [2, 32], strides = [1, 1]} : vector<2x128xf32> to vector<2x32xf32>
    %598 = vector.extract_strided_slice %595 {offsets = [0, 64], sizes = [2, 32], strides = [1, 1]} : vector<2x128xf32> to vector<2x32xf32>
    %599 = vector.extract_strided_slice %595 {offsets = [0, 96], sizes = [2, 32], strides = [1, 1]} : vector<2x128xf32> to vector<2x32xf32>
    %600 = arith.mulf %597, %583 : vector<2x32xf32>
    %601 = arith.mulf %596, %598 : vector<2x32xf32>
    %602 = arith.addf %600, %601 : vector<2x32xf32>
    %603 = math.tanh %602 : vector<2x32xf32>
    %604 = arith.mulf %599, %603 : vector<2x32xf32>
    %c31_i32 = arith.constant 31 : i32
    %605 = arith.index_cast %c31_i32 : i32 to index
    %c0_109 = arith.constant 0 : index
    %c0_110 = arith.constant 0 : index
    %606 = vector.load %arg9[%605, %c0_109, %c0_110] : memref<56x2x128xf32, #tpu.memory_space<vmem>>, vector<1x2x128xf32>
    %607 = vector.shape_cast %606 : vector<1x2x128xf32> to vector<2x128xf32>
    %cst_111 = arith.constant dense<0.000000e+00> : vector<2x128xf32>
    %608 = tpu.matmul %604, %11, %cst_111 {dimension_numbers = #tpu.dot_dimension_numbers<[1], [0], [0], [1], [0, 0, 1, 1], [], []>} : vector<2x32xf32>, vector<32x128xf32>, vector<2x128xf32> -> vector<2x128xf32>
    %609 = arith.addf %607, %608 : vector<2x128xf32>
    %610 = math.tanh %609 : vector<2x128xf32>
    %611 = vector.broadcast %12 : vector<1x128xf32> to vector<2x128xf32>
    %612 = arith.mulf %610, %611 : vector<2x128xf32>
    %613 = vector.broadcast %13 : vector<1x128xf32> to vector<2x128xf32>
    %614 = arith.addf %612, %613 : vector<2x128xf32>
    %615 = vector.extract_strided_slice %614 {offsets = [0, 0], sizes = [2, 32], strides = [1, 1]} : vector<2x128xf32> to vector<2x32xf32>
    %616 = vector.extract_strided_slice %614 {offsets = [0, 32], sizes = [2, 32], strides = [1, 1]} : vector<2x128xf32> to vector<2x32xf32>
    %617 = vector.extract_strided_slice %614 {offsets = [0, 64], sizes = [2, 32], strides = [1, 1]} : vector<2x128xf32> to vector<2x32xf32>
    %618 = vector.extract_strided_slice %614 {offsets = [0, 96], sizes = [2, 32], strides = [1, 1]} : vector<2x128xf32> to vector<2x32xf32>
    %619 = arith.mulf %616, %602 : vector<2x32xf32>
    %620 = arith.mulf %615, %617 : vector<2x32xf32>
    %621 = arith.addf %619, %620 : vector<2x32xf32>
    %622 = math.tanh %621 : vector<2x32xf32>
    %623 = arith.mulf %618, %622 : vector<2x32xf32>
    %c32_i32 = arith.constant 32 : i32
    %624 = arith.index_cast %c32_i32 : i32 to index
    %c0_112 = arith.constant 0 : index
    %c0_113 = arith.constant 0 : index
    %625 = vector.load %arg9[%624, %c0_112, %c0_113] : memref<56x2x128xf32, #tpu.memory_space<vmem>>, vector<1x2x128xf32>
    %626 = vector.shape_cast %625 : vector<1x2x128xf32> to vector<2x128xf32>
    %cst_114 = arith.constant dense<0.000000e+00> : vector<2x128xf32>
    %627 = tpu.matmul %623, %11, %cst_114 {dimension_numbers = #tpu.dot_dimension_numbers<[1], [0], [0], [1], [0, 0, 1, 1], [], []>} : vector<2x32xf32>, vector<32x128xf32>, vector<2x128xf32> -> vector<2x128xf32>
    %628 = arith.addf %626, %627 : vector<2x128xf32>
    %629 = math.tanh %628 : vector<2x128xf32>
    %630 = vector.broadcast %12 : vector<1x128xf32> to vector<2x128xf32>
    %631 = arith.mulf %629, %630 : vector<2x128xf32>
    %632 = vector.broadcast %13 : vector<1x128xf32> to vector<2x128xf32>
    %633 = arith.addf %631, %632 : vector<2x128xf32>
    %634 = vector.extract_strided_slice %633 {offsets = [0, 0], sizes = [2, 32], strides = [1, 1]} : vector<2x128xf32> to vector<2x32xf32>
    %635 = vector.extract_strided_slice %633 {offsets = [0, 32], sizes = [2, 32], strides = [1, 1]} : vector<2x128xf32> to vector<2x32xf32>
    %636 = vector.extract_strided_slice %633 {offsets = [0, 64], sizes = [2, 32], strides = [1, 1]} : vector<2x128xf32> to vector<2x32xf32>
    %637 = vector.extract_strided_slice %633 {offsets = [0, 96], sizes = [2, 32], strides = [1, 1]} : vector<2x128xf32> to vector<2x32xf32>
    %638 = arith.mulf %635, %621 : vector<2x32xf32>
    %639 = arith.mulf %634, %636 : vector<2x32xf32>
    %640 = arith.addf %638, %639 : vector<2x32xf32>
    %641 = math.tanh %640 : vector<2x32xf32>
    %642 = arith.mulf %637, %641 : vector<2x32xf32>
    %c33_i32 = arith.constant 33 : i32
    %643 = arith.index_cast %c33_i32 : i32 to index
    %c0_115 = arith.constant 0 : index
    %c0_116 = arith.constant 0 : index
    %644 = vector.load %arg9[%643, %c0_115, %c0_116] : memref<56x2x128xf32, #tpu.memory_space<vmem>>, vector<1x2x128xf32>
    %645 = vector.shape_cast %644 : vector<1x2x128xf32> to vector<2x128xf32>
    %cst_117 = arith.constant dense<0.000000e+00> : vector<2x128xf32>
    %646 = tpu.matmul %642, %11, %cst_117 {dimension_numbers = #tpu.dot_dimension_numbers<[1], [0], [0], [1], [0, 0, 1, 1], [], []>} : vector<2x32xf32>, vector<32x128xf32>, vector<2x128xf32> -> vector<2x128xf32>
    %647 = arith.addf %645, %646 : vector<2x128xf32>
    %648 = math.tanh %647 : vector<2x128xf32>
    %649 = vector.broadcast %12 : vector<1x128xf32> to vector<2x128xf32>
    %650 = arith.mulf %648, %649 : vector<2x128xf32>
    %651 = vector.broadcast %13 : vector<1x128xf32> to vector<2x128xf32>
    %652 = arith.addf %650, %651 : vector<2x128xf32>
    %653 = vector.extract_strided_slice %652 {offsets = [0, 0], sizes = [2, 32], strides = [1, 1]} : vector<2x128xf32> to vector<2x32xf32>
    %654 = vector.extract_strided_slice %652 {offsets = [0, 32], sizes = [2, 32], strides = [1, 1]} : vector<2x128xf32> to vector<2x32xf32>
    %655 = vector.extract_strided_slice %652 {offsets = [0, 64], sizes = [2, 32], strides = [1, 1]} : vector<2x128xf32> to vector<2x32xf32>
    %656 = vector.extract_strided_slice %652 {offsets = [0, 96], sizes = [2, 32], strides = [1, 1]} : vector<2x128xf32> to vector<2x32xf32>
    %657 = arith.mulf %654, %640 : vector<2x32xf32>
    %658 = arith.mulf %653, %655 : vector<2x32xf32>
    %659 = arith.addf %657, %658 : vector<2x32xf32>
    %660 = math.tanh %659 : vector<2x32xf32>
    %661 = arith.mulf %656, %660 : vector<2x32xf32>
    %c34_i32 = arith.constant 34 : i32
    %662 = arith.index_cast %c34_i32 : i32 to index
    %c0_118 = arith.constant 0 : index
    %c0_119 = arith.constant 0 : index
    %663 = vector.load %arg9[%662, %c0_118, %c0_119] : memref<56x2x128xf32, #tpu.memory_space<vmem>>, vector<1x2x128xf32>
    %664 = vector.shape_cast %663 : vector<1x2x128xf32> to vector<2x128xf32>
    %cst_120 = arith.constant dense<0.000000e+00> : vector<2x128xf32>
    %665 = tpu.matmul %661, %11, %cst_120 {dimension_numbers = #tpu.dot_dimension_numbers<[1], [0], [0], [1], [0, 0, 1, 1], [], []>} : vector<2x32xf32>, vector<32x128xf32>, vector<2x128xf32> -> vector<2x128xf32>
    %666 = arith.addf %664, %665 : vector<2x128xf32>
    %667 = math.tanh %666 : vector<2x128xf32>
    %668 = vector.broadcast %12 : vector<1x128xf32> to vector<2x128xf32>
    %669 = arith.mulf %667, %668 : vector<2x128xf32>
    %670 = vector.broadcast %13 : vector<1x128xf32> to vector<2x128xf32>
    %671 = arith.addf %669, %670 : vector<2x128xf32>
    %672 = vector.extract_strided_slice %671 {offsets = [0, 0], sizes = [2, 32], strides = [1, 1]} : vector<2x128xf32> to vector<2x32xf32>
    %673 = vector.extract_strided_slice %671 {offsets = [0, 32], sizes = [2, 32], strides = [1, 1]} : vector<2x128xf32> to vector<2x32xf32>
    %674 = vector.extract_strided_slice %671 {offsets = [0, 64], sizes = [2, 32], strides = [1, 1]} : vector<2x128xf32> to vector<2x32xf32>
    %675 = vector.extract_strided_slice %671 {offsets = [0, 96], sizes = [2, 32], strides = [1, 1]} : vector<2x128xf32> to vector<2x32xf32>
    %676 = arith.mulf %673, %659 : vector<2x32xf32>
    %677 = arith.mulf %672, %674 : vector<2x32xf32>
    %678 = arith.addf %676, %677 : vector<2x32xf32>
    %679 = math.tanh %678 : vector<2x32xf32>
    %680 = arith.mulf %675, %679 : vector<2x32xf32>
    %c35_i32 = arith.constant 35 : i32
    %681 = arith.index_cast %c35_i32 : i32 to index
    %c0_121 = arith.constant 0 : index
    %c0_122 = arith.constant 0 : index
    %682 = vector.load %arg9[%681, %c0_121, %c0_122] : memref<56x2x128xf32, #tpu.memory_space<vmem>>, vector<1x2x128xf32>
    %683 = vector.shape_cast %682 : vector<1x2x128xf32> to vector<2x128xf32>
    %cst_123 = arith.constant dense<0.000000e+00> : vector<2x128xf32>
    %684 = tpu.matmul %680, %11, %cst_123 {dimension_numbers = #tpu.dot_dimension_numbers<[1], [0], [0], [1], [0, 0, 1, 1], [], []>} : vector<2x32xf32>, vector<32x128xf32>, vector<2x128xf32> -> vector<2x128xf32>
    %685 = arith.addf %683, %684 : vector<2x128xf32>
    %686 = math.tanh %685 : vector<2x128xf32>
    %687 = vector.broadcast %12 : vector<1x128xf32> to vector<2x128xf32>
    %688 = arith.mulf %686, %687 : vector<2x128xf32>
    %689 = vector.broadcast %13 : vector<1x128xf32> to vector<2x128xf32>
    %690 = arith.addf %688, %689 : vector<2x128xf32>
    %691 = vector.extract_strided_slice %690 {offsets = [0, 0], sizes = [2, 32], strides = [1, 1]} : vector<2x128xf32> to vector<2x32xf32>
    %692 = vector.extract_strided_slice %690 {offsets = [0, 32], sizes = [2, 32], strides = [1, 1]} : vector<2x128xf32> to vector<2x32xf32>
    %693 = vector.extract_strided_slice %690 {offsets = [0, 64], sizes = [2, 32], strides = [1, 1]} : vector<2x128xf32> to vector<2x32xf32>
    %694 = vector.extract_strided_slice %690 {offsets = [0, 96], sizes = [2, 32], strides = [1, 1]} : vector<2x128xf32> to vector<2x32xf32>
    %695 = arith.mulf %692, %678 : vector<2x32xf32>
    %696 = arith.mulf %691, %693 : vector<2x32xf32>
    %697 = arith.addf %695, %696 : vector<2x32xf32>
    %698 = math.tanh %697 : vector<2x32xf32>
    %699 = arith.mulf %694, %698 : vector<2x32xf32>
    %c36_i32 = arith.constant 36 : i32
    %700 = arith.index_cast %c36_i32 : i32 to index
    %c0_124 = arith.constant 0 : index
    %c0_125 = arith.constant 0 : index
    %701 = vector.load %arg9[%700, %c0_124, %c0_125] : memref<56x2x128xf32, #tpu.memory_space<vmem>>, vector<1x2x128xf32>
    %702 = vector.shape_cast %701 : vector<1x2x128xf32> to vector<2x128xf32>
    %cst_126 = arith.constant dense<0.000000e+00> : vector<2x128xf32>
    %703 = tpu.matmul %699, %11, %cst_126 {dimension_numbers = #tpu.dot_dimension_numbers<[1], [0], [0], [1], [0, 0, 1, 1], [], []>} : vector<2x32xf32>, vector<32x128xf32>, vector<2x128xf32> -> vector<2x128xf32>
    %704 = arith.addf %702, %703 : vector<2x128xf32>
    %705 = math.tanh %704 : vector<2x128xf32>
    %706 = vector.broadcast %12 : vector<1x128xf32> to vector<2x128xf32>
    %707 = arith.mulf %705, %706 : vector<2x128xf32>
    %708 = vector.broadcast %13 : vector<1x128xf32> to vector<2x128xf32>
    %709 = arith.addf %707, %708 : vector<2x128xf32>
    %710 = vector.extract_strided_slice %709 {offsets = [0, 0], sizes = [2, 32], strides = [1, 1]} : vector<2x128xf32> to vector<2x32xf32>
    %711 = vector.extract_strided_slice %709 {offsets = [0, 32], sizes = [2, 32], strides = [1, 1]} : vector<2x128xf32> to vector<2x32xf32>
    %712 = vector.extract_strided_slice %709 {offsets = [0, 64], sizes = [2, 32], strides = [1, 1]} : vector<2x128xf32> to vector<2x32xf32>
    %713 = vector.extract_strided_slice %709 {offsets = [0, 96], sizes = [2, 32], strides = [1, 1]} : vector<2x128xf32> to vector<2x32xf32>
    %714 = arith.mulf %711, %697 : vector<2x32xf32>
    %715 = arith.mulf %710, %712 : vector<2x32xf32>
    %716 = arith.addf %714, %715 : vector<2x32xf32>
    %717 = math.tanh %716 : vector<2x32xf32>
    %718 = arith.mulf %713, %717 : vector<2x32xf32>
    %c37_i32 = arith.constant 37 : i32
    %719 = arith.index_cast %c37_i32 : i32 to index
    %c0_127 = arith.constant 0 : index
    %c0_128 = arith.constant 0 : index
    %720 = vector.load %arg9[%719, %c0_127, %c0_128] : memref<56x2x128xf32, #tpu.memory_space<vmem>>, vector<1x2x128xf32>
    %721 = vector.shape_cast %720 : vector<1x2x128xf32> to vector<2x128xf32>
    %cst_129 = arith.constant dense<0.000000e+00> : vector<2x128xf32>
    %722 = tpu.matmul %718, %11, %cst_129 {dimension_numbers = #tpu.dot_dimension_numbers<[1], [0], [0], [1], [0, 0, 1, 1], [], []>} : vector<2x32xf32>, vector<32x128xf32>, vector<2x128xf32> -> vector<2x128xf32>
    %723 = arith.addf %721, %722 : vector<2x128xf32>
    %724 = math.tanh %723 : vector<2x128xf32>
    %725 = vector.broadcast %12 : vector<1x128xf32> to vector<2x128xf32>
    %726 = arith.mulf %724, %725 : vector<2x128xf32>
    %727 = vector.broadcast %13 : vector<1x128xf32> to vector<2x128xf32>
    %728 = arith.addf %726, %727 : vector<2x128xf32>
    %729 = vector.extract_strided_slice %728 {offsets = [0, 0], sizes = [2, 32], strides = [1, 1]} : vector<2x128xf32> to vector<2x32xf32>
    %730 = vector.extract_strided_slice %728 {offsets = [0, 32], sizes = [2, 32], strides = [1, 1]} : vector<2x128xf32> to vector<2x32xf32>
    %731 = vector.extract_strided_slice %728 {offsets = [0, 64], sizes = [2, 32], strides = [1, 1]} : vector<2x128xf32> to vector<2x32xf32>
    %732 = vector.extract_strided_slice %728 {offsets = [0, 96], sizes = [2, 32], strides = [1, 1]} : vector<2x128xf32> to vector<2x32xf32>
    %733 = arith.mulf %730, %716 : vector<2x32xf32>
    %734 = arith.mulf %729, %731 : vector<2x32xf32>
    %735 = arith.addf %733, %734 : vector<2x32xf32>
    %736 = math.tanh %735 : vector<2x32xf32>
    %737 = arith.mulf %732, %736 : vector<2x32xf32>
    %c38_i32 = arith.constant 38 : i32
    %738 = arith.index_cast %c38_i32 : i32 to index
    %c0_130 = arith.constant 0 : index
    %c0_131 = arith.constant 0 : index
    %739 = vector.load %arg9[%738, %c0_130, %c0_131] : memref<56x2x128xf32, #tpu.memory_space<vmem>>, vector<1x2x128xf32>
    %740 = vector.shape_cast %739 : vector<1x2x128xf32> to vector<2x128xf32>
    %cst_132 = arith.constant dense<0.000000e+00> : vector<2x128xf32>
    %741 = tpu.matmul %737, %11, %cst_132 {dimension_numbers = #tpu.dot_dimension_numbers<[1], [0], [0], [1], [0, 0, 1, 1], [], []>} : vector<2x32xf32>, vector<32x128xf32>, vector<2x128xf32> -> vector<2x128xf32>
    %742 = arith.addf %740, %741 : vector<2x128xf32>
    %743 = math.tanh %742 : vector<2x128xf32>
    %744 = vector.broadcast %12 : vector<1x128xf32> to vector<2x128xf32>
    %745 = arith.mulf %743, %744 : vector<2x128xf32>
    %746 = vector.broadcast %13 : vector<1x128xf32> to vector<2x128xf32>
    %747 = arith.addf %745, %746 : vector<2x128xf32>
    %748 = vector.extract_strided_slice %747 {offsets = [0, 0], sizes = [2, 32], strides = [1, 1]} : vector<2x128xf32> to vector<2x32xf32>
    %749 = vector.extract_strided_slice %747 {offsets = [0, 32], sizes = [2, 32], strides = [1, 1]} : vector<2x128xf32> to vector<2x32xf32>
    %750 = vector.extract_strided_slice %747 {offsets = [0, 64], sizes = [2, 32], strides = [1, 1]} : vector<2x128xf32> to vector<2x32xf32>
    %751 = vector.extract_strided_slice %747 {offsets = [0, 96], sizes = [2, 32], strides = [1, 1]} : vector<2x128xf32> to vector<2x32xf32>
    %752 = arith.mulf %749, %735 : vector<2x32xf32>
    %753 = arith.mulf %748, %750 : vector<2x32xf32>
    %754 = arith.addf %752, %753 : vector<2x32xf32>
    %755 = math.tanh %754 : vector<2x32xf32>
    %756 = arith.mulf %751, %755 : vector<2x32xf32>
    %c39_i32 = arith.constant 39 : i32
    %757 = arith.index_cast %c39_i32 : i32 to index
    %c0_133 = arith.constant 0 : index
    %c0_134 = arith.constant 0 : index
    %758 = vector.load %arg9[%757, %c0_133, %c0_134] : memref<56x2x128xf32, #tpu.memory_space<vmem>>, vector<1x2x128xf32>
    %759 = vector.shape_cast %758 : vector<1x2x128xf32> to vector<2x128xf32>
    %cst_135 = arith.constant dense<0.000000e+00> : vector<2x128xf32>
    %760 = tpu.matmul %756, %11, %cst_135 {dimension_numbers = #tpu.dot_dimension_numbers<[1], [0], [0], [1], [0, 0, 1, 1], [], []>} : vector<2x32xf32>, vector<32x128xf32>, vector<2x128xf32> -> vector<2x128xf32>
    %761 = arith.addf %759, %760 : vector<2x128xf32>
    %762 = math.tanh %761 : vector<2x128xf32>
    %763 = vector.broadcast %12 : vector<1x128xf32> to vector<2x128xf32>
    %764 = arith.mulf %762, %763 : vector<2x128xf32>
    %765 = vector.broadcast %13 : vector<1x128xf32> to vector<2x128xf32>
    %766 = arith.addf %764, %765 : vector<2x128xf32>
    %767 = vector.extract_strided_slice %766 {offsets = [0, 0], sizes = [2, 32], strides = [1, 1]} : vector<2x128xf32> to vector<2x32xf32>
    %768 = vector.extract_strided_slice %766 {offsets = [0, 32], sizes = [2, 32], strides = [1, 1]} : vector<2x128xf32> to vector<2x32xf32>
    %769 = vector.extract_strided_slice %766 {offsets = [0, 64], sizes = [2, 32], strides = [1, 1]} : vector<2x128xf32> to vector<2x32xf32>
    %770 = vector.extract_strided_slice %766 {offsets = [0, 96], sizes = [2, 32], strides = [1, 1]} : vector<2x128xf32> to vector<2x32xf32>
    %771 = arith.mulf %768, %754 : vector<2x32xf32>
    %772 = arith.mulf %767, %769 : vector<2x32xf32>
    %773 = arith.addf %771, %772 : vector<2x32xf32>
    %774 = math.tanh %773 : vector<2x32xf32>
    %775 = arith.mulf %770, %774 : vector<2x32xf32>
    %c40_i32 = arith.constant 40 : i32
    %776 = arith.index_cast %c40_i32 : i32 to index
    %c0_136 = arith.constant 0 : index
    %c0_137 = arith.constant 0 : index
    %777 = vector.load %arg9[%776, %c0_136, %c0_137] : memref<56x2x128xf32, #tpu.memory_space<vmem>>, vector<1x2x128xf32>
    %778 = vector.shape_cast %777 : vector<1x2x128xf32> to vector<2x128xf32>
    %cst_138 = arith.constant dense<0.000000e+00> : vector<2x128xf32>
    %779 = tpu.matmul %775, %11, %cst_138 {dimension_numbers = #tpu.dot_dimension_numbers<[1], [0], [0], [1], [0, 0, 1, 1], [], []>} : vector<2x32xf32>, vector<32x128xf32>, vector<2x128xf32> -> vector<2x128xf32>
    %780 = arith.addf %778, %779 : vector<2x128xf32>
    %781 = math.tanh %780 : vector<2x128xf32>
    %782 = vector.broadcast %12 : vector<1x128xf32> to vector<2x128xf32>
    %783 = arith.mulf %781, %782 : vector<2x128xf32>
    %784 = vector.broadcast %13 : vector<1x128xf32> to vector<2x128xf32>
    %785 = arith.addf %783, %784 : vector<2x128xf32>
    %786 = vector.extract_strided_slice %785 {offsets = [0, 0], sizes = [2, 32], strides = [1, 1]} : vector<2x128xf32> to vector<2x32xf32>
    %787 = vector.extract_strided_slice %785 {offsets = [0, 32], sizes = [2, 32], strides = [1, 1]} : vector<2x128xf32> to vector<2x32xf32>
    %788 = vector.extract_strided_slice %785 {offsets = [0, 64], sizes = [2, 32], strides = [1, 1]} : vector<2x128xf32> to vector<2x32xf32>
    %789 = vector.extract_strided_slice %785 {offsets = [0, 96], sizes = [2, 32], strides = [1, 1]} : vector<2x128xf32> to vector<2x32xf32>
    %790 = arith.mulf %787, %773 : vector<2x32xf32>
    %791 = arith.mulf %786, %788 : vector<2x32xf32>
    %792 = arith.addf %790, %791 : vector<2x32xf32>
    %793 = math.tanh %792 : vector<2x32xf32>
    %794 = arith.mulf %789, %793 : vector<2x32xf32>
    %c41_i32 = arith.constant 41 : i32
    %795 = arith.index_cast %c41_i32 : i32 to index
    %c0_139 = arith.constant 0 : index
    %c0_140 = arith.constant 0 : index
    %796 = vector.load %arg9[%795, %c0_139, %c0_140] : memref<56x2x128xf32, #tpu.memory_space<vmem>>, vector<1x2x128xf32>
    %797 = vector.shape_cast %796 : vector<1x2x128xf32> to vector<2x128xf32>
    %cst_141 = arith.constant dense<0.000000e+00> : vector<2x128xf32>
    %798 = tpu.matmul %794, %11, %cst_141 {dimension_numbers = #tpu.dot_dimension_numbers<[1], [0], [0], [1], [0, 0, 1, 1], [], []>} : vector<2x32xf32>, vector<32x128xf32>, vector<2x128xf32> -> vector<2x128xf32>
    %799 = arith.addf %797, %798 : vector<2x128xf32>
    %800 = math.tanh %799 : vector<2x128xf32>
    %801 = vector.broadcast %12 : vector<1x128xf32> to vector<2x128xf32>
    %802 = arith.mulf %800, %801 : vector<2x128xf32>
    %803 = vector.broadcast %13 : vector<1x128xf32> to vector<2x128xf32>
    %804 = arith.addf %802, %803 : vector<2x128xf32>
    %805 = vector.extract_strided_slice %804 {offsets = [0, 0], sizes = [2, 32], strides = [1, 1]} : vector<2x128xf32> to vector<2x32xf32>
    %806 = vector.extract_strided_slice %804 {offsets = [0, 32], sizes = [2, 32], strides = [1, 1]} : vector<2x128xf32> to vector<2x32xf32>
    %807 = vector.extract_strided_slice %804 {offsets = [0, 64], sizes = [2, 32], strides = [1, 1]} : vector<2x128xf32> to vector<2x32xf32>
    %808 = vector.extract_strided_slice %804 {offsets = [0, 96], sizes = [2, 32], strides = [1, 1]} : vector<2x128xf32> to vector<2x32xf32>
    %809 = arith.mulf %806, %792 : vector<2x32xf32>
    %810 = arith.mulf %805, %807 : vector<2x32xf32>
    %811 = arith.addf %809, %810 : vector<2x32xf32>
    %812 = math.tanh %811 : vector<2x32xf32>
    %813 = arith.mulf %808, %812 : vector<2x32xf32>
    %c42_i32 = arith.constant 42 : i32
    %814 = arith.index_cast %c42_i32 : i32 to index
    %c0_142 = arith.constant 0 : index
    %c0_143 = arith.constant 0 : index
    %815 = vector.load %arg9[%814, %c0_142, %c0_143] : memref<56x2x128xf32, #tpu.memory_space<vmem>>, vector<1x2x128xf32>
    %816 = vector.shape_cast %815 : vector<1x2x128xf32> to vector<2x128xf32>
    %cst_144 = arith.constant dense<0.000000e+00> : vector<2x128xf32>
    %817 = tpu.matmul %813, %11, %cst_144 {dimension_numbers = #tpu.dot_dimension_numbers<[1], [0], [0], [1], [0, 0, 1, 1], [], []>} : vector<2x32xf32>, vector<32x128xf32>, vector<2x128xf32> -> vector<2x128xf32>
    %818 = arith.addf %816, %817 : vector<2x128xf32>
    %819 = math.tanh %818 : vector<2x128xf32>
    %820 = vector.broadcast %12 : vector<1x128xf32> to vector<2x128xf32>
    %821 = arith.mulf %819, %820 : vector<2x128xf32>
    %822 = vector.broadcast %13 : vector<1x128xf32> to vector<2x128xf32>
    %823 = arith.addf %821, %822 : vector<2x128xf32>
    %824 = vector.extract_strided_slice %823 {offsets = [0, 0], sizes = [2, 32], strides = [1, 1]} : vector<2x128xf32> to vector<2x32xf32>
    %825 = vector.extract_strided_slice %823 {offsets = [0, 32], sizes = [2, 32], strides = [1, 1]} : vector<2x128xf32> to vector<2x32xf32>
    %826 = vector.extract_strided_slice %823 {offsets = [0, 64], sizes = [2, 32], strides = [1, 1]} : vector<2x128xf32> to vector<2x32xf32>
    %827 = vector.extract_strided_slice %823 {offsets = [0, 96], sizes = [2, 32], strides = [1, 1]} : vector<2x128xf32> to vector<2x32xf32>
    %828 = arith.mulf %825, %811 : vector<2x32xf32>
    %829 = arith.mulf %824, %826 : vector<2x32xf32>
    %830 = arith.addf %828, %829 : vector<2x32xf32>
    %831 = math.tanh %830 : vector<2x32xf32>
    %832 = arith.mulf %827, %831 : vector<2x32xf32>
    %c43_i32 = arith.constant 43 : i32
    %833 = arith.index_cast %c43_i32 : i32 to index
    %c0_145 = arith.constant 0 : index
    %c0_146 = arith.constant 0 : index
    %834 = vector.load %arg9[%833, %c0_145, %c0_146] : memref<56x2x128xf32, #tpu.memory_space<vmem>>, vector<1x2x128xf32>
    %835 = vector.shape_cast %834 : vector<1x2x128xf32> to vector<2x128xf32>
    %cst_147 = arith.constant dense<0.000000e+00> : vector<2x128xf32>
    %836 = tpu.matmul %832, %11, %cst_147 {dimension_numbers = #tpu.dot_dimension_numbers<[1], [0], [0], [1], [0, 0, 1, 1], [], []>} : vector<2x32xf32>, vector<32x128xf32>, vector<2x128xf32> -> vector<2x128xf32>
    %837 = arith.addf %835, %836 : vector<2x128xf32>
    %838 = math.tanh %837 : vector<2x128xf32>
    %839 = vector.broadcast %12 : vector<1x128xf32> to vector<2x128xf32>
    %840 = arith.mulf %838, %839 : vector<2x128xf32>
    %841 = vector.broadcast %13 : vector<1x128xf32> to vector<2x128xf32>
    %842 = arith.addf %840, %841 : vector<2x128xf32>
    %843 = vector.extract_strided_slice %842 {offsets = [0, 0], sizes = [2, 32], strides = [1, 1]} : vector<2x128xf32> to vector<2x32xf32>
    %844 = vector.extract_strided_slice %842 {offsets = [0, 32], sizes = [2, 32], strides = [1, 1]} : vector<2x128xf32> to vector<2x32xf32>
    %845 = vector.extract_strided_slice %842 {offsets = [0, 64], sizes = [2, 32], strides = [1, 1]} : vector<2x128xf32> to vector<2x32xf32>
    %846 = vector.extract_strided_slice %842 {offsets = [0, 96], sizes = [2, 32], strides = [1, 1]} : vector<2x128xf32> to vector<2x32xf32>
    %847 = arith.mulf %844, %830 : vector<2x32xf32>
    %848 = arith.mulf %843, %845 : vector<2x32xf32>
    %849 = arith.addf %847, %848 : vector<2x32xf32>
    %850 = math.tanh %849 : vector<2x32xf32>
    %851 = arith.mulf %846, %850 : vector<2x32xf32>
    %c44_i32 = arith.constant 44 : i32
    %852 = arith.index_cast %c44_i32 : i32 to index
    %c0_148 = arith.constant 0 : index
    %c0_149 = arith.constant 0 : index
    %853 = vector.load %arg9[%852, %c0_148, %c0_149] : memref<56x2x128xf32, #tpu.memory_space<vmem>>, vector<1x2x128xf32>
    %854 = vector.shape_cast %853 : vector<1x2x128xf32> to vector<2x128xf32>
    %cst_150 = arith.constant dense<0.000000e+00> : vector<2x128xf32>
    %855 = tpu.matmul %851, %11, %cst_150 {dimension_numbers = #tpu.dot_dimension_numbers<[1], [0], [0], [1], [0, 0, 1, 1], [], []>} : vector<2x32xf32>, vector<32x128xf32>, vector<2x128xf32> -> vector<2x128xf32>
    %856 = arith.addf %854, %855 : vector<2x128xf32>
    %857 = math.tanh %856 : vector<2x128xf32>
    %858 = vector.broadcast %12 : vector<1x128xf32> to vector<2x128xf32>
    %859 = arith.mulf %857, %858 : vector<2x128xf32>
    %860 = vector.broadcast %13 : vector<1x128xf32> to vector<2x128xf32>
    %861 = arith.addf %859, %860 : vector<2x128xf32>
    %862 = vector.extract_strided_slice %861 {offsets = [0, 0], sizes = [2, 32], strides = [1, 1]} : vector<2x128xf32> to vector<2x32xf32>
    %863 = vector.extract_strided_slice %861 {offsets = [0, 32], sizes = [2, 32], strides = [1, 1]} : vector<2x128xf32> to vector<2x32xf32>
    %864 = vector.extract_strided_slice %861 {offsets = [0, 64], sizes = [2, 32], strides = [1, 1]} : vector<2x128xf32> to vector<2x32xf32>
    %865 = vector.extract_strided_slice %861 {offsets = [0, 96], sizes = [2, 32], strides = [1, 1]} : vector<2x128xf32> to vector<2x32xf32>
    %866 = arith.mulf %863, %849 : vector<2x32xf32>
    %867 = arith.mulf %862, %864 : vector<2x32xf32>
    %868 = arith.addf %866, %867 : vector<2x32xf32>
    %869 = math.tanh %868 : vector<2x32xf32>
    %870 = arith.mulf %865, %869 : vector<2x32xf32>
    %c45_i32 = arith.constant 45 : i32
    %871 = arith.index_cast %c45_i32 : i32 to index
    %c0_151 = arith.constant 0 : index
    %c0_152 = arith.constant 0 : index
    %872 = vector.load %arg9[%871, %c0_151, %c0_152] : memref<56x2x128xf32, #tpu.memory_space<vmem>>, vector<1x2x128xf32>
    %873 = vector.shape_cast %872 : vector<1x2x128xf32> to vector<2x128xf32>
    %cst_153 = arith.constant dense<0.000000e+00> : vector<2x128xf32>
    %874 = tpu.matmul %870, %11, %cst_153 {dimension_numbers = #tpu.dot_dimension_numbers<[1], [0], [0], [1], [0, 0, 1, 1], [], []>} : vector<2x32xf32>, vector<32x128xf32>, vector<2x128xf32> -> vector<2x128xf32>
    %875 = arith.addf %873, %874 : vector<2x128xf32>
    %876 = math.tanh %875 : vector<2x128xf32>
    %877 = vector.broadcast %12 : vector<1x128xf32> to vector<2x128xf32>
    %878 = arith.mulf %876, %877 : vector<2x128xf32>
    %879 = vector.broadcast %13 : vector<1x128xf32> to vector<2x128xf32>
    %880 = arith.addf %878, %879 : vector<2x128xf32>
    %881 = vector.extract_strided_slice %880 {offsets = [0, 0], sizes = [2, 32], strides = [1, 1]} : vector<2x128xf32> to vector<2x32xf32>
    %882 = vector.extract_strided_slice %880 {offsets = [0, 32], sizes = [2, 32], strides = [1, 1]} : vector<2x128xf32> to vector<2x32xf32>
    %883 = vector.extract_strided_slice %880 {offsets = [0, 64], sizes = [2, 32], strides = [1, 1]} : vector<2x128xf32> to vector<2x32xf32>
    %884 = vector.extract_strided_slice %880 {offsets = [0, 96], sizes = [2, 32], strides = [1, 1]} : vector<2x128xf32> to vector<2x32xf32>
    %885 = arith.mulf %882, %868 : vector<2x32xf32>
    %886 = arith.mulf %881, %883 : vector<2x32xf32>
    %887 = arith.addf %885, %886 : vector<2x32xf32>
    %888 = math.tanh %887 : vector<2x32xf32>
    %889 = arith.mulf %884, %888 : vector<2x32xf32>
    %c46_i32 = arith.constant 46 : i32
    %890 = arith.index_cast %c46_i32 : i32 to index
    %c0_154 = arith.constant 0 : index
    %c0_155 = arith.constant 0 : index
    %891 = vector.load %arg9[%890, %c0_154, %c0_155] : memref<56x2x128xf32, #tpu.memory_space<vmem>>, vector<1x2x128xf32>
    %892 = vector.shape_cast %891 : vector<1x2x128xf32> to vector<2x128xf32>
    %cst_156 = arith.constant dense<0.000000e+00> : vector<2x128xf32>
    %893 = tpu.matmul %889, %11, %cst_156 {dimension_numbers = #tpu.dot_dimension_numbers<[1], [0], [0], [1], [0, 0, 1, 1], [], []>} : vector<2x32xf32>, vector<32x128xf32>, vector<2x128xf32> -> vector<2x128xf32>
    %894 = arith.addf %892, %893 : vector<2x128xf32>
    %895 = math.tanh %894 : vector<2x128xf32>
    %896 = vector.broadcast %12 : vector<1x128xf32> to vector<2x128xf32>
    %897 = arith.mulf %895, %896 : vector<2x128xf32>
    %898 = vector.broadcast %13 : vector<1x128xf32> to vector<2x128xf32>
    %899 = arith.addf %897, %898 : vector<2x128xf32>
    %900 = vector.extract_strided_slice %899 {offsets = [0, 0], sizes = [2, 32], strides = [1, 1]} : vector<2x128xf32> to vector<2x32xf32>
    %901 = vector.extract_strided_slice %899 {offsets = [0, 32], sizes = [2, 32], strides = [1, 1]} : vector<2x128xf32> to vector<2x32xf32>
    %902 = vector.extract_strided_slice %899 {offsets = [0, 64], sizes = [2, 32], strides = [1, 1]} : vector<2x128xf32> to vector<2x32xf32>
    %903 = vector.extract_strided_slice %899 {offsets = [0, 96], sizes = [2, 32], strides = [1, 1]} : vector<2x128xf32> to vector<2x32xf32>
    %904 = arith.mulf %901, %887 : vector<2x32xf32>
    %905 = arith.mulf %900, %902 : vector<2x32xf32>
    %906 = arith.addf %904, %905 : vector<2x32xf32>
    %907 = math.tanh %906 : vector<2x32xf32>
    %908 = arith.mulf %903, %907 : vector<2x32xf32>
    %c47_i32 = arith.constant 47 : i32
    %909 = arith.index_cast %c47_i32 : i32 to index
    %c0_157 = arith.constant 0 : index
    %c0_158 = arith.constant 0 : index
    %910 = vector.load %arg9[%909, %c0_157, %c0_158] : memref<56x2x128xf32, #tpu.memory_space<vmem>>, vector<1x2x128xf32>
    %911 = vector.shape_cast %910 : vector<1x2x128xf32> to vector<2x128xf32>
    %cst_159 = arith.constant dense<0.000000e+00> : vector<2x128xf32>
    %912 = tpu.matmul %908, %11, %cst_159 {dimension_numbers = #tpu.dot_dimension_numbers<[1], [0], [0], [1], [0, 0, 1, 1], [], []>} : vector<2x32xf32>, vector<32x128xf32>, vector<2x128xf32> -> vector<2x128xf32>
    %913 = arith.addf %911, %912 : vector<2x128xf32>
    %914 = math.tanh %913 : vector<2x128xf32>
    %915 = vector.broadcast %12 : vector<1x128xf32> to vector<2x128xf32>
    %916 = arith.mulf %914, %915 : vector<2x128xf32>
    %917 = vector.broadcast %13 : vector<1x128xf32> to vector<2x128xf32>
    %918 = arith.addf %916, %917 : vector<2x128xf32>
    %919 = vector.extract_strided_slice %918 {offsets = [0, 0], sizes = [2, 32], strides = [1, 1]} : vector<2x128xf32> to vector<2x32xf32>
    %920 = vector.extract_strided_slice %918 {offsets = [0, 32], sizes = [2, 32], strides = [1, 1]} : vector<2x128xf32> to vector<2x32xf32>
    %921 = vector.extract_strided_slice %918 {offsets = [0, 64], sizes = [2, 32], strides = [1, 1]} : vector<2x128xf32> to vector<2x32xf32>
    %922 = vector.extract_strided_slice %918 {offsets = [0, 96], sizes = [2, 32], strides = [1, 1]} : vector<2x128xf32> to vector<2x32xf32>
    %923 = arith.mulf %920, %906 : vector<2x32xf32>
    %924 = arith.mulf %919, %921 : vector<2x32xf32>
    %925 = arith.addf %923, %924 : vector<2x32xf32>
    %926 = math.tanh %925 : vector<2x32xf32>
    %927 = arith.mulf %922, %926 : vector<2x32xf32>
    %c48_i32 = arith.constant 48 : i32
    %928 = arith.index_cast %c48_i32 : i32 to index
    %c0_160 = arith.constant 0 : index
    %c0_161 = arith.constant 0 : index
    %929 = vector.load %arg9[%928, %c0_160, %c0_161] : memref<56x2x128xf32, #tpu.memory_space<vmem>>, vector<1x2x128xf32>
    %930 = vector.shape_cast %929 : vector<1x2x128xf32> to vector<2x128xf32>
    %cst_162 = arith.constant dense<0.000000e+00> : vector<2x128xf32>
    %931 = tpu.matmul %927, %11, %cst_162 {dimension_numbers = #tpu.dot_dimension_numbers<[1], [0], [0], [1], [0, 0, 1, 1], [], []>} : vector<2x32xf32>, vector<32x128xf32>, vector<2x128xf32> -> vector<2x128xf32>
    %932 = arith.addf %930, %931 : vector<2x128xf32>
    %933 = math.tanh %932 : vector<2x128xf32>
    %934 = vector.broadcast %12 : vector<1x128xf32> to vector<2x128xf32>
    %935 = arith.mulf %933, %934 : vector<2x128xf32>
    %936 = vector.broadcast %13 : vector<1x128xf32> to vector<2x128xf32>
    %937 = arith.addf %935, %936 : vector<2x128xf32>
    %938 = vector.extract_strided_slice %937 {offsets = [0, 0], sizes = [2, 32], strides = [1, 1]} : vector<2x128xf32> to vector<2x32xf32>
    %939 = vector.extract_strided_slice %937 {offsets = [0, 32], sizes = [2, 32], strides = [1, 1]} : vector<2x128xf32> to vector<2x32xf32>
    %940 = vector.extract_strided_slice %937 {offsets = [0, 64], sizes = [2, 32], strides = [1, 1]} : vector<2x128xf32> to vector<2x32xf32>
    %941 = vector.extract_strided_slice %937 {offsets = [0, 96], sizes = [2, 32], strides = [1, 1]} : vector<2x128xf32> to vector<2x32xf32>
    %942 = arith.mulf %939, %925 : vector<2x32xf32>
    %943 = arith.mulf %938, %940 : vector<2x32xf32>
    %944 = arith.addf %942, %943 : vector<2x32xf32>
    %945 = math.tanh %944 : vector<2x32xf32>
    %946 = arith.mulf %941, %945 : vector<2x32xf32>
    %c49_i32 = arith.constant 49 : i32
    %c49_i32_163 = arith.constant 49 : i32
    %947 = arith.index_cast %c49_i32_163 : i32 to index
    %c0_164 = arith.constant 0 : index
    %c0_165 = arith.constant 0 : index
    %948 = vector.load %arg9[%947, %c0_164, %c0_165] : memref<56x2x128xf32, #tpu.memory_space<vmem>>, vector<1x2x128xf32>
    %949 = vector.shape_cast %948 : vector<1x2x128xf32> to vector<2x128xf32>
    %cst_166 = arith.constant dense<0.000000e+00> : vector<2x128xf32>
    %950 = tpu.matmul %946, %11, %cst_166 {dimension_numbers = #tpu.dot_dimension_numbers<[1], [0], [0], [1], [0, 0, 1, 1], [], []>} : vector<2x32xf32>, vector<32x128xf32>, vector<2x128xf32> -> vector<2x128xf32>
    %951 = arith.addf %949, %950 : vector<2x128xf32>
    %952 = math.tanh %951 : vector<2x128xf32>
    %953 = vector.broadcast %12 : vector<1x128xf32> to vector<2x128xf32>
    %954 = arith.mulf %952, %953 : vector<2x128xf32>
    %955 = vector.broadcast %13 : vector<1x128xf32> to vector<2x128xf32>
    %956 = arith.addf %954, %955 : vector<2x128xf32>
    %957 = vector.extract_strided_slice %956 {offsets = [0, 0], sizes = [2, 32], strides = [1, 1]} : vector<2x128xf32> to vector<2x32xf32>
    %958 = vector.extract_strided_slice %956 {offsets = [0, 32], sizes = [2, 32], strides = [1, 1]} : vector<2x128xf32> to vector<2x32xf32>
    %959 = vector.extract_strided_slice %956 {offsets = [0, 64], sizes = [2, 32], strides = [1, 1]} : vector<2x128xf32> to vector<2x32xf32>
    %960 = vector.extract_strided_slice %956 {offsets = [0, 96], sizes = [2, 32], strides = [1, 1]} : vector<2x128xf32> to vector<2x32xf32>
    %961 = arith.mulf %958, %944 : vector<2x32xf32>
    %962 = arith.mulf %957, %959 : vector<2x32xf32>
    %963 = arith.addf %961, %962 : vector<2x32xf32>
    %964 = math.tanh %963 : vector<2x32xf32>
    %965 = arith.mulf %960, %964 : vector<2x32xf32>
    %c49_i32_167 = arith.constant 49 : i32
    %966 = arith.subi %c49_i32_163, %c49_i32_167 : i32
    %967 = arith.index_cast %966 : i32 to index
    %c0_168 = arith.constant 0 : index
    %c0_169 = arith.constant 0 : index
    %968 = vector.load %arg10[%967, %c0_168, %c0_169] : memref<7x2x32xf32, #tpu.memory_space<vmem>>, vector<1x2x32xf32>
    %969 = vector.shape_cast %968 : vector<1x2x32xf32> to vector<2x32xf32>
    %970 = vector.shape_cast %965 : vector<2x32xf32> to vector<1x2x32xf32>
    tpu.vector_store %arg10[%967, %c0_168, %c0_169], %970 {strides = array<i32>} : memref<7x2x32xf32, #tpu.memory_space<vmem>>, vector<1x2x32xf32>,
    %c50_i32 = arith.constant 50 : i32
    %971 = arith.index_cast %c50_i32 : i32 to index
    %c0_170 = arith.constant 0 : index
    %c0_171 = arith.constant 0 : index
    %972 = vector.load %arg9[%971, %c0_170, %c0_171] : memref<56x2x128xf32, #tpu.memory_space<vmem>>, vector<1x2x128xf32>
    %973 = vector.shape_cast %972 : vector<1x2x128xf32> to vector<2x128xf32>
    %cst_172 = arith.constant dense<0.000000e+00> : vector<2x128xf32>
    %974 = tpu.matmul %965, %11, %cst_172 {dimension_numbers = #tpu.dot_dimension_numbers<[1], [0], [0], [1], [0, 0, 1, 1], [], []>} : vector<2x32xf32>, vector<32x128xf32>, vector<2x128xf32> -> vector<2x128xf32>
    %975 = arith.addf %973, %974 : vector<2x128xf32>
    %976 = math.tanh %975 : vector<2x128xf32>
    %977 = vector.broadcast %12 : vector<1x128xf32> to vector<2x128xf32>
    %978 = arith.mulf %976, %977 : vector<2x128xf32>
    %979 = vector.broadcast %13 : vector<1x128xf32> to vector<2x128xf32>
    %980 = arith.addf %978, %979 : vector<2x128xf32>
    %981 = vector.extract_strided_slice %980 {offsets = [0, 0], sizes = [2, 32], strides = [1, 1]} : vector<2x128xf32> to vector<2x32xf32>
    %982 = vector.extract_strided_slice %980 {offsets = [0, 32], sizes = [2, 32], strides = [1, 1]} : vector<2x128xf32> to vector<2x32xf32>
    %983 = vector.extract_strided_slice %980 {offsets = [0, 64], sizes = [2, 32], strides = [1, 1]} : vector<2x128xf32> to vector<2x32xf32>
    %984 = vector.extract_strided_slice %980 {offsets = [0, 96], sizes = [2, 32], strides = [1, 1]} : vector<2x128xf32> to vector<2x32xf32>
    %985 = arith.mulf %982, %963 : vector<2x32xf32>
    %986 = arith.mulf %981, %983 : vector<2x32xf32>
    %987 = arith.addf %985, %986 : vector<2x32xf32>
    %988 = math.tanh %987 : vector<2x32xf32>
    %989 = arith.mulf %984, %988 : vector<2x32xf32>
    %c49_i32_173 = arith.constant 49 : i32
    %990 = arith.subi %c50_i32, %c49_i32_173 : i32
    %991 = arith.index_cast %990 : i32 to index
    %c0_174 = arith.constant 0 : index
    %c0_175 = arith.constant 0 : index
    %992 = vector.load %arg10[%991, %c0_174, %c0_175] : memref<7x2x32xf32, #tpu.memory_space<vmem>>, vector<1x2x32xf32>
    %993 = vector.shape_cast %992 : vector<1x2x32xf32> to vector<2x32xf32>
    %994 = vector.shape_cast %989 : vector<2x32xf32> to vector<1x2x32xf32>
    tpu.vector_store %arg10[%991, %c0_174, %c0_175], %994 {strides = array<i32>} : memref<7x2x32xf32, #tpu.memory_space<vmem>>, vector<1x2x32xf32>,
    %c51_i32 = arith.constant 51 : i32
    %995 = arith.index_cast %c51_i32 : i32 to index
    %c0_176 = arith.constant 0 : index
    %c0_177 = arith.constant 0 : index
    %996 = vector.load %arg9[%995, %c0_176, %c0_177] : memref<56x2x128xf32, #tpu.memory_space<vmem>>, vector<1x2x128xf32>
    %997 = vector.shape_cast %996 : vector<1x2x128xf32> to vector<2x128xf32>
    %cst_178 = arith.constant dense<0.000000e+00> : vector<2x128xf32>
    %998 = tpu.matmul %989, %11, %cst_178 {dimension_numbers = #tpu.dot_dimension_numbers<[1], [0], [0], [1], [0, 0, 1, 1], [], []>} : vector<2x32xf32>, vector<32x128xf32>, vector<2x128xf32> -> vector<2x128xf32>
    %999 = arith.addf %997, %998 : vector<2x128xf32>
    %1000 = math.tanh %999 : vector<2x128xf32>
    %1001 = vector.broadcast %12 : vector<1x128xf32> to vector<2x128xf32>
    %1002 = arith.mulf %1000, %1001 : vector<2x128xf32>
    %1003 = vector.broadcast %13 : vector<1x128xf32> to vector<2x128xf32>
    %1004 = arith.addf %1002, %1003 : vector<2x128xf32>
    %1005 = vector.extract_strided_slice %1004 {offsets = [0, 0], sizes = [2, 32], strides = [1, 1]} : vector<2x128xf32> to vector<2x32xf32>
    %1006 = vector.extract_strided_slice %1004 {offsets = [0, 32], sizes = [2, 32], strides = [1, 1]} : vector<2x128xf32> to vector<2x32xf32>
    %1007 = vector.extract_strided_slice %1004 {offsets = [0, 64], sizes = [2, 32], strides = [1, 1]} : vector<2x128xf32> to vector<2x32xf32>
    %1008 = vector.extract_strided_slice %1004 {offsets = [0, 96], sizes = [2, 32], strides = [1, 1]} : vector<2x128xf32> to vector<2x32xf32>
    %1009 = arith.mulf %1006, %987 : vector<2x32xf32>
    %1010 = arith.mulf %1005, %1007 : vector<2x32xf32>
    %1011 = arith.addf %1009, %1010 : vector<2x32xf32>
    %1012 = math.tanh %1011 : vector<2x32xf32>
    %1013 = arith.mulf %1008, %1012 : vector<2x32xf32>
    %c49_i32_179 = arith.constant 49 : i32
    %1014 = arith.subi %c51_i32, %c49_i32_179 : i32
    %1015 = arith.index_cast %1014 : i32 to index
    %c0_180 = arith.constant 0 : index
    %c0_181 = arith.constant 0 : index
    %1016 = vector.load %arg10[%1015, %c0_180, %c0_181] : memref<7x2x32xf32, #tpu.memory_space<vmem>>, vector<1x2x32xf32>
    %1017 = vector.shape_cast %1016 : vector<1x2x32xf32> to vector<2x32xf32>
    %1018 = vector.shape_cast %1013 : vector<2x32xf32> to vector<1x2x32xf32>
    tpu.vector_store %arg10[%1015, %c0_180, %c0_181], %1018 {strides = array<i32>} : memref<7x2x32xf32, #tpu.memory_space<vmem>>, vector<1x2x32xf32>,
    %c52_i32 = arith.constant 52 : i32
    %1019 = arith.index_cast %c52_i32 : i32 to index
    %c0_182 = arith.constant 0 : index
    %c0_183 = arith.constant 0 : index
    %1020 = vector.load %arg9[%1019, %c0_182, %c0_183] : memref<56x2x128xf32, #tpu.memory_space<vmem>>, vector<1x2x128xf32>
    %1021 = vector.shape_cast %1020 : vector<1x2x128xf32> to vector<2x128xf32>
    %cst_184 = arith.constant dense<0.000000e+00> : vector<2x128xf32>
    %1022 = tpu.matmul %1013, %11, %cst_184 {dimension_numbers = #tpu.dot_dimension_numbers<[1], [0], [0], [1], [0, 0, 1, 1], [], []>} : vector<2x32xf32>, vector<32x128xf32>, vector<2x128xf32> -> vector<2x128xf32>
    %1023 = arith.addf %1021, %1022 : vector<2x128xf32>
    %1024 = math.tanh %1023 : vector<2x128xf32>
    %1025 = vector.broadcast %12 : vector<1x128xf32> to vector<2x128xf32>
    %1026 = arith.mulf %1024, %1025 : vector<2x128xf32>
    %1027 = vector.broadcast %13 : vector<1x128xf32> to vector<2x128xf32>
    %1028 = arith.addf %1026, %1027 : vector<2x128xf32>
    %1029 = vector.extract_strided_slice %1028 {offsets = [0, 0], sizes = [2, 32], strides = [1, 1]} : vector<2x128xf32> to vector<2x32xf32>
    %1030 = vector.extract_strided_slice %1028 {offsets = [0, 32], sizes = [2, 32], strides = [1, 1]} : vector<2x128xf32> to vector<2x32xf32>
    %1031 = vector.extract_strided_slice %1028 {offsets = [0, 64], sizes = [2, 32], strides = [1, 1]} : vector<2x128xf32> to vector<2x32xf32>
    %1032 = vector.extract_strided_slice %1028 {offsets = [0, 96], sizes = [2, 32], strides = [1, 1]} : vector<2x128xf32> to vector<2x32xf32>
    %1033 = arith.mulf %1030, %1011 : vector<2x32xf32>
    %1034 = arith.mulf %1029, %1031 : vector<2x32xf32>
    %1035 = arith.addf %1033, %1034 : vector<2x32xf32>
    %1036 = math.tanh %1035 : vector<2x32xf32>
    %1037 = arith.mulf %1032, %1036 : vector<2x32xf32>
    %c49_i32_185 = arith.constant 49 : i32
    %1038 = arith.subi %c52_i32, %c49_i32_185 : i32
    %1039 = arith.index_cast %1038 : i32 to index
    %c0_186 = arith.constant 0 : index
    %c0_187 = arith.constant 0 : index
    %1040 = vector.load %arg10[%1039, %c0_186, %c0_187] : memref<7x2x32xf32, #tpu.memory_space<vmem>>, vector<1x2x32xf32>
    %1041 = vector.shape_cast %1040 : vector<1x2x32xf32> to vector<2x32xf32>
    %1042 = vector.shape_cast %1037 : vector<2x32xf32> to vector<1x2x32xf32>
    tpu.vector_store %arg10[%1039, %c0_186, %c0_187], %1042 {strides = array<i32>} : memref<7x2x32xf32, #tpu.memory_space<vmem>>, vector<1x2x32xf32>,
    %c53_i32 = arith.constant 53 : i32
    %1043 = arith.index_cast %c53_i32 : i32 to index
    %c0_188 = arith.constant 0 : index
    %c0_189 = arith.constant 0 : index
    %1044 = vector.load %arg9[%1043, %c0_188, %c0_189] : memref<56x2x128xf32, #tpu.memory_space<vmem>>, vector<1x2x128xf32>
    %1045 = vector.shape_cast %1044 : vector<1x2x128xf32> to vector<2x128xf32>
    %cst_190 = arith.constant dense<0.000000e+00> : vector<2x128xf32>
    %1046 = tpu.matmul %1037, %11, %cst_190 {dimension_numbers = #tpu.dot_dimension_numbers<[1], [0], [0], [1], [0, 0, 1, 1], [], []>} : vector<2x32xf32>, vector<32x128xf32>, vector<2x128xf32> -> vector<2x128xf32>
    %1047 = arith.addf %1045, %1046 : vector<2x128xf32>
    %1048 = math.tanh %1047 : vector<2x128xf32>
    %1049 = vector.broadcast %12 : vector<1x128xf32> to vector<2x128xf32>
    %1050 = arith.mulf %1048, %1049 : vector<2x128xf32>
    %1051 = vector.broadcast %13 : vector<1x128xf32> to vector<2x128xf32>
    %1052 = arith.addf %1050, %1051 : vector<2x128xf32>
    %1053 = vector.extract_strided_slice %1052 {offsets = [0, 0], sizes = [2, 32], strides = [1, 1]} : vector<2x128xf32> to vector<2x32xf32>
    %1054 = vector.extract_strided_slice %1052 {offsets = [0, 32], sizes = [2, 32], strides = [1, 1]} : vector<2x128xf32> to vector<2x32xf32>
    %1055 = vector.extract_strided_slice %1052 {offsets = [0, 64], sizes = [2, 32], strides = [1, 1]} : vector<2x128xf32> to vector<2x32xf32>
    %1056 = vector.extract_strided_slice %1052 {offsets = [0, 96], sizes = [2, 32], strides = [1, 1]} : vector<2x128xf32> to vector<2x32xf32>
    %1057 = arith.mulf %1054, %1035 : vector<2x32xf32>
    %1058 = arith.mulf %1053, %1055 : vector<2x32xf32>
    %1059 = arith.addf %1057, %1058 : vector<2x32xf32>
    %1060 = math.tanh %1059 : vector<2x32xf32>
    %1061 = arith.mulf %1056, %1060 : vector<2x32xf32>
    %c49_i32_191 = arith.constant 49 : i32
    %1062 = arith.subi %c53_i32, %c49_i32_191 : i32
    %1063 = arith.index_cast %1062 : i32 to index
    %c0_192 = arith.constant 0 : index
    %c0_193 = arith.constant 0 : index
    %1064 = vector.load %arg10[%1063, %c0_192, %c0_193] : memref<7x2x32xf32, #tpu.memory_space<vmem>>, vector<1x2x32xf32>
    %1065 = vector.shape_cast %1064 : vector<1x2x32xf32> to vector<2x32xf32>
    %1066 = vector.shape_cast %1061 : vector<2x32xf32> to vector<1x2x32xf32>
    tpu.vector_store %arg10[%1063, %c0_192, %c0_193], %1066 {strides = array<i32>} : memref<7x2x32xf32, #tpu.memory_space<vmem>>, vector<1x2x32xf32>,
    %c54_i32 = arith.constant 54 : i32
    %1067 = arith.index_cast %c54_i32 : i32 to index
    %c0_194 = arith.constant 0 : index
    %c0_195 = arith.constant 0 : index
    %1068 = vector.load %arg9[%1067, %c0_194, %c0_195] : memref<56x2x128xf32, #tpu.memory_space<vmem>>, vector<1x2x128xf32>
    %1069 = vector.shape_cast %1068 : vector<1x2x128xf32> to vector<2x128xf32>
    %cst_196 = arith.constant dense<0.000000e+00> : vector<2x128xf32>
    %1070 = tpu.matmul %1061, %11, %cst_196 {dimension_numbers = #tpu.dot_dimension_numbers<[1], [0], [0], [1], [0, 0, 1, 1], [], []>} : vector<2x32xf32>, vector<32x128xf32>, vector<2x128xf32> -> vector<2x128xf32>
    %1071 = arith.addf %1069, %1070 : vector<2x128xf32>
    %1072 = math.tanh %1071 : vector<2x128xf32>
    %1073 = vector.broadcast %12 : vector<1x128xf32> to vector<2x128xf32>
    %1074 = arith.mulf %1072, %1073 : vector<2x128xf32>
    %1075 = vector.broadcast %13 : vector<1x128xf32> to vector<2x128xf32>
    %1076 = arith.addf %1074, %1075 : vector<2x128xf32>
    %1077 = vector.extract_strided_slice %1076 {offsets = [0, 0], sizes = [2, 32], strides = [1, 1]} : vector<2x128xf32> to vector<2x32xf32>
    %1078 = vector.extract_strided_slice %1076 {offsets = [0, 32], sizes = [2, 32], strides = [1, 1]} : vector<2x128xf32> to vector<2x32xf32>
    %1079 = vector.extract_strided_slice %1076 {offsets = [0, 64], sizes = [2, 32], strides = [1, 1]} : vector<2x128xf32> to vector<2x32xf32>
    %1080 = vector.extract_strided_slice %1076 {offsets = [0, 96], sizes = [2, 32], strides = [1, 1]} : vector<2x128xf32> to vector<2x32xf32>
    %1081 = arith.mulf %1078, %1059 : vector<2x32xf32>
    %1082 = arith.mulf %1077, %1079 : vector<2x32xf32>
    %1083 = arith.addf %1081, %1082 : vector<2x32xf32>
    %1084 = math.tanh %1083 : vector<2x32xf32>
    %1085 = arith.mulf %1080, %1084 : vector<2x32xf32>
    %c49_i32_197 = arith.constant 49 : i32
    %1086 = arith.subi %c54_i32, %c49_i32_197 : i32
    %1087 = arith.index_cast %1086 : i32 to index
    %c0_198 = arith.constant 0 : index
    %c0_199 = arith.constant 0 : index
    %1088 = vector.load %arg10[%1087, %c0_198, %c0_199] : memref<7x2x32xf32, #tpu.memory_space<vmem>>, vector<1x2x32xf32>
    %1089 = vector.shape_cast %1088 : vector<1x2x32xf32> to vector<2x32xf32>
    %1090 = vector.shape_cast %1085 : vector<2x32xf32> to vector<1x2x32xf32>
    tpu.vector_store %arg10[%1087, %c0_198, %c0_199], %1090 {strides = array<i32>} : memref<7x2x32xf32, #tpu.memory_space<vmem>>, vector<1x2x32xf32>,
    %c55_i32 = arith.constant 55 : i32
    %1091 = arith.index_cast %c55_i32 : i32 to index
    %c0_200 = arith.constant 0 : index
    %c0_201 = arith.constant 0 : index
    %1092 = vector.load %arg9[%1091, %c0_200, %c0_201] : memref<56x2x128xf32, #tpu.memory_space<vmem>>, vector<1x2x128xf32>
    %1093 = vector.shape_cast %1092 : vector<1x2x128xf32> to vector<2x128xf32>
    %cst_202 = arith.constant dense<0.000000e+00> : vector<2x128xf32>
    %1094 = tpu.matmul %1085, %11, %cst_202 {dimension_numbers = #tpu.dot_dimension_numbers<[1], [0], [0], [1], [0, 0, 1, 1], [], []>} : vector<2x32xf32>, vector<32x128xf32>, vector<2x128xf32> -> vector<2x128xf32>
    %1095 = arith.addf %1093, %1094 : vector<2x128xf32>
    %1096 = math.tanh %1095 : vector<2x128xf32>
    %1097 = vector.broadcast %12 : vector<1x128xf32> to vector<2x128xf32>
    %1098 = arith.mulf %1096, %1097 : vector<2x128xf32>
    %1099 = vector.broadcast %13 : vector<1x128xf32> to vector<2x128xf32>
    %1100 = arith.addf %1098, %1099 : vector<2x128xf32>
    %1101 = vector.extract_strided_slice %1100 {offsets = [0, 0], sizes = [2, 32], strides = [1, 1]} : vector<2x128xf32> to vector<2x32xf32>
    %1102 = vector.extract_strided_slice %1100 {offsets = [0, 32], sizes = [2, 32], strides = [1, 1]} : vector<2x128xf32> to vector<2x32xf32>
    %1103 = vector.extract_strided_slice %1100 {offsets = [0, 64], sizes = [2, 32], strides = [1, 1]} : vector<2x128xf32> to vector<2x32xf32>
    %1104 = vector.extract_strided_slice %1100 {offsets = [0, 96], sizes = [2, 32], strides = [1, 1]} : vector<2x128xf32> to vector<2x32xf32>
    %1105 = arith.mulf %1102, %1083 : vector<2x32xf32>
    %1106 = arith.mulf %1101, %1103 : vector<2x32xf32>
    %1107 = arith.addf %1105, %1106 : vector<2x32xf32>
    %1108 = math.tanh %1107 : vector<2x32xf32>
    %1109 = arith.mulf %1104, %1108 : vector<2x32xf32>
    %c49_i32_203 = arith.constant 49 : i32
    %1110 = arith.subi %c55_i32, %c49_i32_203 : i32
    %1111 = arith.index_cast %1110 : i32 to index
    %c0_204 = arith.constant 0 : index
    %c0_205 = arith.constant 0 : index
    %1112 = vector.load %arg10[%1111, %c0_204, %c0_205] : memref<7x2x32xf32, #tpu.memory_space<vmem>>, vector<1x2x32xf32>
    %1113 = vector.shape_cast %1112 : vector<1x2x32xf32> to vector<2x32xf32>
    %1114 = vector.shape_cast %1109 : vector<2x32xf32> to vector<1x2x32xf32>
    tpu.vector_store %arg10[%1111, %c0_204, %c0_205], %1114 {strides = array<i32>} : memref<7x2x32xf32, #tpu.memory_space<vmem>>, vector<1x2x32xf32>,
    %c7_i32_206 = arith.constant 7 : i32
    %c0_207 = arith.constant 0 : index
    %c0_208 = arith.constant 0 : index
    %1115 = vector.load %arg6[%c0_207, %c0_208] : memref<1x32xf32, #tpu.memory_space<vmem>>, vector<1x32xf32>
    %1116 = vector.shape_cast %1115 : vector<1x32xf32> to vector<1x1x32xf32>
    %c0_209 = arith.constant 0 : index
    %c0_210 = arith.constant 0 : index
    %c0_211 = arith.constant 0 : index
    %1117 = vector.load %arg10[%c0_209, %c0_210, %c0_211] : memref<7x2x32xf32, #tpu.memory_space<vmem>>, vector<7x2x32xf32>
    %1118 = vector.broadcast %1116 : vector<1x1x32xf32> to vector<7x2x32xf32>
    %1119 = arith.mulf %1117, %1118 : vector<7x2x32xf32>
    %cst_212 = arith.constant dense<0.000000e+00> : vector<7x2xf32>
    %1120 = vector.multi_reduction <add>, %1119, %cst_212 [2] : vector<7x2x32xf32> to vector<7x2xf32>
    %1121 = vector.shape_cast %1120 : vector<7x2xf32> to vector<7x2x1xf32>
    %c0_213 = arith.constant 0 : index
    %c0_214 = arith.constant 0 : index
    %1122 = vector.load %arg7[%c0_213, %c0_214] : memref<1x1xf32, #tpu.memory_space<vmem>>, vector<1x1xf32>
    %1123 = vector.shape_cast %1122 : vector<1x1xf32> to vector<1x1x1xf32>
    %1124 = vector.broadcast %1123 : vector<1x1x1xf32> to vector<7x2x1xf32>
    %1125 = arith.addf %1121, %1124 : vector<7x2x1xf32>
    %c0_215 = arith.constant 0 : index
    %c0_216 = arith.constant 0 : index
    %c0_217 = arith.constant 0 : index
    %1126 = vector.load %arg8[%c0_215, %c0_216, %c0_217] : memref<7x2x1xf32, #tpu.memory_space<vmem>>, vector<7x2x1xf32>
    tpu.vector_store %arg8[%c0_215, %c0_216, %c0_217], %1125 {strides = array<i32>} : memref<7x2x1xf32, #tpu.memory_space<vmem>>, vector<7x2x1xf32>,
    return
  }
}

</mosaic_0001>

<bundles_post_ra>
// kernel: rnn_forward.1
= control target key start
LH: loop header
LB: loop body
LE: loop exit
PB: predicated region body
PF: predicated region fallthrough
CT: control target
= control target key end

     0   :  { %v7357_v0 = vmov 0.0   ;;  %vm7358_vm0 = vmmov 0   ;;  %v7359_v3 = vmov 0   ;;  %s7360_s23 = smov 64   ;;  %s7361_s24 = smov 32   ;;  %vm556_vm1 = vcmask 261120   ;;  %s8847_s5 = inlined_call_operand.vmem [shape: f32[32,128], index: 5, kind: input, shape index: {}]   ;;  %s8848_s0 = inlined_call_operand.vmem [shape: f32[56,2,1], index: 0, kind: input, shape index: {}]   ;;  %s8849_s1 = inlined_call_operand.vmem [shape: f32[1,128], index: 1, kind: input, shape index: {}]   ;;  %s8850_s2 = inlined_call_operand.vmem [shape: f32[1,128], index: 2, kind: input, shape index: {}]   ;;  %s8851_s3 = inlined_call_operand.vmem [shape: f32[1,128], index: 3, kind: input, shape index: {}]   ;;  %s8852_s4 = inlined_call_operand.vmem [shape: f32[1,128], index: 4, kind: input, shape index: {}]   ;;  %s8853_s6 = inlined_call_operand.vmem [shape: f32[1,32], index: 6, kind: input, shape index: {}]   ;;  %s8854_s7 = inlined_call_operand.<no memory space> [shape: f32[1,1], index: 7, kind: input, shape index: {}]   ;;  %s8855_s8 = inlined_call_operand.vmem [shape: f32[7,2,1], index: 8, kind: output, shape index: {}]  }
   0x1   :  { %6486 = vmatprep.subr.mxu0 %v7357_v0  ;;  %v7411_v1 = vld [vmem:[%s8847_s5 + $0x18] sm:$0xff]  ;;  %v7416_v2 = vld [vmem:[%s8847_s5 + $0x10] sm:$0xff]  ;;  %6494 = vmatprep.mubr.msk.f32.mxu0 %vm7358_vm0, %v7357_v0  ;;  %v31_v4 = vld [vmem:[%s8848_s0] sm:$0x3]  ;;  %vm5469_vm2 = vcmask 254976   ;;  %vm6133_vm3 = vcmask 1024  }
   0x2   :  { %6487 = vmatpush3.msra.mxu0 %v7411_v1  ;;  %7107 = vset.pattern.permute.xlu0 %v7359_v3  ;;  %v7428_v5 = vld [vmem:[%s8847_s5 + $0x8] sm:$0xff]  ;;  %v7436_v6 = vld [vmem:[%s8847_s5] sm:$0xff] }
   0x3   :  { %6488 = vmatprep.subr.mxu0 %v7357_v0  ;;  %90 = vperm.xlu0 %7107, %v31_v4   ;;  %v7466_v7 = vld [vmem:[%s8849_s1] ss:$0 sm:$0xff]  ;;  %v32_v27 = vld [vmem:[%s8848_s0 + $0x2] sm:$0x3]  ;;  %v33_v47 = vld [vmem:[%s8848_s0 + $0x4] sm:$0x3] }
   0x4   :  { %6489 = vmatpush3.msra.mxu0 %v7416_v2  ;;  %6497 = vmatprep.subr.mxu1 %v7357_v0  ;;  %v7471_v8 = vld [vmem:[%s8850_s2] ss:$0 sm:$0xff] }
   0x5   :  { %6490 = vmatprep.subr.mxu0 %v7357_v0  ;;  %6498 = vmatpush3.msra.mxu1 %v7411_v1  ;;  %v7478_v16 = vld [vmem:[%s8851_s3] ss:$0 sm:$0xff] }
   0x6   :  { %6491 = vmatpush3.msra.mxu0 %v7428_v5  ;;  %6499 = vmatprep.subr.mxu1 %v7357_v0  ;;  %v7483_v18 = vld [vmem:[%s8852_s4] ss:$0 sm:$0xff] }
   0x7   :  { %6492 = vmatprep.subr.mxu0 %v7357_v0  ;;  %6500 = vmatpush3.msra.mxu1 %v7416_v2 }
   0x8   :  { %6493 = vmatpush3.msra.mxu0 %v7436_v6  ;;  %6501 = vmatprep.subr.mxu1 %v7357_v0 }
   0x9   :  { %6495 = vmatmul.mubr.f32.vlgmr.msra.gmra.mxu0 %v7357_v0  ;;  %6502 = vmatpush3.msra.mxu1 %v7428_v5 }
   0xa   :  { %6503 = vmatprep.subr.mxu1 %v7357_v0  ;;  %6505 = vmatprep.mubr.msk.f32.mxu1 %vm7358_vm0, %v7357_v0 }
   0xb   :  { %6504 = vmatpush3.msra.mxu1 %v7436_v6  ;;  %7108 = vset.pattern.permute.xlu1 %v7359_v3 }
   0xc   :  { %6508 = vmatprep.subr.mxu0 %v7357_v0  ;;  %6516 = vmatprep.mubr.msk.f32.mxu0 %vm7358_vm0, %v7357_v0 }
   0xd   :  { %6509 = vmatpush3.msra.mxu0 %v7411_v1  ;;  %6519 = vmatprep.subr.mxu1 %v7357_v0 }
   0xe   :  { %6510 = vmatprep.subr.mxu0 %v7357_v0 }
   0xf   :  { %6511 = vmatpush3.msra.mxu0 %v7416_v2 }
  0x10   :  { %6512 = vmatprep.subr.mxu0 %v7357_v0 }
  0x11   :  { %6513 = vmatpush3.msra.mxu0 %v7428_v5 }
  0x12   :  { %6514 = vmatprep.subr.mxu0 %v7357_v0 }
  0x13   :  { %6515 = vmatpush3.msra.mxu0 %v7436_v6 }
  0x14   :  { %6530 = vmatprep.subr.mxu0 %v7357_v0 }
  0x7e   :  { %v91_v9 = vpop.permute.xlu0 %90 }
  0x7f   :  { %v374_v10 = vmul.f32 %v7466_v7, %v91_v9 }
  0x81   :  { %v437_v11 = vadd.f32 %v7471_v8, %v374_v10  ;;  %v34_v10 = vld [vmem:[%s8848_s0 + $0x6] sm:$0x3] }
  0x83   :  { %493 = vst [vmem:[#allocation2] sm:$0x3] %v437_v11 }
  0x8a   :  { %v555_v12 = vld [vmem:[#allocation2] sm:$0x3] }
  0xc9   :  { %v626_v13 = vpop.f32.mrf.mxu0 }
  0xca   :  { %v630_v14 = vadd.f32 %v626_v13, %v555_v12 }
  0xcb   :  { %v6496_v15 = vpop.f32.mrf.mxu0 }
  0xcc   :  { %7109 = vtanh.f32 %v630_v14 }
  0xd9   :  { %v7110_v17 = vpop.eup %7109 }
  0xda   :  { %v638_v19 = vmul.f32 %v7110_v17, %v7478_v16 }
  0xdc   :  { %v645_v20 = vadd.f32 %v7483_v18, %v638_v19 }
  0xde   :  { %648 = vrot.lane.b32.xlu0 %v645_v20, %s7360_s23  ;;  %v646_v23 = vmul.f32 0.0, %v645_v20 }
 0x150   :  { %v649_v21 = vpop.permute.xlu0 %648 }
 0x151   :  { %v651_v22 = vmul.f32 %v649_v21, %v645_v20 }
 0x153   :  { %653 = vrot.lane.b32.xlu1 %v651_v22, %s7361_s24 }
 0x1c5   :  { %v654_v24 = vpop.permute.xlu1 %653 }
 0x1c6   :  { %v656_v25 = vadd.f32 %v654_v24, %v646_v23 }
 0x1c8   :  { %7111 = vtanh.f32 %v656_v25 }
 0x1d5   :  { %v7112_v26 = vpop.eup %7111 }
 0x1d6   :  { %659 = vrot.lane.b32.xlu1 %v7112_v26, %s7360_s23 }
 0x1da   :  { %95 = vperm.xlu1 %7108, %v32_v27  }
 0x248   :  { %v660_v28 = vpop.permute.xlu1 %659 }
 0x249   :  { %v662_v29 = vmul.f32 %v660_v28, %v645_v20 }
 0x24b   :  { %666 = vrot.lane.b32.xlu0 %v662_v29, %s7361_s24 }
 0x255   :  { %v96_v30 = vpop.permute.xlu1 %95 }
 0x256   :  { %v375_v31 = vmul.f32 %v7466_v7, %v96_v30 }
 0x258   :  { %v438_v33 = vadd.f32 %v7471_v8, %v375_v31 }
 0x25a   :  { %494 = vst [vmem:[#allocation2 + $0x2] sm:$0x3] %v438_v33 }
 0x261   :  { %v664_v34 = vld [vmem:[#allocation2 + $0x2] sm:$0x3] }
 0x2bd   :  { %v667_v32 = vpop.permute.xlu0 %666 }
 0x2be   :  { %6506 = vmatmul.mubr.msk.f32.vlgmr.msra.gmra.mxu1 %vm556_vm1, %v667_v32  ;;  %v35_v32 = vld [vmem:[%s8848_s0 + $0x8] sm:$0x3] }
 0x2bf   :  { %6520 = vmatpush3.msra.mxu1 %v7411_v1  ;;  %6527 = vmatprep.mubr.msk.f32.mxu1 %vm7358_vm0, %v7357_v0 }
 0x2c0   :  { %6521 = vmatprep.subr.mxu1 %v7357_v0 }
 0x2c1   :  { %6522 = vmatpush3.msra.mxu1 %v7416_v2 }
 0x2c2   :  { %6523 = vmatprep.subr.mxu1 %v7357_v0 }
 0x2c3   :  { %6524 = vmatpush3.msra.mxu1 %v7428_v5 }
 0x2c4   :  { %6525 = vmatprep.subr.mxu1 %v7357_v0 }
 0x2c5   :  { %6526 = vmatpush3.msra.mxu1 %v7436_v6 }
 0x2c6   :  { %6541 = vmatprep.subr.mxu1 %v7357_v0 }
 0x37e   :  { %v736_v35 = vpop.f32.mrf.mxu1 }
 0x37f   :  { %v740_v36 = vadd.f32 %v736_v35, %v664_v34 }
 0x380   :  { %v6507_v37 = vpop.f32.mrf.mxu1 }
 0x381   :  { %7113 = vtanh.f32 %v740_v36 }
 0x38e   :  { %v7114_v38 = vpop.eup %7113 }
 0x38f   :  { %v742_v39 = vmul.f32 %v7114_v38, %v7478_v16 }
 0x391   :  { %v743_v40 = vadd.f32 %v7483_v18, %v742_v39 }
 0x393   :  { %746 = vrot.lane.b32.xlu0 %v743_v40, %s7360_s23  ;;  %v744_v43 = vmul.f32 %v743_v40, %v656_v25 }
 0x405   :  { %v747_v41 = vpop.permute.xlu0 %746 }
 0x406   :  { %v749_v42 = vmul.f32 %v747_v41, %v743_v40 }
 0x408   :  { %751 = vrot.lane.b32.xlu1 %v749_v42, %s7361_s24 }
 0x47a   :  { %v752_v44 = vpop.permute.xlu1 %751 }
 0x47b   :  { %v754_v45 = vadd.f32 %v752_v44, %v744_v43 }
 0x47d   :  { %7115 = vtanh.f32 %v754_v45 }
 0x48a   :  { %v7116_v46 = vpop.eup %7115 }
 0x48b   :  { %757 = vrot.lane.b32.xlu0 %v7116_v46, %s7360_s23 }
 0x48f   :  { %100 = vperm.xlu0 %7107, %v33_v47  }
 0x4fd   :  { %v758_v48 = vpop.permute.xlu0 %757 }
 0x4fe   :  { %v760_v49 = vmul.f32 %v758_v48, %v743_v40 }
 0x500   :  { %764 = vrot.lane.b32.xlu1 %v760_v49, %s7361_s24 }
 0x50a   :  { %v101_v50 = vpop.permute.xlu0 %100 }
 0x50b   :  { %v376_v51 = vmul.f32 %v7466_v7, %v101_v50 }
 0x50d   :  { %v439_v52 = vadd.f32 %v7471_v8, %v376_v51 }
 0x50f   :  { %495 = vst [vmem:[#allocation2 + $0x4] sm:$0x3] %v439_v52  ;;  %v36_v52 = vld [vmem:[%s8848_s0 + $0xa] sm:$0x3] }
 0x516   :  { %v762_v54 = vld [vmem:[#allocation2 + $0x4] sm:$0x3] }
 0x572   :  { %v765_v53 = vpop.permute.xlu1 %764 }
 0x573   :  { %6517 = vmatmul.mubr.msk.f32.vlgmr.msra.gmra.mxu0 %vm556_vm1, %v765_v53 }
 0x574   :  { %6531 = vmatpush3.msra.mxu0 %v7411_v1  ;;  %6538 = vmatprep.mubr.msk.f32.mxu0 %vm7358_vm0, %v7357_v0 }
 0x575   :  { %6532 = vmatprep.subr.mxu0 %v7357_v0 }
 0x576   :  { %6533 = vmatpush3.msra.mxu0 %v7416_v2 }
 0x577   :  { %6534 = vmatprep.subr.mxu0 %v7357_v0 }
 0x578   :  { %6535 = vmatpush3.msra.mxu0 %v7428_v5 }
 0x579   :  { %6536 = vmatprep.subr.mxu0 %v7357_v0 }
 0x57a   :  { %6537 = vmatpush3.msra.mxu0 %v7436_v6 }
 0x57b   :  { %6552 = vmatprep.subr.mxu0 %v7357_v0 }
 0x633   :  { %v834_v55 = vpop.f32.mrf.mxu0 }
 0x634   :  { %v838_v56 = vadd.f32 %v834_v55, %v762_v54 }
 0x635   :  { %v6518_v57 = vpop.f32.mrf.mxu0 }
 0x636   :  { %7117 = vtanh.f32 %v838_v56 }
 0x643   :  { %v7118_v58 = vpop.eup %7117 }
 0x644   :  { %v840_v59 = vmul.f32 %v7118_v58, %v7478_v16 }
 0x646   :  { %v841_v60 = vadd.f32 %v7483_v18, %v840_v59 }
 0x648   :  { %844 = vrot.lane.b32.xlu1 %v841_v60, %s7360_s23  ;;  %v842_v63 = vmul.f32 %v841_v60, %v754_v45 }
 0x6ba   :  { %v845_v61 = vpop.permute.xlu1 %844 }
 0x6bb   :  { %v847_v62 = vmul.f32 %v845_v61, %v841_v60 }
 0x6bd   :  { %849 = vrot.lane.b32.xlu0 %v847_v62, %s7361_s24 }
 0x72f   :  { %v850_v3 = vpop.permute.xlu0 %849 }
 0x730   :  { %v852_v4 = vadd.f32 %v850_v3, %v842_v63 }
 0x732   :  { %7119 = vtanh.f32 %v852_v4 }
 0x73f   :  { %v7120_v9 = vpop.eup %7119 }
 0x740   :  { %855 = vrot.lane.b32.xlu1 %v7120_v9, %s7360_s23 }
 0x744   :  { %105 = vperm.xlu1 %7108, %v34_v10  }
 0x7b2   :  { %v856_v11 = vpop.permute.xlu1 %855 }
 0x7b3   :  { %v858_v12 = vmul.f32 %v856_v11, %v841_v60 }
 0x7b5   :  { %862 = vrot.lane.b32.xlu0 %v858_v12, %s7361_s24 }
 0x7bf   :  { %v106_v13 = vpop.permute.xlu1 %105 }
 0x7c0   :  { %v377_v14 = vmul.f32 %v7466_v7, %v106_v13 }
 0x7c2   :  { %v440_v15 = vadd.f32 %v7471_v8, %v377_v14 }
 0x7c4   :  { %496 = vst [vmem:[#allocation2 + $0x6] sm:$0x3] %v440_v15  ;;  %v37_v15 = vld [vmem:[%s8848_s0 + $0xc] sm:$0x3] }
 0x7cb   :  { %v860_v19 = vld [vmem:[#allocation2 + $0x6] sm:$0x3] }
 0x827   :  { %v863_v17 = vpop.permute.xlu0 %862 }
 0x828   :  { %6528 = vmatmul.mubr.msk.f32.vlgmr.msra.gmra.mxu1 %vm556_vm1, %v863_v17 }
 0x829   :  { %6542 = vmatpush3.msra.mxu1 %v7411_v1  ;;  %6549 = vmatprep.mubr.msk.f32.mxu1 %vm7358_vm0, %v7357_v0 }
 0x82a   :  { %6543 = vmatprep.subr.mxu1 %v7357_v0 }
 0x82b   :  { %6544 = vmatpush3.msra.mxu1 %v7416_v2 }
 0x82c   :  { %6545 = vmatprep.subr.mxu1 %v7357_v0 }
 0x82d   :  { %6546 = vmatpush3.msra.mxu1 %v7428_v5 }
 0x82e   :  { %6547 = vmatprep.subr.mxu1 %v7357_v0 }
 0x82f   :  { %6548 = vmatpush3.msra.mxu1 %v7436_v6 }
 0x830   :  { %6563 = vmatprep.subr.mxu1 %v7357_v0 }
 0x8e8   :  { %v932_v20 = vpop.f32.mrf.mxu1 }
 0x8e9   :  { %v936_v21 = vadd.f32 %v932_v20, %v860_v19 }
 0x8ea   :  { %v6529_v22 = vpop.f32.mrf.mxu1 }
 0x8eb   :  { %7121 = vtanh.f32 %v936_v21 }
 0x8f8   :  { %v7122_v23 = vpop.eup %7121 }
 0x8f9   :  { %v938_v24 = vmul.f32 %v7122_v23, %v7478_v16 }
 0x8fb   :  { %v939_v25 = vadd.f32 %v7483_v18, %v938_v24 }
 0x8fd   :  { %942 = vrot.lane.b32.xlu0 %v939_v25, %s7360_s23  ;;  %v940_v28 = vmul.f32 %v939_v25, %v852_v4 }
 0x96f   :  { %v943_v26 = vpop.permute.xlu0 %942 }
 0x970   :  { %v945_v27 = vmul.f32 %v943_v26, %v939_v25 }
 0x972   :  { %947 = vrot.lane.b32.xlu1 %v945_v27, %s7361_s24 }
 0x9e4   :  { %v948_v29 = vpop.permute.xlu1 %947 }
 0x9e5   :  { %v950_v30 = vadd.f32 %v948_v29, %v940_v28 }
 0x9e7   :  { %7123 = vtanh.f32 %v950_v30 }
 0x9f4   :  { %v7124_v31 = vpop.eup %7123 }
 0x9f5   :  { %953 = vrot.lane.b32.xlu0 %v7124_v31, %s7360_s23 }
 0x9f9   :  { %110 = vperm.xlu0 %7107, %v35_v32  }
 0xa67   :  { %v954_v33 = vpop.permute.xlu0 %953 }
 0xa68   :  { %v956_v34 = vmul.f32 %v954_v33, %v939_v25 }
 0xa6a   :  { %960 = vrot.lane.b32.xlu1 %v956_v34, %s7361_s24 }
 0xa74   :  { %v111_v35 = vpop.permute.xlu0 %110 }
 0xa75   :  { %v378_v36 = vmul.f32 %v7466_v7, %v111_v35 }
 0xa77   :  { %v441_v37 = vadd.f32 %v7471_v8, %v378_v36 }
 0xa79   :  { %497 = vst [vmem:[#allocation2 + $0x8] sm:$0x3] %v441_v37  ;;  %v38_v37 = vld [vmem:[%s8848_s0 + $0xe] sm:$0x3] }
 0xa80   :  { %v958_v39 = vld [vmem:[#allocation2 + $0x8] sm:$0x3] }
 0xadc   :  { %v961_v38 = vpop.permute.xlu1 %960 }
 0xadd   :  { %6539 = vmatmul.mubr.msk.f32.vlgmr.msra.gmra.mxu0 %vm556_vm1, %v961_v38 }
 0xade   :  { %6553 = vmatpush3.msra.mxu0 %v7411_v1  ;;  %6560 = vmatprep.mubr.msk.f32.mxu0 %vm7358_vm0, %v7357_v0 }
 0xadf   :  { %6554 = vmatprep.subr.mxu0 %v7357_v0 }
 0xae0   :  { %6555 = vmatpush3.msra.mxu0 %v7416_v2 }
 0xae1   :  { %6556 = vmatprep.subr.mxu0 %v7357_v0 }
 0xae2   :  { %6557 = vmatpush3.msra.mxu0 %v7428_v5 }
 0xae3   :  { %6558 = vmatprep.subr.mxu0 %v7357_v0 }
 0xae4   :  { %6559 = vmatpush3.msra.mxu0 %v7436_v6 }
 0xae5   :  { %6574 = vmatprep.subr.mxu0 %v7357_v0 }
 0xb9d   :  { %v1030_v40 = vpop.f32.mrf.mxu0 }
 0xb9e   :  { %v1034_v41 = vadd.f32 %v1030_v40, %v958_v39 }
 0xb9f   :  { %v6540_v42 = vpop.f32.mrf.mxu0 }
 0xba0   :  { %7125 = vtanh.f32 %v1034_v41 }
 0xbad   :  { %v7126_v43 = vpop.eup %7125 }
 0xbae   :  { %v1036_v44 = vmul.f32 %v7126_v43, %v7478_v16 }
 0xbb0   :  { %v1037_v45 = vadd.f32 %v7483_v18, %v1036_v44 }
 0xbb2   :  { %1040 = vrot.lane.b32.xlu1 %v1037_v45, %s7360_s23  ;;  %v1038_v48 = vmul.f32 %v1037_v45, %v950_v30 }
 0xc24   :  { %v1041_v46 = vpop.permute.xlu1 %1040 }
 0xc25   :  { %v1043_v47 = vmul.f32 %v1041_v46, %v1037_v45 }
 0xc27   :  { %1045 = vrot.lane.b32.xlu0 %v1043_v47, %s7361_s24 }
 0xc99   :  { %v1046_v49 = vpop.permute.xlu0 %1045 }
 0xc9a   :  { %v1048_v50 = vadd.f32 %v1046_v49, %v1038_v48 }
 0xc9c   :  { %7127 = vtanh.f32 %v1048_v50 }
 0xca9   :  { %v7128_v51 = vpop.eup %7127 }
 0xcaa   :  { %1051 = vrot.lane.b32.xlu1 %v7128_v51, %s7360_s23 }
 0xcae   :  { %115 = vperm.xlu1 %7108, %v36_v52  }
 0xd1c   :  { %v1052_v53 = vpop.permute.xlu1 %1051 }
 0xd1d   :  { %v1054_v54 = vmul.f32 %v1052_v53, %v1037_v45 }
 0xd1f   :  { %1058 = vrot.lane.b32.xlu0 %v1054_v54, %s7361_s24 }
 0xd29   :  { %v116_v55 = vpop.permute.xlu1 %115 }
 0xd2a   :  { %v379_v56 = vmul.f32 %v7466_v7, %v116_v55 }
 0xd2c   :  { %v442_v57 = vadd.f32 %v7471_v8, %v379_v56 }
 0xd2e   :  { %498 = vst [vmem:[#allocation2 + $0xa] sm:$0x3] %v442_v57  ;;  %v39_v57 = vld [vmem:[%s8848_s0 + $0x10] sm:$0x3] }
 0xd35   :  { %v1056_v59 = vld [vmem:[#allocation2 + $0xa] sm:$0x3] }
 0xd91   :  { %v1059_v58 = vpop.permute.xlu0 %1058 }
 0xd92   :  { %6550 = vmatmul.mubr.msk.f32.vlgmr.msra.gmra.mxu1 %vm556_vm1, %v1059_v58 }
 0xd93   :  { %6564 = vmatpush3.msra.mxu1 %v7411_v1  ;;  %6571 = vmatprep.mubr.msk.f32.mxu1 %vm7358_vm0, %v7357_v0 }
 0xd94   :  { %6565 = vmatprep.subr.mxu1 %v7357_v0 }
 0xd95   :  { %6566 = vmatpush3.msra.mxu1 %v7416_v2 }
 0xd96   :  { %6567 = vmatprep.subr.mxu1 %v7357_v0 }
 0xd97   :  { %6568 = vmatpush3.msra.mxu1 %v7428_v5 }
 0xd98   :  { %6569 = vmatprep.subr.mxu1 %v7357_v0 }
 0xd99   :  { %6570 = vmatpush3.msra.mxu1 %v7436_v6 }
 0xd9a   :  { %6585 = vmatprep.subr.mxu1 %v7357_v0 }
 0xe52   :  { %v1128_v60 = vpop.f32.mrf.mxu1 }
 0xe53   :  { %v1132_v61 = vadd.f32 %v1128_v60, %v1056_v59 }
 0xe54   :  { %v6551_v62 = vpop.f32.mrf.mxu1 }
 0xe55   :  { %7129 = vtanh.f32 %v1132_v61 }
 0xe62   :  { %v7130_v63 = vpop.eup %7129 }
 0xe63   :  { %v1134_v3 = vmul.f32 %v7130_v63, %v7478_v16 }
 0xe65   :  { %v1135_v4 = vadd.f32 %v7483_v18, %v1134_v3 }
 0xe67   :  { %1138 = vrot.lane.b32.xlu0 %v1135_v4, %s7360_s23  ;;  %v1136_v11 = vmul.f32 %v1135_v4, %v1048_v50 }
 0xed9   :  { %v1139_v9 = vpop.permute.xlu0 %1138 }
 0xeda   :  { %v1141_v10 = vmul.f32 %v1139_v9, %v1135_v4 }
 0xedc   :  { %1143 = vrot.lane.b32.xlu1 %v1141_v10, %s7361_s24 }
 0xf4e   :  { %v1144_v12 = vpop.permute.xlu1 %1143 }
 0xf4f   :  { %v1146_v13 = vadd.f32 %v1144_v12, %v1136_v11 }
 0xf51   :  { %7131 = vtanh.f32 %v1146_v13 }
 0xf5e   :  { %v7132_v14 = vpop.eup %7131 }
 0xf5f   :  { %1149 = vrot.lane.b32.xlu0 %v7132_v14, %s7360_s23 }
 0xf63   :  { %120 = vperm.xlu0 %7107, %v37_v15  }
 0xfd1   :  { %v1150_v17 = vpop.permute.xlu0 %1149 }
 0xfd2   :  { %v1152_v19 = vmul.f32 %v1150_v17, %v1135_v4 }
 0xfd4   :  { %1156 = vrot.lane.b32.xlu1 %v1152_v19, %s7361_s24 }
 0xfde   :  { %v121_v20 = vpop.permute.xlu0 %120 }
 0xfdf   :  { %v380_v21 = vmul.f32 %v7466_v7, %v121_v20 }
 0xfe1   :  { %v443_v22 = vadd.f32 %v7471_v8, %v380_v21 }
 0xfe3   :  { %499 = vst [vmem:[#allocation2 + $0xc] sm:$0x3] %v443_v22  ;;  %v40_v22 = vld [vmem:[%s8848_s0 + $0x12] sm:$0x3] }
 0xfea   :  { %v1154_v24 = vld [vmem:[#allocation2 + $0xc] sm:$0x3] }
0x1046   :  { %v1157_v23 = vpop.permute.xlu1 %1156 }
0x1047   :  { %6561 = vmatmul.mubr.msk.f32.vlgmr.msra.gmra.mxu0 %vm556_vm1, %v1157_v23 }
0x1048   :  { %6575 = vmatpush3.msra.mxu0 %v7411_v1  ;;  %6582 = vmatprep.mubr.msk.f32.mxu0 %vm7358_vm0, %v7357_v0 }
0x1049   :  { %6576 = vmatprep.subr.mxu0 %v7357_v0 }
0x104a   :  { %6577 = vmatpush3.msra.mxu0 %v7416_v2 }
0x104b   :  { %6578 = vmatprep.subr.mxu0 %v7357_v0 }
0x104c   :  { %6579 = vmatpush3.msra.mxu0 %v7428_v5 }
0x104d   :  { %6580 = vmatprep.subr.mxu0 %v7357_v0 }
0x104e   :  { %6581 = vmatpush3.msra.mxu0 %v7436_v6 }
0x104f   :  { %6596 = vmatprep.subr.mxu0 %v7357_v0 }
0x1107   :  { %v1226_v25 = vpop.f32.mrf.mxu0 }
0x1108   :  { %v1230_v26 = vadd.f32 %v1226_v25, %v1154_v24 }
0x1109   :  { %v6562_v27 = vpop.f32.mrf.mxu0 }
0x110a   :  { %7133 = vtanh.f32 %v1230_v26 }
0x1117   :  { %v7134_v28 = vpop.eup %7133 }
0x1118   :  { %v1232_v29 = vmul.f32 %v7134_v28, %v7478_v16 }
0x111a   :  { %v1233_v30 = vadd.f32 %v7483_v18, %v1232_v29 }
0x111c   :  { %1236 = vrot.lane.b32.xlu1 %v1233_v30, %s7360_s23  ;;  %v1234_v33 = vmul.f32 %v1233_v30, %v1146_v13 }
0x118e   :  { %v1237_v31 = vpop.permute.xlu1 %1236 }
0x118f   :  { %v1239_v32 = vmul.f32 %v1237_v31, %v1233_v30 }
0x1191   :  { %1241 = vrot.lane.b32.xlu0 %v1239_v32, %s7361_s24 }
0x1203   :  { %v1242_v34 = vpop.permute.xlu0 %1241 }
0x1204   :  { %v1244_v35 = vadd.f32 %v1242_v34, %v1234_v33 }
0x1206   :  { %7135 = vtanh.f32 %v1244_v35 }
0x1213   :  { %v7136_v36 = vpop.eup %7135 }
0x1214   :  { %1247 = vrot.lane.b32.xlu1 %v7136_v36, %s7360_s23 }
0x1218   :  { %125 = vperm.xlu1 %7108, %v38_v37  }
0x1286   :  { %v1248_v38 = vpop.permute.xlu1 %1247 }
0x1287   :  { %v1250_v39 = vmul.f32 %v1248_v38, %v1233_v30 }
0x1289   :  { %1254 = vrot.lane.b32.xlu0 %v1250_v39, %s7361_s24 }
0x1293   :  { %v126_v40 = vpop.permute.xlu1 %125 }
0x1294   :  { %v381_v41 = vmul.f32 %v7466_v7, %v126_v40 }
0x1296   :  { %v444_v42 = vadd.f32 %v7471_v8, %v381_v41 }
0x1298   :  { %500 = vst [vmem:[#allocation2 + $0xe] sm:$0x3] %v444_v42  ;;  %v41_v42 = vld [vmem:[%s8848_s0 + $0x14] sm:$0x3] }
0x129f   :  { %v1252_v44 = vld [vmem:[#allocation2 + $0xe] sm:$0x3] }
0x12fb   :  { %v1255_v43 = vpop.permute.xlu0 %1254 }
0x12fc   :  { %6572 = vmatmul.mubr.msk.f32.vlgmr.msra.gmra.mxu1 %vm556_vm1, %v1255_v43 }
0x12fd   :  { %6586 = vmatpush3.msra.mxu1 %v7411_v1  ;;  %6593 = vmatprep.mubr.msk.f32.mxu1 %vm7358_vm0, %v7357_v0 }
0x12fe   :  { %6587 = vmatprep.subr.mxu1 %v7357_v0 }
0x12ff   :  { %6588 = vmatpush3.msra.mxu1 %v7416_v2 }
0x1300   :  { %6589 = vmatprep.subr.mxu1 %v7357_v0 }
0x1301   :  { %6590 = vmatpush3.msra.mxu1 %v7428_v5 }
0x1302   :  { %6591 = vmatprep.subr.mxu1 %v7357_v0 }
0x1303   :  { %6592 = vmatpush3.msra.mxu1 %v7436_v6 }
0x1304   :  { %6607 = vmatprep.subr.mxu1 %v7357_v0 }
0x13bc   :  { %v1324_v45 = vpop.f32.mrf.mxu1 }
0x13bd   :  { %v1328_v46 = vadd.f32 %v1324_v45, %v1252_v44 }
0x13be   :  { %v6573_v47 = vpop.f32.mrf.mxu1 }
0x13bf   :  { %7137 = vtanh.f32 %v1328_v46 }
0x13cc   :  { %v7138_v48 = vpop.eup %7137 }
0x13cd   :  { %v1330_v49 = vmul.f32 %v7138_v48, %v7478_v16 }
0x13cf   :  { %v1331_v50 = vadd.f32 %v7483_v18, %v1330_v49 }
0x13d1   :  { %1334 = vrot.lane.b32.xlu0 %v1331_v50, %s7360_s23  ;;  %v1332_v53 = vmul.f32 %v1331_v50, %v1244_v35 }
0x1443   :  { %v1335_v51 = vpop.permute.xlu0 %1334 }
0x1444   :  { %v1337_v52 = vmul.f32 %v1335_v51, %v1331_v50 }
0x1446   :  { %1339 = vrot.lane.b32.xlu1 %v1337_v52, %s7361_s24 }
0x14b8   :  { %v1340_v54 = vpop.permute.xlu1 %1339 }
0x14b9   :  { %v1342_v55 = vadd.f32 %v1340_v54, %v1332_v53 }
0x14bb   :  { %7139 = vtanh.f32 %v1342_v55 }
0x14c8   :  { %v7140_v56 = vpop.eup %7139 }
0x14c9   :  { %1345 = vrot.lane.b32.xlu0 %v7140_v56, %s7360_s23 }
0x14cd   :  { %130 = vperm.xlu0 %7107, %v39_v57  }
0x153b   :  { %v1346_v58 = vpop.permute.xlu0 %1345 }
0x153c   :  { %v1348_v59 = vmul.f32 %v1346_v58, %v1331_v50 }
0x153e   :  { %1352 = vrot.lane.b32.xlu1 %v1348_v59, %s7361_s24 }
0x1548   :  { %v131_v60 = vpop.permute.xlu0 %130 }
0x1549   :  { %v382_v61 = vmul.f32 %v7466_v7, %v131_v60 }
0x154b   :  { %v445_v62 = vadd.f32 %v7471_v8, %v382_v61 }
0x154d   :  { %501 = vst [vmem:[#allocation2 + $0x10] sm:$0x3] %v445_v62  ;;  %v42_v62 = vld [vmem:[%s8848_s0 + $0x16] sm:$0x3] }
0x1554   :  { %v1350_v3 = vld [vmem:[#allocation2 + $0x10] sm:$0x3] }
0x15b0   :  { %v1353_v63 = vpop.permute.xlu1 %1352 }
0x15b1   :  { %6583 = vmatmul.mubr.msk.f32.vlgmr.msra.gmra.mxu0 %vm556_vm1, %v1353_v63 }
0x15b2   :  { %6597 = vmatpush3.msra.mxu0 %v7411_v1  ;;  %6604 = vmatprep.mubr.msk.f32.mxu0 %vm7358_vm0, %v7357_v0 }
0x15b3   :  { %6598 = vmatprep.subr.mxu0 %v7357_v0 }
0x15b4   :  { %6599 = vmatpush3.msra.mxu0 %v7416_v2 }
0x15b5   :  { %6600 = vmatprep.subr.mxu0 %v7357_v0 }
0x15b6   :  { %6601 = vmatpush3.msra.mxu0 %v7428_v5 }
0x15b7   :  { %6602 = vmatprep.subr.mxu0 %v7357_v0 }
0x15b8   :  { %6603 = vmatpush3.msra.mxu0 %v7436_v6 }
0x15b9   :  { %6618 = vmatprep.subr.mxu0 %v7357_v0 }
0x1671   :  { %v1422_v4 = vpop.f32.mrf.mxu0 }
0x1672   :  { %v1426_v9 = vadd.f32 %v1422_v4, %v1350_v3 }
0x1673   :  { %v6584_v10 = vpop.f32.mrf.mxu0 }
0x1674   :  { %7141 = vtanh.f32 %v1426_v9 }
0x1681   :  { %v7142_v11 = vpop.eup %7141 }
0x1682   :  { %v1428_v12 = vmul.f32 %v7142_v11, %v7478_v16 }
0x1684   :  { %v1429_v13 = vadd.f32 %v7483_v18, %v1428_v12 }
0x1686   :  { %1432 = vrot.lane.b32.xlu1 %v1429_v13, %s7360_s23  ;;  %v1430_v17 = vmul.f32 %v1429_v13, %v1342_v55 }
0x16f8   :  { %v1433_v14 = vpop.permute.xlu1 %1432 }
0x16f9   :  { %v1435_v15 = vmul.f32 %v1433_v14, %v1429_v13 }
0x16fb   :  { %1437 = vrot.lane.b32.xlu0 %v1435_v15, %s7361_s24 }
0x176d   :  { %v1438_v19 = vpop.permute.xlu0 %1437 }
0x176e   :  { %v1440_v20 = vadd.f32 %v1438_v19, %v1430_v17 }
0x1770   :  { %7143 = vtanh.f32 %v1440_v20 }
0x177d   :  { %v7144_v21 = vpop.eup %7143 }
0x177e   :  { %1443 = vrot.lane.b32.xlu1 %v7144_v21, %s7360_s23 }
0x1782   :  { %135 = vperm.xlu1 %7108, %v40_v22  }
0x17f0   :  { %v1444_v23 = vpop.permute.xlu1 %1443 }
0x17f1   :  { %v1446_v24 = vmul.f32 %v1444_v23, %v1429_v13 }
0x17f3   :  { %1450 = vrot.lane.b32.xlu0 %v1446_v24, %s7361_s24 }
0x17fd   :  { %v136_v25 = vpop.permute.xlu1 %135 }
0x17fe   :  { %v383_v26 = vmul.f32 %v7466_v7, %v136_v25 }
0x1800   :  { %v446_v27 = vadd.f32 %v7471_v8, %v383_v26 }
0x1802   :  { %502 = vst [vmem:[#allocation2 + $0x12] sm:$0x3] %v446_v27  ;;  %v43_v27 = vld [vmem:[%s8848_s0 + $0x18] sm:$0x3] }
0x1809   :  { %v1448_v29 = vld [vmem:[#allocation2 + $0x12] sm:$0x3] }
0x1865   :  { %v1451_v28 = vpop.permute.xlu0 %1450 }
0x1866   :  { %6594 = vmatmul.mubr.msk.f32.vlgmr.msra.gmra.mxu1 %vm556_vm1, %v1451_v28 }
0x1867   :  { %6608 = vmatpush3.msra.mxu1 %v7411_v1  ;;  %6615 = vmatprep.mubr.msk.f32.mxu1 %vm7358_vm0, %v7357_v0 }
0x1868   :  { %6609 = vmatprep.subr.mxu1 %v7357_v0 }
0x1869   :  { %6610 = vmatpush3.msra.mxu1 %v7416_v2 }
0x186a   :  { %6611 = vmatprep.subr.mxu1 %v7357_v0 }
0x186b   :  { %6612 = vmatpush3.msra.mxu1 %v7428_v5 }
0x186c   :  { %6613 = vmatprep.subr.mxu1 %v7357_v0 }
0x186d   :  { %6614 = vmatpush3.msra.mxu1 %v7436_v6 }
0x186e   :  { %6629 = vmatprep.subr.mxu1 %v7357_v0 }
0x1926   :  { %v1520_v30 = vpop.f32.mrf.mxu1 }
0x1927   :  { %v1524_v31 = vadd.f32 %v1520_v30, %v1448_v29 }
0x1928   :  { %v6595_v32 = vpop.f32.mrf.mxu1 }
0x1929   :  { %7145 = vtanh.f32 %v1524_v31 }
0x1936   :  { %v7146_v33 = vpop.eup %7145 }
0x1937   :  { %v1526_v34 = vmul.f32 %v7146_v33, %v7478_v16 }
0x1939   :  { %v1527_v35 = vadd.f32 %v7483_v18, %v1526_v34 }
0x193b   :  { %1530 = vrot.lane.b32.xlu0 %v1527_v35, %s7360_s23  ;;  %v1528_v38 = vmul.f32 %v1527_v35, %v1440_v20 }
0x19ad   :  { %v1531_v36 = vpop.permute.xlu0 %1530 }
0x19ae   :  { %v1533_v37 = vmul.f32 %v1531_v36, %v1527_v35 }
0x19b0   :  { %1535 = vrot.lane.b32.xlu1 %v1533_v37, %s7361_s24 }
0x1a22   :  { %v1536_v39 = vpop.permute.xlu1 %1535 }
0x1a23   :  { %v1538_v40 = vadd.f32 %v1536_v39, %v1528_v38 }
0x1a25   :  { %7147 = vtanh.f32 %v1538_v40 }
0x1a32   :  { %v7148_v41 = vpop.eup %7147 }
0x1a33   :  { %1541 = vrot.lane.b32.xlu0 %v7148_v41, %s7360_s23 }
0x1a37   :  { %140 = vperm.xlu0 %7107, %v41_v42  }
0x1aa5   :  { %v1542_v43 = vpop.permute.xlu0 %1541 }
0x1aa6   :  { %v1544_v44 = vmul.f32 %v1542_v43, %v1527_v35  ;;  %v44_v43 = vld [vmem:[%s8848_s0 + $0x1a] sm:$0x3] }
0x1aa8   :  { %1548 = vrot.lane.b32.xlu1 %v1544_v44, %s7361_s24 }
0x1ab2   :  { %v141_v45 = vpop.permute.xlu0 %140 }
0x1ab3   :  { %v384_v46 = vmul.f32 %v7466_v7, %v141_v45 }
0x1ab5   :  { %v447_v47 = vadd.f32 %v7471_v8, %v384_v46 }
0x1ab7   :  { %503 = vst [vmem:[#allocation2 + $0x14] sm:$0x3] %v447_v47 }
0x1abe   :  { %v1546_v49 = vld [vmem:[#allocation2 + $0x14] sm:$0x3] }
0x1b1a   :  { %v1549_v48 = vpop.permute.xlu1 %1548 }
0x1b1b   :  { %6605 = vmatmul.mubr.msk.f32.vlgmr.msra.gmra.mxu0 %vm556_vm1, %v1549_v48 }
0x1b1c   :  { %6619 = vmatpush3.msra.mxu0 %v7411_v1  ;;  %6626 = vmatprep.mubr.msk.f32.mxu0 %vm7358_vm0, %v7357_v0 }
0x1b1d   :  { %6620 = vmatprep.subr.mxu0 %v7357_v0 }
0x1b1e   :  { %6621 = vmatpush3.msra.mxu0 %v7416_v2 }
0x1b1f   :  { %6622 = vmatprep.subr.mxu0 %v7357_v0 }
0x1b20   :  { %6623 = vmatpush3.msra.mxu0 %v7428_v5 }
0x1b21   :  { %6624 = vmatprep.subr.mxu0 %v7357_v0 }
0x1b22   :  { %6625 = vmatpush3.msra.mxu0 %v7436_v6 }
0x1b23   :  { %6640 = vmatprep.subr.mxu0 %v7357_v0 }
0x1bdb   :  { %v1618_v50 = vpop.f32.mrf.mxu0 }
0x1bdc   :  { %v1622_v51 = vadd.f32 %v1618_v50, %v1546_v49  ;;  %v7764_v50 = vld [vmem:[%s8847_s5 + $0x18] sm:$0xff] }
0x1bdd   :  { %v6606_v52 = vpop.f32.mrf.mxu0 }
0x1bde   :  { %7149 = vtanh.f32 %v1622_v51  ;;  %v7787_v51 = vld [vmem:[%s8847_s5] sm:$0xff] }
0x1beb   :  { %v7150_v53 = vpop.eup %7149 }
0x1bec   :  { %v1624_v54 = vmul.f32 %v7150_v53, %v7478_v16 }
0x1bee   :  { %v1625_v55 = vadd.f32 %v7483_v18, %v1624_v54 }
0x1bf0   :  { %1628 = vrot.lane.b32.xlu1 %v1625_v55, %s7360_s23  ;;  %v1626_v58 = vmul.f32 %v1625_v55, %v1538_v40 }
0x1c62   :  { %v1629_v56 = vpop.permute.xlu1 %1628 }
0x1c63   :  { %v1631_v57 = vmul.f32 %v1629_v56, %v1625_v55 }
0x1c65   :  { %1633 = vrot.lane.b32.xlu0 %v1631_v57, %s7361_s24 }
0x1cd7   :  { %v1634_v59 = vpop.permute.xlu0 %1633 }
0x1cd8   :  { %v1636_v60 = vadd.f32 %v1634_v59, %v1626_v58 }
0x1cda   :  { %7151 = vtanh.f32 %v1636_v60 }
0x1ce7   :  { %v7152_v61 = vpop.eup %7151 }
0x1ce8   :  { %1639 = vrot.lane.b32.xlu1 %v7152_v61, %s7360_s23 }
0x1cec   :  { %145 = vperm.xlu1 %7108, %v42_v62  }
0x1d5a   :  { %v1640_v63 = vpop.permute.xlu1 %1639 }
0x1d5b   :  { %v1642_v3 = vmul.f32 %v1640_v63, %v1625_v55 }
0x1d5d   :  { %1646 = vrot.lane.b32.xlu0 %v1642_v3, %s7361_s24 }
0x1d67   :  { %v146_v4 = vpop.permute.xlu1 %145 }
0x1d68   :  { %v385_v9 = vmul.f32 %v7466_v7, %v146_v4  ;;  %v45_v4 = vld [vmem:[%s8848_s0 + $0x1c] sm:$0x3] }
0x1d6a   :  { %v448_v10 = vadd.f32 %v7471_v8, %v385_v9 }
0x1d6c   :  { %504 = vst [vmem:[#allocation2 + $0x16] sm:$0x3] %v448_v10  ;;  %v7803_v10 = vld [vmem:[%s8849_s1] ss:$0 sm:$0xff] }
0x1d73   :  { %v1644_v12 = vld [vmem:[#allocation2 + $0x16] sm:$0x3] }
0x1dcf   :  { %v1647_v11 = vpop.permute.xlu0 %1646 }
0x1dd0   :  { %6616 = vmatmul.mubr.msk.f32.vlgmr.msra.gmra.mxu1 %vm556_vm1, %v1647_v11 }
0x1dd1   :  { %6630 = vmatpush3.msra.mxu1 %v7411_v1  ;;  %6637 = vmatprep.mubr.msk.f32.mxu1 %vm7358_vm0, %v7357_v0 }
0x1dd2   :  { %6631 = vmatprep.subr.mxu1 %v7357_v0 }
0x1dd3   :  { %6632 = vmatpush3.msra.mxu1 %v7416_v2 }
0x1dd4   :  { %6633 = vmatprep.subr.mxu1 %v7357_v0 }
0x1dd5   :  { %6634 = vmatpush3.msra.mxu1 %v7428_v5 }
0x1dd6   :  { %6635 = vmatprep.subr.mxu1 %v7357_v0 }
0x1dd7   :  { %6636 = vmatpush3.msra.mxu1 %v7436_v6 }
0x1dd8   :  { %6651 = vmatprep.subr.mxu1 %v7357_v0 }
0x1e90   :  { %v1716_v13 = vpop.f32.mrf.mxu1 }
0x1e91   :  { %v1720_v14 = vadd.f32 %v1716_v13, %v1644_v12  ;;  %v7809_v12 = vld [vmem:[%s8850_s2] ss:$0 sm:$0xff] }
0x1e92   :  { %v6617_v15 = vpop.f32.mrf.mxu1 }
0x1e93   :  { %7153 = vtanh.f32 %v1720_v14 }
0x1ea0   :  { %v7154_v17 = vpop.eup %7153 }
0x1ea1   :  { %v1722_v19 = vmul.f32 %v7154_v17, %v7478_v16 }
0x1ea3   :  { %v1723_v20 = vadd.f32 %v7483_v18, %v1722_v19 }
0x1ea5   :  { %1726 = vrot.lane.b32.xlu0 %v1723_v20, %s7360_s23  ;;  %v1724_v23 = vmul.f32 %v1723_v20, %v1636_v60 }
0x1f17   :  { %v1727_v21 = vpop.permute.xlu0 %1726 }
0x1f18   :  { %v1729_v22 = vmul.f32 %v1727_v21, %v1723_v20 }
0x1f1a   :  { %1731 = vrot.lane.b32.xlu1 %v1729_v22, %s7361_s24  ;;  %v7826_v22 = vld [vmem:[%s8851_s3] ss:$0 sm:$0xff] }
0x1f8c   :  { %v1732_v24 = vpop.permute.xlu1 %1731 }
0x1f8d   :  { %v1734_v25 = vadd.f32 %v1732_v24, %v1724_v23  ;;  %v7832_v24 = vld [vmem:[%s8852_s4] ss:$0 sm:$0xff] }
0x1f8f   :  { %7155 = vtanh.f32 %v1734_v25 }
0x1f9c   :  { %v7156_v26 = vpop.eup %7155 }
0x1f9d   :  { %1737 = vrot.lane.b32.xlu0 %v7156_v26, %s7360_s23 }
0x1fa1   :  { %150 = vperm.xlu0 %7107, %v43_v27  }
0x200f   :  { %v1738_v28 = vpop.permute.xlu0 %1737 }
0x2010   :  { %v1740_v29 = vmul.f32 %v1738_v28, %v1723_v20 }
0x2012   :  { %1744 = vrot.lane.b32.xlu1 %v1740_v29, %s7361_s24 }
0x201c   :  { %v151_v30 = vpop.permute.xlu0 %150 }
0x201d   :  { %v386_v31 = vmul.f32 %v7466_v7, %v151_v30 }
0x201f   :  { %v449_v32 = vadd.f32 %v7471_v8, %v386_v31 }
0x2021   :  { %505 = vst [vmem:[#allocation2 + $0x18] sm:$0x3] %v449_v32  ;;  %v46_v32 = vld [vmem:[%s8848_s0 + $0x1e] sm:$0x3] }
0x2028   :  { %v1742_v34 = vld [vmem:[#allocation2 + $0x18] sm:$0x3] }
0x2084   :  { %v1745_v33 = vpop.permute.xlu1 %1744 }
0x2085   :  { %6627 = vmatmul.mubr.msk.f32.vlgmr.msra.gmra.mxu0 %vm556_vm1, %v1745_v33 }
0x2086   :  { %6641 = vmatpush3.msra.mxu0 %v7411_v1  ;;  %6648 = vmatprep.mubr.msk.f32.mxu0 %vm7358_vm0, %v7357_v0 }
0x2087   :  { %6642 = vmatprep.subr.mxu0 %v7357_v0 }
0x2088   :  { %6643 = vmatpush3.msra.mxu0 %v7416_v2 }
0x2089   :  { %6644 = vmatprep.subr.mxu0 %v7357_v0 }
0x208a   :  { %6645 = vmatpush3.msra.mxu0 %v7428_v5 }
0x208b   :  { %6646 = vmatprep.subr.mxu0 %v7357_v0 }
0x208c   :  { %6647 = vmatpush3.msra.mxu0 %v7436_v6 }
0x208d   :  { %6662 = vmatprep.subr.mxu0 %v7357_v0 }
0x2145   :  { %v1814_v35 = vpop.f32.mrf.mxu0 }
0x2146   :  { %v1818_v1 = vadd.f32 %v1814_v35, %v1742_v34 }
0x2147   :  { %v6628_v36 = vpop.f32.mrf.mxu0 }
0x2148   :  { %7157 = vtanh.f32 %v1818_v1 }
0x2155   :  { %v7158_v37 = vpop.eup %7157 }
0x2156   :  { %v1820_v38 = vmul.f32 %v7158_v37, %v7478_v16 }
0x2158   :  { %v1821_v2 = vadd.f32 %v7483_v18, %v1820_v38 }
0x215a   :  { %1824 = vrot.lane.b32.xlu1 %v1821_v2, %s7360_s23  ;;  %v1822_v40 = vmul.f32 %v1821_v2, %v1734_v25 }
0x21cc   :  { %v1825_v39 = vpop.permute.xlu1 %1824 }
0x21cd   :  { %v1827_v5 = vmul.f32 %v1825_v39, %v1821_v2 }
0x21cf   :  { %1829 = vrot.lane.b32.xlu0 %v1827_v5, %s7361_s24 }
0x2241   :  { %v1830_v6 = vpop.permute.xlu0 %1829 }
0x2242   :  { %v1832_v41 = vadd.f32 %v1830_v6, %v1822_v40 }
0x2244   :  { %7159 = vtanh.f32 %v1832_v41 }
0x2251   :  { %v7160_v42 = vpop.eup %7159 }
0x2252   :  { %1835 = vrot.lane.b32.xlu1 %v7160_v42, %s7360_s23 }
0x2256   :  { %155 = vperm.xlu1 %7108, %v44_v43  }
0x22c4   :  { %v1836_v44 = vpop.permute.xlu1 %1835 }
0x22c5   :  { %v1838_v45 = vmul.f32 %v1836_v44, %v1821_v2 }
0x22c7   :  { %1842 = vrot.lane.b32.xlu0 %v1838_v45, %s7361_s24 }
0x22d1   :  { %v156_v46 = vpop.permute.xlu1 %155 }
0x22d2   :  { %v387_v47 = vmul.f32 %v7466_v7, %v156_v46  ;;  %v7773_v7 = vld [vmem:[%s8847_s5 + $0x10] sm:$0xff] }
0x22d4   :  { %v450_v48 = vadd.f32 %v7471_v8, %v387_v47  ;;  %v7780_v8 = vld [vmem:[%s8847_s5 + $0x8] sm:$0xff] }
0x22d6   :  { %506 = vst [vmem:[#allocation2 + $0x1a] sm:$0x3] %v450_v48  ;;  %v47_v48 = vld [vmem:[%s8848_s0 + $0x20] sm:$0x3] }
0x22dd   :  { %v1840_v52 = vld [vmem:[#allocation2 + $0x1a] sm:$0x3] }
0x2339   :  { %v1843_v49 = vpop.permute.xlu0 %1842 }
0x233a   :  { %6638 = vmatmul.mubr.msk.f32.vlgmr.msra.gmra.mxu1 %vm556_vm1, %v1843_v49 }
0x233b   :  { %6652 = vmatpush3.msra.mxu1 %v7764_v50  ;;  %6659 = vmatprep.mubr.msk.f32.mxu1 %vm7358_vm0, %v7357_v0 }
0x233c   :  { %6653 = vmatprep.subr.mxu1 %v7357_v0 }
0x233d   :  { %6654 = vmatpush3.msra.mxu1 %v7773_v7 }
0x233e   :  { %6655 = vmatprep.subr.mxu1 %v7357_v0 }
0x233f   :  { %6656 = vmatpush3.msra.mxu1 %v7780_v8 }
0x2340   :  { %6657 = vmatprep.subr.mxu1 %v7357_v0 }
0x2341   :  { %6658 = vmatpush3.msra.mxu1 %v7787_v51 }
0x2342   :  { %6673 = vmatprep.subr.mxu1 %v7357_v0 }
0x23fa   :  { %v1912_v53 = vpop.f32.mrf.mxu1 }
0x23fb   :  { %v1916_v54 = vadd.f32 %v1912_v53, %v1840_v52 }
0x23fc   :  { %v6639_v55 = vpop.f32.mrf.mxu1 }
0x23fd   :  { %7161 = vtanh.f32 %v1916_v54 }
0x240a   :  { %v7162_v56 = vpop.eup %7161 }
0x240b   :  { %v1918_v57 = vmul.f32 %v7162_v56, %v7478_v16 }
0x240d   :  { %v1919_v58 = vadd.f32 %v7483_v18, %v1918_v57 }
0x240f   :  { %1922 = vrot.lane.b32.xlu0 %v1919_v58, %s7360_s23  ;;  %v1920_v61 = vmul.f32 %v1919_v58, %v1832_v41 }
0x2481   :  { %v1923_v59 = vpop.permute.xlu0 %1922 }
0x2482   :  { %v1925_v60 = vmul.f32 %v1923_v59, %v1919_v58 }
0x2484   :  { %1927 = vrot.lane.b32.xlu1 %v1925_v60, %s7361_s24 }
0x24f6   :  { %v1928_v62 = vpop.permute.xlu1 %1927 }
0x24f7   :  { %v1930_v63 = vadd.f32 %v1928_v62, %v1920_v61 }
0x24f9   :  { %7163 = vtanh.f32 %v1930_v63 }
0x2506   :  { %v7164_v3 = vpop.eup %7163 }
0x2507   :  { %1933 = vrot.lane.b32.xlu0 %v7164_v3, %s7360_s23 }
0x250b   :  { %160 = vperm.xlu0 %7107, %v45_v4  }
0x2579   :  { %v1934_v16 = vpop.permute.xlu0 %1933 }
0x257a   :  { %v1936_v18 = vmul.f32 %v1934_v16, %v1919_v58 }
0x257c   :  { %1940 = vrot.lane.b32.xlu1 %v1936_v18, %s7361_s24 }
0x2586   :  { %v161_v9 = vpop.permute.xlu0 %160 }
0x2587   :  { %v388_v11 = vmul.f32 %v7803_v10, %v161_v9 }
0x2589   :  { %v451_v13 = vadd.f32 %v7809_v12, %v388_v11 }
0x258b   :  { %507 = vst [vmem:[#allocation2 + $0x1c] sm:$0x3] %v451_v13  ;;  %v48_v13 = vld [vmem:[%s8848_s0 + $0x22] sm:$0x3] }
0x2592   :  { %v1938_v15 = vld [vmem:[#allocation2 + $0x1c] sm:$0x3] }
0x25ee   :  { %v1941_v14 = vpop.permute.xlu1 %1940 }
0x25ef   :  { %6649 = vmatmul.mubr.msk.f32.vlgmr.msra.gmra.mxu0 %vm556_vm1, %v1941_v14 }
0x25f0   :  { %6663 = vmatpush3.msra.mxu0 %v7764_v50  ;;  %6670 = vmatprep.mubr.msk.f32.mxu0 %vm7358_vm0, %v7357_v0 }
0x25f1   :  { %6664 = vmatprep.subr.mxu0 %v7357_v0 }
0x25f2   :  { %6665 = vmatpush3.msra.mxu0 %v7773_v7 }
0x25f3   :  { %6666 = vmatprep.subr.mxu0 %v7357_v0 }
0x25f4   :  { %6667 = vmatpush3.msra.mxu0 %v7780_v8 }
0x25f5   :  { %6668 = vmatprep.subr.mxu0 %v7357_v0 }
0x25f6   :  { %6669 = vmatpush3.msra.mxu0 %v7787_v51 }
0x25f7   :  { %6684 = vmatprep.subr.mxu0 %v7357_v0 }
0x26af   :  { %v2010_v17 = vpop.f32.mrf.mxu0 }
0x26b0   :  { %v2014_v19 = vadd.f32 %v2010_v17, %v1938_v15 }
0x26b1   :  { %v6650_v20 = vpop.f32.mrf.mxu0 }
0x26b2   :  { %7165 = vtanh.f32 %v2014_v19 }
0x26bf   :  { %v7166_v21 = vpop.eup %7165 }
0x26c0   :  { %v2016_v23 = vmul.f32 %v7826_v22, %v7166_v21 }
0x26c2   :  { %v2017_v25 = vadd.f32 %v7832_v24, %v2016_v23 }
0x26c4   :  { %2020 = vrot.lane.b32.xlu1 %v2017_v25, %s7360_s23  ;;  %v2018_v28 = vmul.f32 %v2017_v25, %v1930_v63 }
0x2736   :  { %v2021_v26 = vpop.permute.xlu1 %2020 }
0x2737   :  { %v2023_v27 = vmul.f32 %v2021_v26, %v2017_v25 }
0x2739   :  { %2025 = vrot.lane.b32.xlu0 %v2023_v27, %s7361_s24 }
0x27ab   :  { %v2026_v29 = vpop.permute.xlu0 %2025 }
0x27ac   :  { %v2028_v30 = vadd.f32 %v2026_v29, %v2018_v28 }
0x27ae   :  { %7167 = vtanh.f32 %v2028_v30 }
0x27bb   :  { %v7168_v31 = vpop.eup %7167 }
0x27bc   :  { %2031 = vrot.lane.b32.xlu1 %v7168_v31, %s7360_s23 }
0x27c0   :  { %165 = vperm.xlu1 %7108, %v46_v32  }
0x282e   :  { %v2032_v33 = vpop.permute.xlu1 %2031 }
0x282f   :  { %v2034_v34 = vmul.f32 %v2032_v33, %v2017_v25 }
0x2831   :  { %2038 = vrot.lane.b32.xlu0 %v2034_v34, %s7361_s24 }
0x283b   :  { %v166_v35 = vpop.permute.xlu1 %165 }
0x283c   :  { %v389_v1 = vmul.f32 %v7803_v10, %v166_v35 }
0x283e   :  { %v452_v36 = vadd.f32 %v7809_v12, %v389_v1 }
0x2840   :  { %508 = vst [vmem:[#allocation2 + $0x1e] sm:$0x3] %v452_v36  ;;  %v49_v36 = vld [vmem:[%s8848_s0 + $0x24] sm:$0x3] }
0x2847   :  { %v2036_v38 = vld [vmem:[#allocation2 + $0x1e] sm:$0x3] }
0x28a3   :  { %v2039_v37 = vpop.permute.xlu0 %2038 }
0x28a4   :  { %6660 = vmatmul.mubr.msk.f32.vlgmr.msra.gmra.mxu1 %vm556_vm1, %v2039_v37 }
0x28a5   :  { %6674 = vmatpush3.msra.mxu1 %v7764_v50  ;;  %6681 = vmatprep.mubr.msk.f32.mxu1 %vm7358_vm0, %v7357_v0 }
0x28a6   :  { %6675 = vmatprep.subr.mxu1 %v7357_v0 }
0x28a7   :  { %6676 = vmatpush3.msra.mxu1 %v7773_v7 }
0x28a8   :  { %6677 = vmatprep.subr.mxu1 %v7357_v0 }
0x28a9   :  { %6678 = vmatpush3.msra.mxu1 %v7780_v8 }
0x28aa   :  { %6679 = vmatprep.subr.mxu1 %v7357_v0 }
0x28ab   :  { %6680 = vmatpush3.msra.mxu1 %v7787_v51 }
0x28ac   :  { %6695 = vmatprep.subr.mxu1 %v7357_v0 }
0x2964   :  { %v2108_v2 = vpop.f32.mrf.mxu1 }
0x2965   :  { %v2112_v39 = vadd.f32 %v2108_v2, %v2036_v38 }
0x2966   :  { %v6661_v5 = vpop.f32.mrf.mxu1 }
0x2967   :  { %7169 = vtanh.f32 %v2112_v39 }
0x2974   :  { %v7170_v40 = vpop.eup %7169 }
0x2975   :  { %v2114_v6 = vmul.f32 %v7826_v22, %v7170_v40 }
0x2977   :  { %v2115_v41 = vadd.f32 %v7832_v24, %v2114_v6 }
0x2979   :  { %2118 = vrot.lane.b32.xlu0 %v2115_v41, %s7360_s23  ;;  %v2116_v44 = vmul.f32 %v2115_v41, %v2028_v30 }
0x29eb   :  { %v2119_v42 = vpop.permute.xlu0 %2118 }
0x29ec   :  { %v2121_v43 = vmul.f32 %v2119_v42, %v2115_v41 }
0x29ee   :  { %2123 = vrot.lane.b32.xlu1 %v2121_v43, %s7361_s24 }
0x2a60   :  { %v2124_v45 = vpop.permute.xlu1 %2123 }
0x2a61   :  { %v2126_v46 = vadd.f32 %v2124_v45, %v2116_v44 }
0x2a63   :  { %7171 = vtanh.f32 %v2126_v46 }
0x2a70   :  { %v7172_v47 = vpop.eup %7171 }
0x2a71   :  { %2129 = vrot.lane.b32.xlu0 %v7172_v47, %s7360_s23 }
0x2a75   :  { %170 = vperm.xlu0 %7107, %v47_v48  }
0x2ae3   :  { %v2130_v49 = vpop.permute.xlu0 %2129 }
0x2ae4   :  { %v2132_v52 = vmul.f32 %v2130_v49, %v2115_v41 }
0x2ae6   :  { %2136 = vrot.lane.b32.xlu1 %v2132_v52, %s7361_s24 }
0x2af0   :  { %v171_v53 = vpop.permute.xlu0 %170 }
0x2af1   :  { %v390_v54 = vmul.f32 %v7803_v10, %v171_v53 }
0x2af3   :  { %v453_v55 = vadd.f32 %v7809_v12, %v390_v54 }
0x2af5   :  { %509 = vst [vmem:[#allocation2 + $0x20] sm:$0x3] %v453_v55  ;;  %v50_v55 = vld [vmem:[%s8848_s0 + $0x26] sm:$0x3] }
0x2afc   :  { %v2134_v57 = vld [vmem:[#allocation2 + $0x20] sm:$0x3] }
0x2b58   :  { %v2137_v56 = vpop.permute.xlu1 %2136 }
0x2b59   :  { %6671 = vmatmul.mubr.msk.f32.vlgmr.msra.gmra.mxu0 %vm556_vm1, %v2137_v56 }
0x2b5a   :  { %6685 = vmatpush3.msra.mxu0 %v7764_v50  ;;  %6692 = vmatprep.mubr.msk.f32.mxu0 %vm7358_vm0, %v7357_v0 }
0x2b5b   :  { %6686 = vmatprep.subr.mxu0 %v7357_v0 }
0x2b5c   :  { %6687 = vmatpush3.msra.mxu0 %v7773_v7 }
0x2b5d   :  { %6688 = vmatprep.subr.mxu0 %v7357_v0 }
0x2b5e   :  { %6689 = vmatpush3.msra.mxu0 %v7780_v8 }
0x2b5f   :  { %6690 = vmatprep.subr.mxu0 %v7357_v0 }
0x2b60   :  { %6691 = vmatpush3.msra.mxu0 %v7787_v51 }
0x2b61   :  { %6706 = vmatprep.subr.mxu0 %v7357_v0 }
0x2c19   :  { %v2206_v58 = vpop.f32.mrf.mxu0 }
0x2c1a   :  { %v2210_v59 = vadd.f32 %v2206_v58, %v2134_v57 }
0x2c1b   :  { %v6672_v60 = vpop.f32.mrf.mxu0 }
0x2c1c   :  { %7173 = vtanh.f32 %v2210_v59 }
0x2c29   :  { %v7174_v61 = vpop.eup %7173 }
0x2c2a   :  { %v2212_v62 = vmul.f32 %v7826_v22, %v7174_v61 }
0x2c2c   :  { %v2213_v63 = vadd.f32 %v7832_v24, %v2212_v62 }
0x2c2e   :  { %2216 = vrot.lane.b32.xlu1 %v2213_v63, %s7360_s23  ;;  %v2214_v16 = vmul.f32 %v2213_v63, %v2126_v46 }
0x2ca0   :  { %v2217_v3 = vpop.permute.xlu1 %2216 }
0x2ca1   :  { %v2219_v4 = vmul.f32 %v2217_v3, %v2213_v63 }
0x2ca3   :  { %2221 = vrot.lane.b32.xlu0 %v2219_v4, %s7361_s24 }
0x2d15   :  { %v2222_v18 = vpop.permute.xlu0 %2221 }
0x2d16   :  { %v2224_v9 = vadd.f32 %v2222_v18, %v2214_v16 }
0x2d18   :  { %7175 = vtanh.f32 %v2224_v9 }
0x2d25   :  { %v7176_v11 = vpop.eup %7175 }
0x2d26   :  { %2227 = vrot.lane.b32.xlu1 %v7176_v11, %s7360_s23 }
0x2d2a   :  { %175 = vperm.xlu1 %7108, %v48_v13  }
0x2d98   :  { %v2228_v14 = vpop.permute.xlu1 %2227 }
0x2d99   :  { %v2230_v15 = vmul.f32 %v2228_v14, %v2213_v63 }
0x2d9b   :  { %2234 = vrot.lane.b32.xlu0 %v2230_v15, %s7361_s24 }
0x2da5   :  { %v176_v17 = vpop.permute.xlu1 %175 }
0x2da6   :  { %v391_v19 = vmul.f32 %v7803_v10, %v176_v17 }
0x2da8   :  { %v454_v20 = vadd.f32 %v7809_v12, %v391_v19 }
0x2daa   :  { %510 = vst [vmem:[#allocation2 + $0x22] sm:$0x3] %v454_v20  ;;  %v51_v20 = vld [vmem:[%s8848_s0 + $0x28] sm:$0x3] }
0x2db1   :  { %v2232_v23 = vld [vmem:[#allocation2 + $0x22] sm:$0x3] }
0x2e0d   :  { %v2235_v21 = vpop.permute.xlu0 %2234 }
0x2e0e   :  { %6682 = vmatmul.mubr.msk.f32.vlgmr.msra.gmra.mxu1 %vm556_vm1, %v2235_v21 }
0x2e0f   :  { %6696 = vmatpush3.msra.mxu1 %v7764_v50  ;;  %6703 = vmatprep.mubr.msk.f32.mxu1 %vm7358_vm0, %v7357_v0 }
0x2e10   :  { %6697 = vmatprep.subr.mxu1 %v7357_v0 }
0x2e11   :  { %6698 = vmatpush3.msra.mxu1 %v7773_v7 }
0x2e12   :  { %6699 = vmatprep.subr.mxu1 %v7357_v0 }
0x2e13   :  { %6700 = vmatpush3.msra.mxu1 %v7780_v8 }
0x2e14   :  { %6701 = vmatprep.subr.mxu1 %v7357_v0 }
0x2e15   :  { %6702 = vmatpush3.msra.mxu1 %v7787_v51 }
0x2e16   :  { %6717 = vmatprep.subr.mxu1 %v7357_v0 }
0x2ece   :  { %v2304_v25 = vpop.f32.mrf.mxu1 }
0x2ecf   :  { %v2308_v26 = vadd.f32 %v2304_v25, %v2232_v23 }
0x2ed0   :  { %v6683_v27 = vpop.f32.mrf.mxu1 }
0x2ed1   :  { %7177 = vtanh.f32 %v2308_v26 }
0x2ede   :  { %v7178_v28 = vpop.eup %7177 }
0x2edf   :  { %v2310_v29 = vmul.f32 %v7826_v22, %v7178_v28 }
0x2ee1   :  { %v2311_v30 = vadd.f32 %v7832_v24, %v2310_v29 }
0x2ee3   :  { %2314 = vrot.lane.b32.xlu0 %v2311_v30, %s7360_s23  ;;  %v2312_v33 = vmul.f32 %v2311_v30, %v2224_v9 }
0x2f55   :  { %v2315_v31 = vpop.permute.xlu0 %2314 }
0x2f56   :  { %v2317_v32 = vmul.f32 %v2315_v31, %v2311_v30 }
0x2f58   :  { %2319 = vrot.lane.b32.xlu1 %v2317_v32, %s7361_s24 }
0x2fca   :  { %v2320_v34 = vpop.permute.xlu1 %2319 }
0x2fcb   :  { %v2322_v35 = vadd.f32 %v2320_v34, %v2312_v33 }
0x2fcd   :  { %7179 = vtanh.f32 %v2322_v35 }
0x2fda   :  { %v7180_v1 = vpop.eup %7179 }
0x2fdb   :  { %2325 = vrot.lane.b32.xlu0 %v7180_v1, %s7360_s23 }
0x2fdf   :  { %180 = vperm.xlu0 %7107, %v49_v36  }
0x304d   :  { %v2326_v37 = vpop.permute.xlu0 %2325 }
0x304e   :  { %v2328_v38 = vmul.f32 %v2326_v37, %v2311_v30 }
0x3050   :  { %2332 = vrot.lane.b32.xlu1 %v2328_v38, %s7361_s24 }
0x305a   :  { %v181_v2 = vpop.permute.xlu0 %180 }
0x305b   :  { %v392_v39 = vmul.f32 %v7803_v10, %v181_v2 }
0x305d   :  { %v455_v5 = vadd.f32 %v7809_v12, %v392_v39 }
0x305f   :  { %511 = vst [vmem:[#allocation2 + $0x24] sm:$0x3] %v455_v5  ;;  %v52_v5 = vld [vmem:[%s8848_s0 + $0x2a] sm:$0x3] }
0x3066   :  { %v2330_v6 = vld [vmem:[#allocation2 + $0x24] sm:$0x3] }
0x30c2   :  { %v2333_v40 = vpop.permute.xlu1 %2332 }
0x30c3   :  { %6693 = vmatmul.mubr.msk.f32.vlgmr.msra.gmra.mxu0 %vm556_vm1, %v2333_v40 }
0x30c4   :  { %6707 = vmatpush3.msra.mxu0 %v7764_v50  ;;  %6714 = vmatprep.mubr.msk.f32.mxu0 %vm7358_vm0, %v7357_v0 }
0x30c5   :  { %6708 = vmatprep.subr.mxu0 %v7357_v0 }
0x30c6   :  { %6709 = vmatpush3.msra.mxu0 %v7773_v7 }
0x30c7   :  { %6710 = vmatprep.subr.mxu0 %v7357_v0 }
0x30c8   :  { %6711 = vmatpush3.msra.mxu0 %v7780_v8 }
0x30c9   :  { %6712 = vmatprep.subr.mxu0 %v7357_v0 }
0x30ca   :  { %6713 = vmatpush3.msra.mxu0 %v7787_v51 }
0x30cb   :  { %6728 = vmatprep.subr.mxu0 %v7357_v0 }
0x3183   :  { %v2402_v41 = vpop.f32.mrf.mxu0 }
0x3184   :  { %v2406_v42 = vadd.f32 %v2402_v41, %v2330_v6 }
0x3185   :  { %v6694_v43 = vpop.f32.mrf.mxu0 }
0x3186   :  { %7181 = vtanh.f32 %v2406_v42 }
0x3193   :  { %v7182_v44 = vpop.eup %7181 }
0x3194   :  { %v2408_v45 = vmul.f32 %v7826_v22, %v7182_v44 }
0x3196   :  { %v2409_v46 = vadd.f32 %v7832_v24, %v2408_v45 }
0x3198   :  { %2412 = vrot.lane.b32.xlu1 %v2409_v46, %s7360_s23  ;;  %v2410_v49 = vmul.f32 %v2409_v46, %v2322_v35 }
0x320a   :  { %v2413_v47 = vpop.permute.xlu1 %2412 }
0x320b   :  { %v2415_v48 = vmul.f32 %v2413_v47, %v2409_v46 }
0x320d   :  { %2417 = vrot.lane.b32.xlu0 %v2415_v48, %s7361_s24 }
0x327f   :  { %v2418_v52 = vpop.permute.xlu0 %2417 }
0x3280   :  { %v2420_v53 = vadd.f32 %v2418_v52, %v2410_v49 }
0x3282   :  { %7183 = vtanh.f32 %v2420_v53 }
0x328f   :  { %v7184_v54 = vpop.eup %7183 }
0x3290   :  { %2423 = vrot.lane.b32.xlu1 %v7184_v54, %s7360_s23 }
0x3294   :  { %185 = vperm.xlu1 %7108, %v50_v55  }
0x3302   :  { %v2424_v56 = vpop.permute.xlu1 %2423 }
0x3303   :  { %v2426_v57 = vmul.f32 %v2424_v56, %v2409_v46 }
0x3305   :  { %2430 = vrot.lane.b32.xlu0 %v2426_v57, %s7361_s24 }
0x330f   :  { %v186_v58 = vpop.permute.xlu1 %185 }
0x3310   :  { %v393_v59 = vmul.f32 %v7803_v10, %v186_v58 }
0x3312   :  { %v456_v60 = vadd.f32 %v7809_v12, %v393_v59 }
0x3314   :  { %512 = vst [vmem:[#allocation2 + $0x26] sm:$0x3] %v456_v60  ;;  %v53_v60 = vld [vmem:[%s8848_s0 + $0x2c] sm:$0x3] }
0x331b   :  { %v2428_v62 = vld [vmem:[#allocation2 + $0x26] sm:$0x3] }
0x3377   :  { %v2431_v61 = vpop.permute.xlu0 %2430 }
0x3378   :  { %6704 = vmatmul.mubr.msk.f32.vlgmr.msra.gmra.mxu1 %vm556_vm1, %v2431_v61 }
0x3379   :  { %6718 = vmatpush3.msra.mxu1 %v7764_v50  ;;  %6725 = vmatprep.mubr.msk.f32.mxu1 %vm7358_vm0, %v7357_v0 }
0x337a   :  { %6719 = vmatprep.subr.mxu1 %v7357_v0 }
0x337b   :  { %6720 = vmatpush3.msra.mxu1 %v7773_v7 }
0x337c   :  { %6721 = vmatprep.subr.mxu1 %v7357_v0 }
0x337d   :  { %6722 = vmatpush3.msra.mxu1 %v7780_v8 }
0x337e   :  { %6723 = vmatprep.subr.mxu1 %v7357_v0 }
0x337f   :  { %6724 = vmatpush3.msra.mxu1 %v7787_v51 }
0x3380   :  { %6739 = vmatprep.subr.mxu1 %v7357_v0 }
0x3438   :  { %v2500_v63 = vpop.f32.mrf.mxu1 }
0x3439   :  { %v2504_v3 = vadd.f32 %v2500_v63, %v2428_v62 }
0x343a   :  { %v6705_v4 = vpop.f32.mrf.mxu1 }
0x343b   :  { %7185 = vtanh.f32 %v2504_v3 }
0x3448   :  { %v7186_v16 = vpop.eup %7185 }
0x3449   :  { %v2506_v18 = vmul.f32 %v7826_v22, %v7186_v16 }
0x344b   :  { %v2507_v9 = vadd.f32 %v7832_v24, %v2506_v18 }
0x344d   :  { %2510 = vrot.lane.b32.xlu0 %v2507_v9, %s7360_s23  ;;  %v2508_v14 = vmul.f32 %v2507_v9, %v2420_v53 }
0x34bf   :  { %v2511_v11 = vpop.permute.xlu0 %2510 }
0x34c0   :  { %v2513_v13 = vmul.f32 %v2511_v11, %v2507_v9 }
0x34c2   :  { %2515 = vrot.lane.b32.xlu1 %v2513_v13, %s7361_s24 }
0x3534   :  { %v2516_v15 = vpop.permute.xlu1 %2515 }
0x3535   :  { %v2518_v17 = vadd.f32 %v2516_v15, %v2508_v14 }
0x3537   :  { %7187 = vtanh.f32 %v2518_v17 }
0x3544   :  { %v7188_v19 = vpop.eup %7187 }
0x3545   :  { %2521 = vrot.lane.b32.xlu0 %v7188_v19, %s7360_s23 }
0x3549   :  { %190 = vperm.xlu0 %7107, %v51_v20  }
0x35b7   :  { %v2522_v21 = vpop.permute.xlu0 %2521 }
0x35b8   :  { %v2524_v23 = vmul.f32 %v2522_v21, %v2507_v9 }
0x35ba   :  { %2528 = vrot.lane.b32.xlu1 %v2524_v23, %s7361_s24 }
0x35c4   :  { %v191_v25 = vpop.permute.xlu0 %190 }
0x35c5   :  { %v394_v26 = vmul.f32 %v7803_v10, %v191_v25 }
0x35c7   :  { %v457_v27 = vadd.f32 %v7809_v12, %v394_v26 }
0x35c9   :  { %513 = vst [vmem:[#allocation2 + $0x28] sm:$0x3] %v457_v27  ;;  %v54_v27 = vld [vmem:[%s8848_s0 + $0x2e] sm:$0x3] }
0x35d0   :  { %v2526_v29 = vld [vmem:[#allocation2 + $0x28] sm:$0x3] }
0x362c   :  { %v2529_v28 = vpop.permute.xlu1 %2528 }
0x362d   :  { %6715 = vmatmul.mubr.msk.f32.vlgmr.msra.gmra.mxu0 %vm556_vm1, %v2529_v28 }
0x362e   :  { %6729 = vmatpush3.msra.mxu0 %v7764_v50  ;;  %6736 = vmatprep.mubr.msk.f32.mxu0 %vm7358_vm0, %v7357_v0 }
0x362f   :  { %6730 = vmatprep.subr.mxu0 %v7357_v0 }
0x3630   :  { %6731 = vmatpush3.msra.mxu0 %v7773_v7 }
0x3631   :  { %6732 = vmatprep.subr.mxu0 %v7357_v0 }
0x3632   :  { %6733 = vmatpush3.msra.mxu0 %v7780_v8 }
0x3633   :  { %6734 = vmatprep.subr.mxu0 %v7357_v0 }
0x3634   :  { %6735 = vmatpush3.msra.mxu0 %v7787_v51 }
0x3635   :  { %6750 = vmatprep.subr.mxu0 %v7357_v0 }
0x36ed   :  { %v2598_v30 = vpop.f32.mrf.mxu0 }
0x36ee   :  { %v2602_v31 = vadd.f32 %v2598_v30, %v2526_v29 }
0x36ef   :  { %v6716_v32 = vpop.f32.mrf.mxu0 }
0x36f0   :  { %7189 = vtanh.f32 %v2602_v31 }
0x36fd   :  { %v7190_v33 = vpop.eup %7189 }
0x36fe   :  { %v2604_v34 = vmul.f32 %v7826_v22, %v7190_v33 }
0x3700   :  { %v2605_v35 = vadd.f32 %v7832_v24, %v2604_v34 }
0x3702   :  { %2608 = vrot.lane.b32.xlu1 %v2605_v35, %s7360_s23  ;;  %v2606_v37 = vmul.f32 %v2605_v35, %v2518_v17 }
0x3774   :  { %v2609_v1 = vpop.permute.xlu1 %2608 }
0x3775   :  { %v2611_v36 = vmul.f32 %v2609_v1, %v2605_v35 }
0x3777   :  { %2613 = vrot.lane.b32.xlu0 %v2611_v36, %s7361_s24 }
0x37e9   :  { %v2614_v38 = vpop.permute.xlu0 %2613 }
0x37ea   :  { %v2616_v2 = vadd.f32 %v2614_v38, %v2606_v37 }
0x37ec   :  { %7191 = vtanh.f32 %v2616_v2 }
0x37f9   :  { %v7192_v39 = vpop.eup %7191 }
0x37fa   :  { %2619 = vrot.lane.b32.xlu1 %v7192_v39, %s7360_s23 }
0x37fe   :  { %195 = vperm.xlu1 %7108, %v52_v5  }
0x386c   :  { %v2620_v40 = vpop.permute.xlu1 %2619 }
0x386d   :  { %v2622_v6 = vmul.f32 %v2620_v40, %v2605_v35 }
0x386f   :  { %2626 = vrot.lane.b32.xlu0 %v2622_v6, %s7361_s24 }
0x3879   :  { %v196_v41 = vpop.permute.xlu1 %195 }
0x387a   :  { %v395_v42 = vmul.f32 %v7803_v10, %v196_v41 }
0x387c   :  { %v458_v43 = vadd.f32 %v7809_v12, %v395_v42 }
0x387e   :  { %514 = vst [vmem:[#allocation2 + $0x2a] sm:$0x3] %v458_v43  ;;  %v55_v43 = vld [vmem:[%s8848_s0 + $0x30] sm:$0x3] }
0x3885   :  { %v2624_v45 = vld [vmem:[#allocation2 + $0x2a] sm:$0x3] }
0x38e1   :  { %v2627_v44 = vpop.permute.xlu0 %2626 }
0x38e2   :  { %6726 = vmatmul.mubr.msk.f32.vlgmr.msra.gmra.mxu1 %vm556_vm1, %v2627_v44 }
0x38e3   :  { %6740 = vmatpush3.msra.mxu1 %v7764_v50  ;;  %6747 = vmatprep.mubr.msk.f32.mxu1 %vm7358_vm0, %v7357_v0 }
0x38e4   :  { %6741 = vmatprep.subr.mxu1 %v7357_v0 }
0x38e5   :  { %6742 = vmatpush3.msra.mxu1 %v7773_v7 }
0x38e6   :  { %6743 = vmatprep.subr.mxu1 %v7357_v0 }
0x38e7   :  { %6744 = vmatpush3.msra.mxu1 %v7780_v8 }
0x38e8   :  { %6745 = vmatprep.subr.mxu1 %v7357_v0 }
0x38e9   :  { %6746 = vmatpush3.msra.mxu1 %v7787_v51 }
0x38ea   :  { %6761 = vmatprep.subr.mxu1 %v7357_v0 }
0x39a2   :  { %v2696_v46 = vpop.f32.mrf.mxu1 }
0x39a3   :  { %v2700_v47 = vadd.f32 %v2696_v46, %v2624_v45 }
0x39a4   :  { %v6727_v48 = vpop.f32.mrf.mxu1 }
0x39a5   :  { %7193 = vtanh.f32 %v2700_v47 }
0x39b2   :  { %v7194_v49 = vpop.eup %7193 }
0x39b3   :  { %v2702_v52 = vmul.f32 %v7826_v22, %v7194_v49 }
0x39b5   :  { %v2703_v53 = vadd.f32 %v7832_v24, %v2702_v52 }
0x39b7   :  { %2706 = vrot.lane.b32.xlu0 %v2703_v53, %s7360_s23  ;;  %v2704_v56 = vmul.f32 %v2703_v53, %v2616_v2 }
0x3a29   :  { %v2707_v54 = vpop.permute.xlu0 %2706 }
0x3a2a   :  { %v2709_v55 = vmul.f32 %v2707_v54, %v2703_v53 }
0x3a2c   :  { %2711 = vrot.lane.b32.xlu1 %v2709_v55, %s7361_s24 }
0x3a9e   :  { %v2712_v57 = vpop.permute.xlu1 %2711 }
0x3a9f   :  { %v2714_v58 = vadd.f32 %v2712_v57, %v2704_v56 }
0x3aa1   :  { %7195 = vtanh.f32 %v2714_v58 }
0x3aae   :  { %v7196_v59 = vpop.eup %7195 }
0x3aaf   :  { %2717 = vrot.lane.b32.xlu0 %v7196_v59, %s7360_s23 }
0x3ab3   :  { %200 = vperm.xlu0 %7107, %v53_v60  }
0x3b21   :  { %v2718_v61 = vpop.permute.xlu0 %2717 }
0x3b22   :  { %v2720_v62 = vmul.f32 %v2718_v61, %v2703_v53 }
0x3b24   :  { %2724 = vrot.lane.b32.xlu1 %v2720_v62, %s7361_s24 }
0x3b2e   :  { %v201_v63 = vpop.permute.xlu0 %200 }
0x3b2f   :  { %v396_v3 = vmul.f32 %v7803_v10, %v201_v63 }
0x3b31   :  { %v459_v4 = vadd.f32 %v7809_v12, %v396_v3 }
0x3b33   :  { %515 = vst [vmem:[#allocation2 + $0x2c] sm:$0x3] %v459_v4  ;;  %v56_v4 = vld [vmem:[%s8848_s0 + $0x32] sm:$0x3] }
0x3b3a   :  { %v2722_v18 = vld [vmem:[#allocation2 + $0x2c] sm:$0x3] }
0x3b96   :  { %v2725_v16 = vpop.permute.xlu1 %2724 }
0x3b97   :  { %6737 = vmatmul.mubr.msk.f32.vlgmr.msra.gmra.mxu0 %vm556_vm1, %v2725_v16 }
0x3b98   :  { %6751 = vmatpush3.msra.mxu0 %v7764_v50  ;;  %6758 = vmatprep.mubr.msk.f32.mxu0 %vm7358_vm0, %v7357_v0 }
0x3b99   :  { %6752 = vmatprep.subr.mxu0 %v7357_v0 }
0x3b9a   :  { %6753 = vmatpush3.msra.mxu0 %v7773_v7 }
0x3b9b   :  { %6754 = vmatprep.subr.mxu0 %v7357_v0 }
0x3b9c   :  { %6755 = vmatpush3.msra.mxu0 %v7780_v8 }
0x3b9d   :  { %6756 = vmatprep.subr.mxu0 %v7357_v0 }
0x3b9e   :  { %6757 = vmatpush3.msra.mxu0 %v7787_v51 }
0x3b9f   :  { %6772 = vmatprep.subr.mxu0 %v7357_v0 }
0x3c57   :  { %v2794_v9 = vpop.f32.mrf.mxu0 }
0x3c58   :  { %v2798_v11 = vadd.f32 %v2794_v9, %v2722_v18 }
0x3c59   :  { %v6738_v13 = vpop.f32.mrf.mxu0 }
0x3c5a   :  { %7197 = vtanh.f32 %v2798_v11 }
0x3c67   :  { %v7198_v14 = vpop.eup %7197 }
0x3c68   :  { %v2800_v15 = vmul.f32 %v7826_v22, %v7198_v14 }
0x3c6a   :  { %v2801_v17 = vadd.f32 %v7832_v24, %v2800_v15 }
0x3c6c   :  { %2804 = vrot.lane.b32.xlu1 %v2801_v17, %s7360_s23  ;;  %v2802_v21 = vmul.f32 %v2801_v17, %v2714_v58 }
0x3cde   :  { %v2805_v19 = vpop.permute.xlu1 %2804 }
0x3cdf   :  { %v2807_v20 = vmul.f32 %v2805_v19, %v2801_v17 }
0x3ce1   :  { %2809 = vrot.lane.b32.xlu0 %v2807_v20, %s7361_s24 }
0x3d53   :  { %v2810_v23 = vpop.permute.xlu0 %2809 }
0x3d54   :  { %v2812_v25 = vadd.f32 %v2810_v23, %v2802_v21 }
0x3d56   :  { %7199 = vtanh.f32 %v2812_v25 }
0x3d63   :  { %v7200_v26 = vpop.eup %7199 }
0x3d64   :  { %2815 = vrot.lane.b32.xlu1 %v7200_v26, %s7360_s23 }
0x3d68   :  { %205 = vperm.xlu1 %7108, %v54_v27  }
0x3dd6   :  { %v2816_v28 = vpop.permute.xlu1 %2815 }
0x3dd7   :  { %v2818_v29 = vmul.f32 %v2816_v28, %v2801_v17 }
0x3dd9   :  { %2822 = vrot.lane.b32.xlu0 %v2818_v29, %s7361_s24 }
0x3de3   :  { %v206_v30 = vpop.permute.xlu1 %205 }
0x3de4   :  { %v397_v31 = vmul.f32 %v7803_v10, %v206_v30 }
0x3de6   :  { %v460_v32 = vadd.f32 %v7809_v12, %v397_v31 }
0x3de8   :  { %516 = vst [vmem:[#allocation2 + $0x2e] sm:$0x3] %v460_v32  ;;  %v57_v32 = vld [vmem:[%s8848_s0 + $0x34] sm:$0x3] }
0x3def   :  { %v2820_v34 = vld [vmem:[#allocation2 + $0x2e] sm:$0x3] }
0x3e4b   :  { %v2823_v33 = vpop.permute.xlu0 %2822 }
0x3e4c   :  { %6748 = vmatmul.mubr.msk.f32.vlgmr.msra.gmra.mxu1 %vm556_vm1, %v2823_v33 }
0x3e4d   :  { %6762 = vmatpush3.msra.mxu1 %v7764_v50  ;;  %6769 = vmatprep.mubr.msk.f32.mxu1 %vm7358_vm0, %v7357_v0 }
0x3e4e   :  { %6763 = vmatprep.subr.mxu1 %v7357_v0 }
0x3e4f   :  { %6764 = vmatpush3.msra.mxu1 %v7773_v7 }
0x3e50   :  { %6765 = vmatprep.subr.mxu1 %v7357_v0 }
0x3e51   :  { %6766 = vmatpush3.msra.mxu1 %v7780_v8 }
0x3e52   :  { %6767 = vmatprep.subr.mxu1 %v7357_v0 }
0x3e53   :  { %6768 = vmatpush3.msra.mxu1 %v7787_v51 }
0x3e54   :  { %6783 = vmatprep.subr.mxu1 %v7357_v0 }
0x3f0c   :  { %v2892_v35 = vpop.f32.mrf.mxu1 }
0x3f0d   :  { %v2896_v1 = vadd.f32 %v2892_v35, %v2820_v34 }
0x3f0e   :  { %v6749_v36 = vpop.f32.mrf.mxu1 }
0x3f0f   :  { %7201 = vtanh.f32 %v2896_v1 }
0x3f1c   :  { %v7202_v37 = vpop.eup %7201 }
0x3f1d   :  { %v2898_v38 = vmul.f32 %v7826_v22, %v7202_v37 }
0x3f1f   :  { %v2899_v2 = vadd.f32 %v7832_v24, %v2898_v38 }
0x3f21   :  { %2902 = vrot.lane.b32.xlu0 %v2899_v2, %s7360_s23  ;;  %v2900_v40 = vmul.f32 %v2899_v2, %v2812_v25 }
0x3f93   :  { %v2903_v39 = vpop.permute.xlu0 %2902 }
0x3f94   :  { %v2905_v5 = vmul.f32 %v2903_v39, %v2899_v2 }
0x3f96   :  { %2907 = vrot.lane.b32.xlu1 %v2905_v5, %s7361_s24 }
0x4008   :  { %v2908_v6 = vpop.permute.xlu1 %2907 }
0x4009   :  { %v2910_v41 = vadd.f32 %v2908_v6, %v2900_v40 }
0x400b   :  { %7203 = vtanh.f32 %v2910_v41 }
0x4018   :  { %v7204_v42 = vpop.eup %7203 }
0x4019   :  { %2913 = vrot.lane.b32.xlu0 %v7204_v42, %s7360_s23 }
0x401d   :  { %210 = vperm.xlu0 %7107, %v55_v43  }
0x408b   :  { %v2914_v44 = vpop.permute.xlu0 %2913 }
0x408c   :  { %v2916_v45 = vmul.f32 %v2914_v44, %v2899_v2  ;;  %v58_v44 = vld [vmem:[%s8848_s0 + $0x36] sm:$0x3] }
0x408e   :  { %2920 = vrot.lane.b32.xlu1 %v2916_v45, %s7361_s24 }
0x4098   :  { %v211_v46 = vpop.permute.xlu0 %210 }
0x4099   :  { %v398_v47 = vmul.f32 %v7803_v10, %v211_v46 }
0x409b   :  { %v461_v48 = vadd.f32 %v7809_v12, %v398_v47 }
0x409d   :  { %517 = vst [vmem:[#allocation2 + $0x30] sm:$0x3] %v461_v48 }
0x40a4   :  { %v2918_v52 = vld [vmem:[#allocation2 + $0x30] sm:$0x3] }
0x4100   :  { %v2921_v49 = vpop.permute.xlu1 %2920 }
0x4101   :  { %6759 = vmatmul.mubr.msk.f32.vlgmr.msra.gmra.mxu0 %vm556_vm1, %v2921_v49 }
0x4102   :  { %6773 = vmatpush3.msra.mxu0 %v7764_v50  ;;  %6780 = vmatprep.mubr.msk.f32.mxu0 %vm7358_vm0, %v7357_v0 }
0x4103   :  { %6774 = vmatprep.subr.mxu0 %v7357_v0 }
0x4104   :  { %6775 = vmatpush3.msra.mxu0 %v7773_v7 }
0x4105   :  { %6776 = vmatprep.subr.mxu0 %v7357_v0 }
0x4106   :  { %6777 = vmatpush3.msra.mxu0 %v7780_v8 }
0x4107   :  { %6778 = vmatprep.subr.mxu0 %v7357_v0 }
0x4108   :  { %6779 = vmatpush3.msra.mxu0 %v7787_v51 }
0x4109   :  { %6794 = vmatprep.subr.mxu0 %v7357_v0 }
0x41c1   :  { %v2990_v53 = vpop.f32.mrf.mxu0 }
0x41c2   :  { %v2994_v54 = vadd.f32 %v2990_v53, %v2918_v52  ;;  %v8112_v53 = vld [vmem:[%s8847_s5 + $0x18] sm:$0xff] }
0x41c3   :  { %v6760_v55 = vpop.f32.mrf.mxu0 }
0x41c4   :  { %7205 = vtanh.f32 %v2994_v54  ;;  %v8135_v54 = vld [vmem:[%s8847_s5] sm:$0xff] }
0x41d1   :  { %v7206_v56 = vpop.eup %7205 }
0x41d2   :  { %v2996_v57 = vmul.f32 %v7826_v22, %v7206_v56 }
0x41d4   :  { %v2997_v58 = vadd.f32 %v7832_v24, %v2996_v57 }
0x41d6   :  { %3000 = vrot.lane.b32.xlu1 %v2997_v58, %s7360_s23  ;;  %v2998_v61 = vmul.f32 %v2997_v58, %v2910_v41 }
0x4248   :  { %v3001_v59 = vpop.permute.xlu1 %3000 }
0x4249   :  { %v3003_v60 = vmul.f32 %v3001_v59, %v2997_v58 }
0x424b   :  { %3005 = vrot.lane.b32.xlu0 %v3003_v60, %s7361_s24 }
0x42bd   :  { %v3006_v62 = vpop.permute.xlu0 %3005 }
0x42be   :  { %v3008_v63 = vadd.f32 %v3006_v62, %v2998_v61 }
0x42c0   :  { %7207 = vtanh.f32 %v3008_v63 }
0x42cd   :  { %v7208_v3 = vpop.eup %7207 }
0x42ce   :  { %3011 = vrot.lane.b32.xlu1 %v7208_v3, %s7360_s23 }
0x42d2   :  { %215 = vperm.xlu1 %7108, %v56_v4  }
0x4340   :  { %v3012_v16 = vpop.permute.xlu1 %3011 }
0x4341   :  { %v3014_v18 = vmul.f32 %v3012_v16, %v2997_v58 }
0x4343   :  { %3018 = vrot.lane.b32.xlu0 %v3014_v18, %s7361_s24 }
0x434d   :  { %v216_v9 = vpop.permute.xlu1 %215 }
0x434e   :  { %v399_v11 = vmul.f32 %v7803_v10, %v216_v9  ;;  %v59_v9 = vld [vmem:[%s8848_s0 + $0x38] sm:$0x3] }
0x4350   :  { %v462_v13 = vadd.f32 %v7809_v12, %v399_v11 }
0x4352   :  { %518 = vst [vmem:[#allocation2 + $0x32] sm:$0x3] %v462_v13  ;;  %v8151_v13 = vld [vmem:[%s8849_s1] ss:$0 sm:$0xff] }
0x4359   :  { %v3016_v15 = vld [vmem:[#allocation2 + $0x32] sm:$0x3] }
0x43b5   :  { %v3019_v14 = vpop.permute.xlu0 %3018 }
0x43b6   :  { %6770 = vmatmul.mubr.msk.f32.vlgmr.msra.gmra.mxu1 %vm556_vm1, %v3019_v14 }
0x43b7   :  { %6784 = vmatpush3.msra.mxu1 %v7764_v50  ;;  %6791 = vmatprep.mubr.msk.f32.mxu1 %vm7358_vm0, %v7357_v0 }
0x43b8   :  { %6785 = vmatprep.subr.mxu1 %v7357_v0 }
0x43b9   :  { %6786 = vmatpush3.msra.mxu1 %v7773_v7 }
0x43ba   :  { %6787 = vmatprep.subr.mxu1 %v7357_v0 }
0x43bb   :  { %6788 = vmatpush3.msra.mxu1 %v7780_v8 }
0x43bc   :  { %6789 = vmatprep.subr.mxu1 %v7357_v0 }
0x43bd   :  { %6790 = vmatpush3.msra.mxu1 %v7787_v51 }
0x43be   :  { %6805 = vmatprep.subr.mxu1 %v7357_v0 }
0x4476   :  { %v3088_v17 = vpop.f32.mrf.mxu1 }
0x4477   :  { %v3092_v19 = vadd.f32 %v3088_v17, %v3016_v15  ;;  %v8157_v15 = vld [vmem:[%s8850_s2] ss:$0 sm:$0xff] }
0x4478   :  { %v6771_v20 = vpop.f32.mrf.mxu1 }
0x4479   :  { %7209 = vtanh.f32 %v3092_v19 }
0x4486   :  { %v7210_v21 = vpop.eup %7209 }
0x4487   :  { %v3094_v23 = vmul.f32 %v7826_v22, %v7210_v21 }
0x4489   :  { %v3095_v25 = vadd.f32 %v7832_v24, %v3094_v23 }
0x448b   :  { %3098 = vrot.lane.b32.xlu0 %v3095_v25, %s7360_s23  ;;  %v3096_v28 = vmul.f32 %v3095_v25, %v3008_v63 }
0x44fd   :  { %v3099_v26 = vpop.permute.xlu0 %3098 }
0x44fe   :  { %v3101_v27 = vmul.f32 %v3099_v26, %v3095_v25 }
0x4500   :  { %3103 = vrot.lane.b32.xlu1 %v3101_v27, %s7361_s24  ;;  %v8174_v27 = vld [vmem:[%s8851_s3] ss:$0 sm:$0xff] }
0x4572   :  { %v3104_v29 = vpop.permute.xlu1 %3103 }
0x4573   :  { %v3106_v30 = vadd.f32 %v3104_v29, %v3096_v28  ;;  %v8180_v29 = vld [vmem:[%s8852_s4] ss:$0 sm:$0xff] }
0x4575   :  { %7211 = vtanh.f32 %v3106_v30 }
0x4582   :  { %v7212_v31 = vpop.eup %7211 }
0x4583   :  { %3109 = vrot.lane.b32.xlu0 %v7212_v31, %s7360_s23 }
0x4587   :  { %220 = vperm.xlu0 %7107, %v57_v32  }
0x45f5   :  { %v3110_v33 = vpop.permute.xlu0 %3109 }
0x45f6   :  { %v3112_v34 = vmul.f32 %v3110_v33, %v3095_v25 }
0x45f8   :  { %3116 = vrot.lane.b32.xlu1 %v3112_v34, %s7361_s24 }
0x4602   :  { %v221_v35 = vpop.permute.xlu0 %220 }
0x4603   :  { %v400_v1 = vmul.f32 %v7803_v10, %v221_v35 }
0x4605   :  { %v463_v36 = vadd.f32 %v7809_v12, %v400_v1 }
0x4607   :  { %519 = vst [vmem:[#allocation2 + $0x34] sm:$0x3] %v463_v36  ;;  %v60_v36 = vld [vmem:[%s8848_s0 + $0x3a] sm:$0x3] }
0x460e   :  { %v3114_v38 = vld [vmem:[#allocation2 + $0x34] sm:$0x3] }
0x466a   :  { %v3117_v37 = vpop.permute.xlu1 %3116 }
0x466b   :  { %6781 = vmatmul.mubr.msk.f32.vlgmr.msra.gmra.mxu0 %vm556_vm1, %v3117_v37 }
0x466c   :  { %6795 = vmatpush3.msra.mxu0 %v7764_v50  ;;  %6802 = vmatprep.mubr.msk.f32.mxu0 %vm7358_vm0, %v7357_v0 }
0x466d   :  { %6796 = vmatprep.subr.mxu0 %v7357_v0 }
0x466e   :  { %6797 = vmatpush3.msra.mxu0 %v7773_v7 }
0x466f   :  { %6798 = vmatprep.subr.mxu0 %v7357_v0 }
0x4670   :  { %6799 = vmatpush3.msra.mxu0 %v7780_v8 }
0x4671   :  { %6800 = vmatprep.subr.mxu0 %v7357_v0 }
0x4672   :  { %6801 = vmatpush3.msra.mxu0 %v7787_v51 }
0x4673   :  { %6816 = vmatprep.subr.mxu0 %v7357_v0 }
0x472b   :  { %v3186_v2 = vpop.f32.mrf.mxu0 }
0x472c   :  { %v3190_v50 = vadd.f32 %v3186_v2, %v3114_v38 }
0x472d   :  { %v6782_v39 = vpop.f32.mrf.mxu0 }
0x472e   :  { %7213 = vtanh.f32 %v3190_v50 }
0x473b   :  { %v7214_v5 = vpop.eup %7213 }
0x473c   :  { %v3192_v40 = vmul.f32 %v7826_v22, %v7214_v5 }
0x473e   :  { %v3193_v7 = vadd.f32 %v7832_v24, %v3192_v40 }
0x4740   :  { %3196 = vrot.lane.b32.xlu1 %v3193_v7, %s7360_s23  ;;  %v3194_v41 = vmul.f32 %v3193_v7, %v3106_v30 }
0x47b2   :  { %v3197_v6 = vpop.permute.xlu1 %3196 }
0x47b3   :  { %v3199_v8 = vmul.f32 %v3197_v6, %v3193_v7 }
0x47b5   :  { %3201 = vrot.lane.b32.xlu0 %v3199_v8, %s7361_s24 }
0x4827   :  { %v3202_v51 = vpop.permute.xlu0 %3201 }
0x4828   :  { %v3204_v42 = vadd.f32 %v3202_v51, %v3194_v41 }
0x482a   :  { %7215 = vtanh.f32 %v3204_v42 }
0x4837   :  { %v7216_v43 = vpop.eup %7215 }
0x4838   :  { %3207 = vrot.lane.b32.xlu1 %v7216_v43, %s7360_s23 }
0x483c   :  { %225 = vperm.xlu1 %7108, %v58_v44  }
0x48aa   :  { %v3208_v45 = vpop.permute.xlu1 %3207 }
0x48ab   :  { %v3210_v46 = vmul.f32 %v3208_v45, %v3193_v7 }
0x48ad   :  { %3214 = vrot.lane.b32.xlu0 %v3210_v46, %s7361_s24 }
0x48b7   :  { %v226_v47 = vpop.permute.xlu1 %225 }
0x48b8   :  { %v401_v48 = vmul.f32 %v7803_v10, %v226_v47  ;;  %v8121_v10 = vld [vmem:[%s8847_s5 + $0x10] sm:$0xff] }
0x48ba   :  { %v464_v49 = vadd.f32 %v7809_v12, %v401_v48  ;;  %v8128_v12 = vld [vmem:[%s8847_s5 + $0x8] sm:$0xff] }
0x48bc   :  { %520 = vst [vmem:[#allocation2 + $0x36] sm:$0x3] %v464_v49  ;;  %v61_v49 = vld [vmem:[%s8848_s0 + $0x3c] sm:$0x3] }
0x48c3   :  { %v3212_v55 = vld [vmem:[#allocation2 + $0x36] sm:$0x3] }
0x491f   :  { %v3215_v52 = vpop.permute.xlu0 %3214 }
0x4920   :  { %6792 = vmatmul.mubr.msk.f32.vlgmr.msra.gmra.mxu1 %vm556_vm1, %v3215_v52 }
0x4921   :  { %6806 = vmatpush3.msra.mxu1 %v8112_v53  ;;  %6813 = vmatprep.mubr.msk.f32.mxu1 %vm7358_vm0, %v7357_v0 }
0x4922   :  { %6807 = vmatprep.subr.mxu1 %v7357_v0 }
0x4923   :  { %6808 = vmatpush3.msra.mxu1 %v8121_v10 }
0x4924   :  { %6809 = vmatprep.subr.mxu1 %v7357_v0 }
0x4925   :  { %6810 = vmatpush3.msra.mxu1 %v8128_v12 }
0x4926   :  { %6811 = vmatprep.subr.mxu1 %v7357_v0 }
0x4927   :  { %6812 = vmatpush3.msra.mxu1 %v8135_v54 }
0x4928   :  { %6827 = vmatprep.subr.mxu1 %v7357_v0 }
0x49e0   :  { %v3284_v56 = vpop.f32.mrf.mxu1 }
0x49e1   :  { %v3288_v57 = vadd.f32 %v3284_v56, %v3212_v55 }
0x49e2   :  { %v6793_v58 = vpop.f32.mrf.mxu1 }
0x49e3   :  { %7217 = vtanh.f32 %v3288_v57 }
0x49f0   :  { %v7218_v59 = vpop.eup %7217 }
0x49f1   :  { %v3290_v60 = vmul.f32 %v7826_v22, %v7218_v59 }
0x49f3   :  { %v3291_v61 = vadd.f32 %v7832_v24, %v3290_v60 }
0x49f5   :  { %3294 = vrot.lane.b32.xlu0 %v3291_v61, %s7360_s23  ;;  %v3292_v3 = vmul.f32 %v3291_v61, %v3204_v42 }
0x4a67   :  { %v3295_v62 = vpop.permute.xlu0 %3294 }
0x4a68   :  { %v3297_v63 = vmul.f32 %v3295_v62, %v3291_v61 }
0x4a6a   :  { %3299 = vrot.lane.b32.xlu1 %v3297_v63, %s7361_s24 }
0x4adc   :  { %v3300_v4 = vpop.permute.xlu1 %3299 }
0x4add   :  { %v3302_v16 = vadd.f32 %v3300_v4, %v3292_v3 }
0x4adf   :  { %7219 = vtanh.f32 %v3302_v16 }
0x4aec   :  { %v7220_v18 = vpop.eup %7219 }
0x4aed   :  { %3305 = vrot.lane.b32.xlu0 %v7220_v18, %s7360_s23 }
0x4af1   :  { %230 = vperm.xlu0 %7107, %v59_v9  }
0x4b5f   :  { %v3306_v22 = vpop.permute.xlu0 %3305 }
0x4b60   :  { %v3308_v24 = vmul.f32 %v3306_v22, %v3291_v61 }
0x4b62   :  { %3312 = vrot.lane.b32.xlu1 %v3308_v24, %s7361_s24 }
0x4b6c   :  { %v231_v11 = vpop.permute.xlu0 %230 }
0x4b6d   :  { %v402_v14 = vmul.f32 %v8151_v13, %v231_v11 }
0x4b6f   :  { %v465_v17 = vadd.f32 %v8157_v15, %v402_v14 }
0x4b71   :  { %521 = vst [vmem:[#allocation2 + $0x38] sm:$0x3] %v465_v17  ;;  %v62_v17 = vld [vmem:[%s8848_s0 + $0x3e] sm:$0x3] }
0x4b78   :  { %v3310_v20 = vld [vmem:[#allocation2 + $0x38] sm:$0x3] }
0x4bd4   :  { %v3313_v19 = vpop.permute.xlu1 %3312 }
0x4bd5   :  { %6803 = vmatmul.mubr.msk.f32.vlgmr.msra.gmra.mxu0 %vm556_vm1, %v3313_v19 }
0x4bd6   :  { %6817 = vmatpush3.msra.mxu0 %v8112_v53  ;;  %6824 = vmatprep.mubr.msk.f32.mxu0 %vm7358_vm0, %v7357_v0 }
0x4bd7   :  { %6818 = vmatprep.subr.mxu0 %v7357_v0 }
0x4bd8   :  { %6819 = vmatpush3.msra.mxu0 %v8121_v10 }
0x4bd9   :  { %6820 = vmatprep.subr.mxu0 %v7357_v0 }
0x4bda   :  { %6821 = vmatpush3.msra.mxu0 %v8128_v12 }
0x4bdb   :  { %6822 = vmatprep.subr.mxu0 %v7357_v0 }
0x4bdc   :  { %6823 = vmatpush3.msra.mxu0 %v8135_v54 }
0x4bdd   :  { %6838 = vmatprep.subr.mxu0 %v7357_v0 }
0x4c95   :  { %v3382_v21 = vpop.f32.mrf.mxu0 }
0x4c96   :  { %v3386_v23 = vadd.f32 %v3382_v21, %v3310_v20 }
0x4c97   :  { %v6804_v25 = vpop.f32.mrf.mxu0 }
0x4c98   :  { %7221 = vtanh.f32 %v3386_v23 }
0x4ca5   :  { %v7222_v26 = vpop.eup %7221 }
0x4ca6   :  { %v3388_v28 = vmul.f32 %v8174_v27, %v7222_v26 }
0x4ca8   :  { %v3389_v30 = vadd.f32 %v8180_v29, %v3388_v28 }
0x4caa   :  { %3392 = vrot.lane.b32.xlu1 %v3389_v30, %s7360_s23  ;;  %v3390_v33 = vmul.f32 %v3389_v30, %v3302_v16 }
0x4d1c   :  { %v3393_v31 = vpop.permute.xlu1 %3392 }
0x4d1d   :  { %v3395_v32 = vmul.f32 %v3393_v31, %v3389_v30 }
0x4d1f   :  { %3397 = vrot.lane.b32.xlu0 %v3395_v32, %s7361_s24 }
0x4d91   :  { %v3398_v34 = vpop.permute.xlu0 %3397 }
0x4d92   :  { %v3400_v35 = vadd.f32 %v3398_v34, %v3390_v33 }
0x4d94   :  { %7223 = vtanh.f32 %v3400_v35 }
0x4da1   :  { %v7224_v1 = vpop.eup %7223 }
0x4da2   :  { %3403 = vrot.lane.b32.xlu1 %v7224_v1, %s7360_s23 }
0x4da6   :  { %235 = vperm.xlu1 %7108, %v60_v36  }
0x4e14   :  { %v3404_v37 = vpop.permute.xlu1 %3403 }
0x4e15   :  { %v3406_v38 = vmul.f32 %v3404_v37, %v3389_v30 }
0x4e17   :  { %3410 = vrot.lane.b32.xlu0 %v3406_v38, %s7361_s24 }
0x4e21   :  { %v236_v2 = vpop.permute.xlu1 %235 }
0x4e22   :  { %v403_v50 = vmul.f32 %v8151_v13, %v236_v2 }
0x4e24   :  { %v466_v39 = vadd.f32 %v8157_v15, %v403_v50 }
0x4e26   :  { %522 = vst [vmem:[#allocation2 + $0x3a] sm:$0x3] %v466_v39  ;;  %v63_v39 = vld [vmem:[%s8848_s0 + $0x40] sm:$0x3] }
0x4e2d   :  { %v3408_v40 = vld [vmem:[#allocation2 + $0x3a] sm:$0x3] }
0x4e89   :  { %v3411_v5 = vpop.permute.xlu0 %3410 }
0x4e8a   :  { %6814 = vmatmul.mubr.msk.f32.vlgmr.msra.gmra.mxu1 %vm556_vm1, %v3411_v5 }
0x4e8b   :  { %6828 = vmatpush3.msra.mxu1 %v8112_v53  ;;  %6835 = vmatprep.mubr.msk.f32.mxu1 %vm7358_vm0, %v7357_v0 }
0x4e8c   :  { %6829 = vmatprep.subr.mxu1 %v7357_v0 }
0x4e8d   :  { %6830 = vmatpush3.msra.mxu1 %v8121_v10 }
0x4e8e   :  { %6831 = vmatprep.subr.mxu1 %v7357_v0 }
0x4e8f   :  { %6832 = vmatpush3.msra.mxu1 %v8128_v12 }
0x4e90   :  { %6833 = vmatprep.subr.mxu1 %v7357_v0 }
0x4e91   :  { %6834 = vmatpush3.msra.mxu1 %v8135_v54 }
0x4e92   :  { %6849 = vmatprep.subr.mxu1 %v7357_v0 }
0x4f4a   :  { %v3480_v7 = vpop.f32.mrf.mxu1 }
0x4f4b   :  { %v3484_v6 = vadd.f32 %v3480_v7, %v3408_v40 }
0x4f4c   :  { %v6815_v8 = vpop.f32.mrf.mxu1 }
0x4f4d   :  { %7225 = vtanh.f32 %v3484_v6 }
0x4f5a   :  { %v7226_v41 = vpop.eup %7225 }
0x4f5b   :  { %v3486_v51 = vmul.f32 %v8174_v27, %v7226_v41 }
0x4f5d   :  { %v3487_v42 = vadd.f32 %v8180_v29, %v3486_v51 }
0x4f5f   :  { %3490 = vrot.lane.b32.xlu0 %v3487_v42, %s7360_s23  ;;  %v3488_v45 = vmul.f32 %v3487_v42, %v3400_v35 }
0x4fd1   :  { %v3491_v43 = vpop.permute.xlu0 %3490 }
0x4fd2   :  { %v3493_v44 = vmul.f32 %v3491_v43, %v3487_v42 }
0x4fd4   :  { %3495 = vrot.lane.b32.xlu1 %v3493_v44, %s7361_s24 }
0x5046   :  { %v3496_v46 = vpop.permute.xlu1 %3495 }
0x5047   :  { %v3498_v47 = vadd.f32 %v3496_v46, %v3488_v45 }
0x5049   :  { %7227 = vtanh.f32 %v3498_v47 }
0x5056   :  { %v7228_v48 = vpop.eup %7227 }
0x5057   :  { %3501 = vrot.lane.b32.xlu0 %v7228_v48, %s7360_s23 }
0x505b   :  { %240 = vperm.xlu0 %7107, %v61_v49  }
0x50c9   :  { %v3502_v52 = vpop.permute.xlu0 %3501 }
0x50ca   :  { %v3504_v55 = vmul.f32 %v3502_v52, %v3487_v42 }
0x50cc   :  { %3508 = vrot.lane.b32.xlu1 %v3504_v55, %s7361_s24 }
0x50d6   :  { %v241_v56 = vpop.permute.xlu0 %240 }
0x50d7   :  { %v404_v57 = vmul.f32 %v8151_v13, %v241_v56 }
0x50d9   :  { %v467_v58 = vadd.f32 %v8157_v15, %v404_v57 }
0x50db   :  { %523 = vst [vmem:[#allocation2 + $0x3c] sm:$0x3] %v467_v58  ;;  %v64_v58 = vld [vmem:[%s8848_s0 + $0x42] sm:$0x3] }
0x50e2   :  { %v3506_v60 = vld [vmem:[#allocation2 + $0x3c] sm:$0x3] }
0x513e   :  { %v3509_v59 = vpop.permute.xlu1 %3508 }
0x513f   :  { %6825 = vmatmul.mubr.msk.f32.vlgmr.msra.gmra.mxu0 %vm556_vm1, %v3509_v59 }
0x5140   :  { %6839 = vmatpush3.msra.mxu0 %v8112_v53  ;;  %6846 = vmatprep.mubr.msk.f32.mxu0 %vm7358_vm0, %v7357_v0 }
0x5141   :  { %6840 = vmatprep.subr.mxu0 %v7357_v0 }
0x5142   :  { %6841 = vmatpush3.msra.mxu0 %v8121_v10 }
0x5143   :  { %6842 = vmatprep.subr.mxu0 %v7357_v0 }
0x5144   :  { %6843 = vmatpush3.msra.mxu0 %v8128_v12 }
0x5145   :  { %6844 = vmatprep.subr.mxu0 %v7357_v0 }
0x5146   :  { %6845 = vmatpush3.msra.mxu0 %v8135_v54 }
0x5147   :  { %6860 = vmatprep.subr.mxu0 %v7357_v0 }
0x51ff   :  { %v3578_v61 = vpop.f32.mrf.mxu0 }
0x5200   :  { %v3582_v62 = vadd.f32 %v3578_v61, %v3506_v60 }
0x5201   :  { %v6826_v63 = vpop.f32.mrf.mxu0 }
0x5202   :  { %7229 = vtanh.f32 %v3582_v62 }
0x520f   :  { %v7230_v3 = vpop.eup %7229 }
0x5210   :  { %v3584_v4 = vmul.f32 %v8174_v27, %v7230_v3 }
0x5212   :  { %v3585_v16 = vadd.f32 %v8180_v29, %v3584_v4 }
0x5214   :  { %3588 = vrot.lane.b32.xlu1 %v3585_v16, %s7360_s23  ;;  %v3586_v22 = vmul.f32 %v3585_v16, %v3498_v47 }
0x5286   :  { %v3589_v18 = vpop.permute.xlu1 %3588 }
0x5287   :  { %v3591_v9 = vmul.f32 %v3589_v18, %v3585_v16 }
0x5289   :  { %3593 = vrot.lane.b32.xlu0 %v3591_v9, %s7361_s24 }
0x52fb   :  { %v3594_v24 = vpop.permute.xlu0 %3593 }
0x52fc   :  { %v3596_v11 = vadd.f32 %v3594_v24, %v3586_v22 }
0x52fe   :  { %7231 = vtanh.f32 %v3596_v11 }
0x530b   :  { %v7232_v14 = vpop.eup %7231 }
0x530c   :  { %3599 = vrot.lane.b32.xlu1 %v7232_v14, %s7360_s23 }
0x5310   :  { %245 = vperm.xlu1 %7108, %v62_v17  }
0x537e   :  { %v3600_v19 = vpop.permute.xlu1 %3599 }
0x537f   :  { %v3602_v20 = vmul.f32 %v3600_v19, %v3585_v16 }
0x5381   :  { %3606 = vrot.lane.b32.xlu0 %v3602_v20, %s7361_s24 }
0x538b   :  { %v246_v21 = vpop.permute.xlu1 %245 }
0x538c   :  { %v405_v23 = vmul.f32 %v8151_v13, %v246_v21 }
0x538e   :  { %v468_v25 = vadd.f32 %v8157_v15, %v405_v23 }
0x5390   :  { %524 = vst [vmem:[#allocation2 + $0x3e] sm:$0x3] %v468_v25  ;;  %v65_v25 = vld [vmem:[%s8848_s0 + $0x44] sm:$0x3] }
0x5397   :  { %v3604_v28 = vld [vmem:[#allocation2 + $0x3e] sm:$0x3] }
0x53f3   :  { %v3607_v26 = vpop.permute.xlu0 %3606 }
0x53f4   :  { %6836 = vmatmul.mubr.msk.f32.vlgmr.msra.gmra.mxu1 %vm556_vm1, %v3607_v26 }
0x53f5   :  { %6850 = vmatpush3.msra.mxu1 %v8112_v53  ;;  %6857 = vmatprep.mubr.msk.f32.mxu1 %vm7358_vm0, %v7357_v0 }
0x53f6   :  { %6851 = vmatprep.subr.mxu1 %v7357_v0 }
0x53f7   :  { %6852 = vmatpush3.msra.mxu1 %v8121_v10 }
0x53f8   :  { %6853 = vmatprep.subr.mxu1 %v7357_v0 }
0x53f9   :  { %6854 = vmatpush3.msra.mxu1 %v8128_v12 }
0x53fa   :  { %6855 = vmatprep.subr.mxu1 %v7357_v0 }
0x53fb   :  { %6856 = vmatpush3.msra.mxu1 %v8135_v54 }
0x53fc   :  { %6871 = vmatprep.subr.mxu1 %v7357_v0 }
0x54b4   :  { %v3676_v30 = vpop.f32.mrf.mxu1 }
0x54b5   :  { %v3680_v31 = vadd.f32 %v3676_v30, %v3604_v28 }
0x54b6   :  { %v6837_v32 = vpop.f32.mrf.mxu1 }
0x54b7   :  { %7233 = vtanh.f32 %v3680_v31 }
0x54c4   :  { %v7234_v33 = vpop.eup %7233 }
0x54c5   :  { %v3682_v34 = vmul.f32 %v8174_v27, %v7234_v33 }
0x54c7   :  { %v3683_v35 = vadd.f32 %v8180_v29, %v3682_v34 }
0x54c9   :  { %3686 = vrot.lane.b32.xlu0 %v3683_v35, %s7360_s23  ;;  %v3684_v37 = vmul.f32 %v3683_v35, %v3596_v11 }
0x553b   :  { %v3687_v1 = vpop.permute.xlu0 %3686 }
0x553c   :  { %v3689_v36 = vmul.f32 %v3687_v1, %v3683_v35 }
0x553e   :  { %3691 = vrot.lane.b32.xlu1 %v3689_v36, %s7361_s24 }
0x55b0   :  { %v3692_v38 = vpop.permute.xlu1 %3691 }
0x55b1   :  { %v3694_v2 = vadd.f32 %v3692_v38, %v3684_v37 }
0x55b3   :  { %7235 = vtanh.f32 %v3694_v2 }
0x55c0   :  { %v7236_v50 = vpop.eup %7235 }
0x55c1   :  { %3697 = vrot.lane.b32.xlu0 %v7236_v50, %s7360_s23 }
0x55c5   :  { %250 = vperm.xlu0 %7107, %v63_v39  }
0x5633   :  { %v3698_v5 = vpop.permute.xlu0 %3697 }
0x5634   :  { %v3700_v40 = vmul.f32 %v3698_v5, %v3683_v35 }
0x5636   :  { %3704 = vrot.lane.b32.xlu1 %v3700_v40, %s7361_s24 }
0x5640   :  { %v251_v7 = vpop.permute.xlu0 %250 }
0x5641   :  { %v406_v6 = vmul.f32 %v8151_v13, %v251_v7 }
0x5643   :  { %v469_v8 = vadd.f32 %v8157_v15, %v406_v6 }
0x5645   :  { %525 = vst [vmem:[#allocation2 + $0x40] sm:$0x3] %v469_v8  ;;  %v66_v8 = vld [vmem:[%s8848_s0 + $0x46] sm:$0x3] }
0x564c   :  { %v3702_v51 = vld [vmem:[#allocation2 + $0x40] sm:$0x3] }
0x56a8   :  { %v3705_v41 = vpop.permute.xlu1 %3704 }
0x56a9   :  { %6847 = vmatmul.mubr.msk.f32.vlgmr.msra.gmra.mxu0 %vm556_vm1, %v3705_v41 }
0x56aa   :  { %6861 = vmatpush3.msra.mxu0 %v8112_v53  ;;  %6868 = vmatprep.mubr.msk.f32.mxu0 %vm7358_vm0, %v7357_v0 }
0x56ab   :  { %6862 = vmatprep.subr.mxu0 %v7357_v0 }
0x56ac   :  { %6863 = vmatpush3.msra.mxu0 %v8121_v10 }
0x56ad   :  { %6864 = vmatprep.subr.mxu0 %v7357_v0 }
0x56ae   :  { %6865 = vmatpush3.msra.mxu0 %v8128_v12 }
0x56af   :  { %6866 = vmatprep.subr.mxu0 %v7357_v0 }
0x56b0   :  { %6867 = vmatpush3.msra.mxu0 %v8135_v54 }
0x56b1   :  { %6882 = vmatprep.subr.mxu0 %v7357_v0 }
0x5769   :  { %v3774_v42 = vpop.f32.mrf.mxu0 }
0x576a   :  { %v3778_v43 = vadd.f32 %v3774_v42, %v3702_v51 }
0x576b   :  { %v6848_v44 = vpop.f32.mrf.mxu0 }
0x576c   :  { %7237 = vtanh.f32 %v3778_v43 }
0x5779   :  { %v7238_v45 = vpop.eup %7237 }
0x577a   :  { %v3780_v46 = vmul.f32 %v8174_v27, %v7238_v45 }
0x577c   :  { %v3781_v47 = vadd.f32 %v8180_v29, %v3780_v46 }
0x577e   :  { %3784 = vrot.lane.b32.xlu1 %v3781_v47, %s7360_s23  ;;  %v3782_v52 = vmul.f32 %v3781_v47, %v3694_v2 }
0x57f0   :  { %v3785_v48 = vpop.permute.xlu1 %3784 }
0x57f1   :  { %v3787_v49 = vmul.f32 %v3785_v48, %v3781_v47 }
0x57f3   :  { %3789 = vrot.lane.b32.xlu0 %v3787_v49, %s7361_s24 }
0x5865   :  { %v3790_v55 = vpop.permute.xlu0 %3789 }
0x5866   :  { %v3792_v56 = vadd.f32 %v3790_v55, %v3782_v52 }
0x5868   :  { %7239 = vtanh.f32 %v3792_v56 }
0x5875   :  { %v7240_v57 = vpop.eup %7239 }
0x5876   :  { %3795 = vrot.lane.b32.xlu1 %v7240_v57, %s7360_s23 }
0x587a   :  { %255 = vperm.xlu1 %7108, %v64_v58  }
0x58e8   :  { %v3796_v59 = vpop.permute.xlu1 %3795 }
0x58e9   :  { %v3798_v60 = vmul.f32 %v3796_v59, %v3781_v47 }
0x58eb   :  { %3802 = vrot.lane.b32.xlu0 %v3798_v60, %s7361_s24 }
0x58f5   :  { %v256_v61 = vpop.permute.xlu1 %255 }
0x58f6   :  { %v407_v62 = vmul.f32 %v8151_v13, %v256_v61 }
0x58f8   :  { %v470_v63 = vadd.f32 %v8157_v15, %v407_v62 }
0x58fa   :  { %526 = vst [vmem:[#allocation2 + $0x42] sm:$0x3] %v470_v63  ;;  %v67_v63 = vld [vmem:[%s8848_s0 + $0x48] sm:$0x3] }
0x5901   :  { %v3800_v4 = vld [vmem:[#allocation2 + $0x42] sm:$0x3] }
0x595d   :  { %v3803_v3 = vpop.permute.xlu0 %3802 }
0x595e   :  { %6858 = vmatmul.mubr.msk.f32.vlgmr.msra.gmra.mxu1 %vm556_vm1, %v3803_v3 }
0x595f   :  { %6872 = vmatpush3.msra.mxu1 %v8112_v53  ;;  %6879 = vmatprep.mubr.msk.f32.mxu1 %vm7358_vm0, %v7357_v0 }
0x5960   :  { %6873 = vmatprep.subr.mxu1 %v7357_v0 }
0x5961   :  { %6874 = vmatpush3.msra.mxu1 %v8121_v10 }
0x5962   :  { %6875 = vmatprep.subr.mxu1 %v7357_v0 }
0x5963   :  { %6876 = vmatpush3.msra.mxu1 %v8128_v12 }
0x5964   :  { %6877 = vmatprep.subr.mxu1 %v7357_v0 }
0x5965   :  { %6878 = vmatpush3.msra.mxu1 %v8135_v54 }
0x5966   :  { %6893 = vmatprep.subr.mxu1 %v7357_v0 }
0x5a1e   :  { %v3872_v16 = vpop.f32.mrf.mxu1 }
0x5a1f   :  { %v3876_v18 = vadd.f32 %v3872_v16, %v3800_v4 }
0x5a20   :  { %v6859_v9 = vpop.f32.mrf.mxu1 }
0x5a21   :  { %7241 = vtanh.f32 %v3876_v18 }
0x5a2e   :  { %v7242_v22 = vpop.eup %7241 }
0x5a2f   :  { %v3878_v24 = vmul.f32 %v8174_v27, %v7242_v22 }
0x5a31   :  { %v3879_v11 = vadd.f32 %v8180_v29, %v3878_v24 }
0x5a33   :  { %3882 = vrot.lane.b32.xlu0 %v3879_v11, %s7360_s23  ;;  %v3880_v19 = vmul.f32 %v3879_v11, %v3792_v56 }
0x5aa5   :  { %v3883_v14 = vpop.permute.xlu0 %3882 }
0x5aa6   :  { %v3885_v17 = vmul.f32 %v3883_v14, %v3879_v11 }
0x5aa8   :  { %3887 = vrot.lane.b32.xlu1 %v3885_v17, %s7361_s24 }
0x5b1a   :  { %v3888_v20 = vpop.permute.xlu1 %3887 }
0x5b1b   :  { %v3890_v21 = vadd.f32 %v3888_v20, %v3880_v19 }
0x5b1d   :  { %7243 = vtanh.f32 %v3890_v21 }
0x5b2a   :  { %v7244_v23 = vpop.eup %7243 }
0x5b2b   :  { %3893 = vrot.lane.b32.xlu0 %v7244_v23, %s7360_s23 }
0x5b2f   :  { %260 = vperm.xlu0 %7107, %v65_v25  }
0x5b9d   :  { %v3894_v26 = vpop.permute.xlu0 %3893 }
0x5b9e   :  { %v3896_v28 = vmul.f32 %v3894_v26, %v3879_v11 }
0x5ba0   :  { %3900 = vrot.lane.b32.xlu1 %v3896_v28, %s7361_s24 }
0x5baa   :  { %v261_v30 = vpop.permute.xlu0 %260 }
0x5bab   :  { %v408_v31 = vmul.f32 %v8151_v13, %v261_v30 }
0x5bad   :  { %v471_v32 = vadd.f32 %v8157_v15, %v408_v31 }
0x5baf   :  { %527 = vst [vmem:[#allocation2 + $0x44] sm:$0x3] %v471_v32  ;;  %v68_v32 = vld [vmem:[%s8848_s0 + $0x4a] sm:$0x3] }
0x5bb6   :  { %v3898_v34 = vld [vmem:[#allocation2 + $0x44] sm:$0x3] }
0x5c12   :  { %v3901_v33 = vpop.permute.xlu1 %3900 }
0x5c13   :  { %6869 = vmatmul.mubr.msk.f32.vlgmr.msra.gmra.mxu0 %vm556_vm1, %v3901_v33 }
0x5c14   :  { %6883 = vmatpush3.msra.mxu0 %v8112_v53  ;;  %6890 = vmatprep.mubr.msk.f32.mxu0 %vm7358_vm0, %v7357_v0 }
0x5c15   :  { %6884 = vmatprep.subr.mxu0 %v7357_v0 }
0x5c16   :  { %6885 = vmatpush3.msra.mxu0 %v8121_v10 }
0x5c17   :  { %6886 = vmatprep.subr.mxu0 %v7357_v0 }
0x5c18   :  { %6887 = vmatpush3.msra.mxu0 %v8128_v12 }
0x5c19   :  { %6888 = vmatprep.subr.mxu0 %v7357_v0 }
0x5c1a   :  { %6889 = vmatpush3.msra.mxu0 %v8135_v54 }
0x5c1b   :  { %6904 = vmatprep.subr.mxu0 %v7357_v0 }
0x5cd3   :  { %v3970_v35 = vpop.f32.mrf.mxu0 }
0x5cd4   :  { %v3974_v1 = vadd.f32 %v3970_v35, %v3898_v34 }
0x5cd5   :  { %v6870_v36 = vpop.f32.mrf.mxu0 }
0x5cd6   :  { %7245 = vtanh.f32 %v3974_v1 }
0x5ce3   :  { %v7246_v37 = vpop.eup %7245 }
0x5ce4   :  { %v3976_v38 = vmul.f32 %v8174_v27, %v7246_v37 }
0x5ce6   :  { %v3977_v2 = vadd.f32 %v8180_v29, %v3976_v38 }
0x5ce8   :  { %3980 = vrot.lane.b32.xlu1 %v3977_v2, %s7360_s23  ;;  %v3978_v5 = vmul.f32 %v3977_v2, %v3890_v21 }
0x5d5a   :  { %v3981_v50 = vpop.permute.xlu1 %3980 }
0x5d5b   :  { %v3983_v39 = vmul.f32 %v3981_v50, %v3977_v2 }
0x5d5d   :  { %3985 = vrot.lane.b32.xlu0 %v3983_v39, %s7361_s24 }
0x5dcf   :  { %v3986_v40 = vpop.permute.xlu0 %3985 }
0x5dd0   :  { %v3988_v7 = vadd.f32 %v3986_v40, %v3978_v5 }
0x5dd2   :  { %7247 = vtanh.f32 %v3988_v7 }
0x5ddf   :  { %v7248_v6 = vpop.eup %7247 }
0x5de0   :  { %3991 = vrot.lane.b32.xlu1 %v7248_v6, %s7360_s23 }
0x5de4   :  { %265 = vperm.xlu1 %7108, %v66_v8  }
0x5e52   :  { %v3992_v41 = vpop.permute.xlu1 %3991 }
0x5e53   :  { %v3994_v51 = vmul.f32 %v3992_v41, %v3977_v2 }
0x5e55   :  { %3998 = vrot.lane.b32.xlu0 %v3994_v51, %s7361_s24 }
0x5e5f   :  { %v266_v42 = vpop.permute.xlu1 %265 }
0x5e60   :  { %v409_v43 = vmul.f32 %v8151_v13, %v266_v42 }
0x5e62   :  { %v472_v44 = vadd.f32 %v8157_v15, %v409_v43 }
0x5e64   :  { %528 = vst [vmem:[#allocation2 + $0x46] sm:$0x3] %v472_v44  ;;  %v69_v44 = vld [vmem:[%s8848_s0 + $0x4c] sm:$0x3] }
0x5e6b   :  { %v3996_v46 = vld [vmem:[#allocation2 + $0x46] sm:$0x3] }
0x5ec7   :  { %v3999_v45 = vpop.permute.xlu0 %3998 }
0x5ec8   :  { %6880 = vmatmul.mubr.msk.f32.vlgmr.msra.gmra.mxu1 %vm556_vm1, %v3999_v45 }
0x5ec9   :  { %6894 = vmatpush3.msra.mxu1 %v8112_v53  ;;  %6901 = vmatprep.mubr.msk.f32.mxu1 %vm7358_vm0, %v7357_v0 }
0x5eca   :  { %6895 = vmatprep.subr.mxu1 %v7357_v0 }
0x5ecb   :  { %6896 = vmatpush3.msra.mxu1 %v8121_v10 }
0x5ecc   :  { %6897 = vmatprep.subr.mxu1 %v7357_v0 }
0x5ecd   :  { %6898 = vmatpush3.msra.mxu1 %v8128_v12 }
0x5ece   :  { %6899 = vmatprep.subr.mxu1 %v7357_v0 }
0x5ecf   :  { %6900 = vmatpush3.msra.mxu1 %v8135_v54 }
0x5ed0   :  { %6915 = vmatprep.subr.mxu1 %v7357_v0 }
0x5f88   :  { %v4068_v47 = vpop.f32.mrf.mxu1 }
0x5f89   :  { %v4072_v48 = vadd.f32 %v4068_v47, %v3996_v46 }
0x5f8a   :  { %v6881_v49 = vpop.f32.mrf.mxu1 }
0x5f8b   :  { %7249 = vtanh.f32 %v4072_v48 }
0x5f98   :  { %v7250_v52 = vpop.eup %7249 }
0x5f99   :  { %v4074_v55 = vmul.f32 %v8174_v27, %v7250_v52 }
0x5f9b   :  { %v4075_v56 = vadd.f32 %v8180_v29, %v4074_v55 }
0x5f9d   :  { %4078 = vrot.lane.b32.xlu0 %v4075_v56, %s7360_s23  ;;  %v4076_v59 = vmul.f32 %v4075_v56, %v3988_v7 }
0x600f   :  { %v4079_v57 = vpop.permute.xlu0 %4078 }
0x6010   :  { %v4081_v58 = vmul.f32 %v4079_v57, %v4075_v56 }
0x6012   :  { %4083 = vrot.lane.b32.xlu1 %v4081_v58, %s7361_s24 }
0x6084   :  { %v4084_v60 = vpop.permute.xlu1 %4083 }
0x6085   :  { %v4086_v61 = vadd.f32 %v4084_v60, %v4076_v59 }
0x6087   :  { %7251 = vtanh.f32 %v4086_v61 }
0x6094   :  { %v7252_v62 = vpop.eup %7251 }
0x6095   :  { %4089 = vrot.lane.b32.xlu0 %v7252_v62, %s7360_s23 }
0x6099   :  { %270 = vperm.xlu0 %7107, %v67_v63  }
0x6107   :  { %v4090_v3 = vpop.permute.xlu0 %4089 }
0x6108   :  { %v4092_v4 = vmul.f32 %v4090_v3, %v4075_v56 }
0x610a   :  { %4096 = vrot.lane.b32.xlu1 %v4092_v4, %s7361_s24 }
0x6114   :  { %v271_v16 = vpop.permute.xlu0 %270 }
0x6115   :  { %v410_v18 = vmul.f32 %v8151_v13, %v271_v16 }
0x6117   :  { %v473_v9 = vadd.f32 %v8157_v15, %v410_v18 }
0x6119   :  { %529 = vst [vmem:[#allocation2 + $0x48] sm:$0x3] %v473_v9  ;;  %v70_v9 = vld [vmem:[%s8848_s0 + $0x4e] sm:$0x3] }
0x6120   :  { %v4094_v24 = vld [vmem:[#allocation2 + $0x48] sm:$0x3] }
0x617c   :  { %v4097_v22 = vpop.permute.xlu1 %4096 }
0x617d   :  { %6891 = vmatmul.mubr.msk.f32.vlgmr.msra.gmra.mxu0 %vm556_vm1, %v4097_v22 }
0x617e   :  { %6905 = vmatpush3.msra.mxu0 %v8112_v53  ;;  %6912 = vmatprep.mubr.msk.f32.mxu0 %vm7358_vm0, %v7357_v0 }
0x617f   :  { %6906 = vmatprep.subr.mxu0 %v7357_v0 }
0x6180   :  { %6907 = vmatpush3.msra.mxu0 %v8121_v10 }
0x6181   :  { %6908 = vmatprep.subr.mxu0 %v7357_v0 }
0x6182   :  { %6909 = vmatpush3.msra.mxu0 %v8128_v12 }
0x6183   :  { %6910 = vmatprep.subr.mxu0 %v7357_v0 }
0x6184   :  { %6911 = vmatpush3.msra.mxu0 %v8135_v54 }
0x6185   :  { %6926 = vmatprep.subr.mxu0 %v7357_v0 }
0x623d   :  { %v4166_v11 = vpop.f32.mrf.mxu0 }
0x623e   :  { %v4170_v14 = vadd.f32 %v4166_v11, %v4094_v24 }
0x623f   :  { %v6892_v17 = vpop.f32.mrf.mxu0 }
0x6240   :  { %7253 = vtanh.f32 %v4170_v14 }
0x624d   :  { %v7254_v19 = vpop.eup %7253 }
0x624e   :  { %v4172_v20 = vmul.f32 %v8174_v27, %v7254_v19 }
0x6250   :  { %v4173_v21 = vadd.f32 %v8180_v29, %v4172_v20 }
0x6252   :  { %4176 = vrot.lane.b32.xlu1 %v4173_v21, %s7360_s23  ;;  %v4174_v26 = vmul.f32 %v4173_v21, %v4086_v61 }
0x62c4   :  { %v4177_v23 = vpop.permute.xlu1 %4176 }
0x62c5   :  { %v4179_v25 = vmul.f32 %v4177_v23, %v4173_v21 }
0x62c7   :  { %4181 = vrot.lane.b32.xlu0 %v4179_v25, %s7361_s24 }
0x6339   :  { %v4182_v28 = vpop.permute.xlu0 %4181 }
0x633a   :  { %v4184_v30 = vadd.f32 %v4182_v28, %v4174_v26 }
0x633c   :  { %7255 = vtanh.f32 %v4184_v30 }
0x6349   :  { %v7256_v31 = vpop.eup %7255 }
0x634a   :  { %4187 = vrot.lane.b32.xlu1 %v7256_v31, %s7360_s23 }
0x634e   :  { %275 = vperm.xlu1 %7108, %v68_v32  }
0x63bc   :  { %v4188_v33 = vpop.permute.xlu1 %4187 }
0x63bd   :  { %v4190_v34 = vmul.f32 %v4188_v33, %v4173_v21 }
0x63bf   :  { %4194 = vrot.lane.b32.xlu0 %v4190_v34, %s7361_s24 }
0x63c9   :  { %v276_v35 = vpop.permute.xlu1 %275 }
0x63ca   :  { %v411_v1 = vmul.f32 %v8151_v13, %v276_v35 }
0x63cc   :  { %v474_v36 = vadd.f32 %v8157_v15, %v411_v1 }
0x63ce   :  { %530 = vst [vmem:[#allocation2 + $0x4a] sm:$0x3] %v474_v36  ;;  %v71_v36 = vld [vmem:[%s8848_s0 + $0x50] sm:$0x3] }
0x63d5   :  { %v4192_v38 = vld [vmem:[#allocation2 + $0x4a] sm:$0x3] }
0x6431   :  { %v4195_v37 = vpop.permute.xlu0 %4194 }
0x6432   :  { %6902 = vmatmul.mubr.msk.f32.vlgmr.msra.gmra.mxu1 %vm556_vm1, %v4195_v37 }
0x6433   :  { %6916 = vmatpush3.msra.mxu1 %v8112_v53  ;;  %6923 = vmatprep.mubr.msk.f32.mxu1 %vm7358_vm0, %v7357_v0 }
0x6434   :  { %6917 = vmatprep.subr.mxu1 %v7357_v0 }
0x6435   :  { %6918 = vmatpush3.msra.mxu1 %v8121_v10 }
0x6436   :  { %6919 = vmatprep.subr.mxu1 %v7357_v0 }
0x6437   :  { %6920 = vmatpush3.msra.mxu1 %v8128_v12 }
0x6438   :  { %6921 = vmatprep.subr.mxu1 %v7357_v0 }
0x6439   :  { %6922 = vmatpush3.msra.mxu1 %v8135_v54 }
0x643a   :  { %6937 = vmatprep.subr.mxu1 %v7357_v0 }
0x64f2   :  { %v4264_v2 = vpop.f32.mrf.mxu1 }
0x64f3   :  { %v4268_v50 = vadd.f32 %v4264_v2, %v4192_v38 }
0x64f4   :  { %v6903_v39 = vpop.f32.mrf.mxu1 }
0x64f5   :  { %7257 = vtanh.f32 %v4268_v50 }
0x6502   :  { %v7258_v5 = vpop.eup %7257 }
0x6503   :  { %v4270_v40 = vmul.f32 %v8174_v27, %v7258_v5 }
0x6505   :  { %v4271_v7 = vadd.f32 %v8180_v29, %v4270_v40 }
0x6507   :  { %4274 = vrot.lane.b32.xlu0 %v4271_v7, %s7360_s23  ;;  %v4272_v41 = vmul.f32 %v4271_v7, %v4184_v30 }
0x6579   :  { %v4275_v6 = vpop.permute.xlu0 %4274 }
0x657a   :  { %v4277_v8 = vmul.f32 %v4275_v6, %v4271_v7 }
0x657c   :  { %4279 = vrot.lane.b32.xlu1 %v4277_v8, %s7361_s24 }
0x65ee   :  { %v4280_v51 = vpop.permute.xlu1 %4279 }
0x65ef   :  { %v4282_v42 = vadd.f32 %v4280_v51, %v4272_v41 }
0x65f1   :  { %7259 = vtanh.f32 %v4282_v42 }
0x65fe   :  { %v7260_v43 = vpop.eup %7259 }
0x65ff   :  { %4285 = vrot.lane.b32.xlu0 %v7260_v43, %s7360_s23 }
0x6603   :  { %280 = vperm.xlu0 %7107, %v69_v44  }
0x6671   :  { %v4286_v45 = vpop.permute.xlu0 %4285 }
0x6672   :  { %v4288_v46 = vmul.f32 %v4286_v45, %v4271_v7  ;;  %v72_v45 = vld [vmem:[%s8848_s0 + $0x52] sm:$0x3] }
0x6674   :  { %4292 = vrot.lane.b32.xlu1 %v4288_v46, %s7361_s24 }
0x667e   :  { %v281_v47 = vpop.permute.xlu0 %280 }
0x667f   :  { %v412_v48 = vmul.f32 %v8151_v13, %v281_v47 }
0x6681   :  { %v475_v49 = vadd.f32 %v8157_v15, %v412_v48 }
0x6683   :  { %531 = vst [vmem:[#allocation2 + $0x4c] sm:$0x3] %v475_v49 }
0x668a   :  { %v4290_v55 = vld [vmem:[#allocation2 + $0x4c] sm:$0x3] }
0x66e6   :  { %v4293_v52 = vpop.permute.xlu1 %4292 }
0x66e7   :  { %6913 = vmatmul.mubr.msk.f32.vlgmr.msra.gmra.mxu0 %vm556_vm1, %v4293_v52 }
0x66e8   :  { %6927 = vmatpush3.msra.mxu0 %v8112_v53  ;;  %6934 = vmatprep.mubr.msk.f32.mxu0 %vm7358_vm0, %v7357_v0 }
0x66e9   :  { %6928 = vmatprep.subr.mxu0 %v7357_v0 }
0x66ea   :  { %6929 = vmatpush3.msra.mxu0 %v8121_v10 }
0x66eb   :  { %6930 = vmatprep.subr.mxu0 %v7357_v0 }
0x66ec   :  { %6931 = vmatpush3.msra.mxu0 %v8128_v12 }
0x66ed   :  { %6932 = vmatprep.subr.mxu0 %v7357_v0 }
0x66ee   :  { %6933 = vmatpush3.msra.mxu0 %v8135_v54 }
0x66ef   :  { %6948 = vmatprep.subr.mxu0 %v7357_v0 }
0x67a7   :  { %v4362_v56 = vpop.f32.mrf.mxu0 }
0x67a8   :  { %v4366_v57 = vadd.f32 %v4362_v56, %v4290_v55  ;;  %v8460_v56 = vld [vmem:[%s8847_s5 + $0x18] sm:$0xff] }
0x67a9   :  { %v6914_v58 = vpop.f32.mrf.mxu0 }
0x67aa   :  { %7261 = vtanh.f32 %v4366_v57  ;;  %v8483_v57 = vld [vmem:[%s8847_s5] sm:$0xff] }
0x67b7   :  { %v7262_v59 = vpop.eup %7261 }
0x67b8   :  { %v4368_v60 = vmul.f32 %v8174_v27, %v7262_v59 }
0x67ba   :  { %v4369_v61 = vadd.f32 %v8180_v29, %v4368_v60 }
0x67bc   :  { %4372 = vrot.lane.b32.xlu1 %v4369_v61, %s7360_s23  ;;  %v4370_v3 = vmul.f32 %v4369_v61, %v4282_v42 }
0x682e   :  { %v4373_v62 = vpop.permute.xlu1 %4372 }
0x682f   :  { %v4375_v63 = vmul.f32 %v4373_v62, %v4369_v61 }
0x6831   :  { %4377 = vrot.lane.b32.xlu0 %v4375_v63, %s7361_s24 }
0x68a3   :  { %v4378_v4 = vpop.permute.xlu0 %4377 }
0x68a4   :  { %v4380_v16 = vadd.f32 %v4378_v4, %v4370_v3 }
0x68a6   :  { %7263 = vtanh.f32 %v4380_v16 }
0x68b3   :  { %v7264_v18 = vpop.eup %7263 }
0x68b4   :  { %4383 = vrot.lane.b32.xlu1 %v7264_v18, %s7360_s23 }
0x68b8   :  { %285 = vperm.xlu1 %7108, %v70_v9  }
0x6926   :  { %v4384_v22 = vpop.permute.xlu1 %4383 }
0x6927   :  { %v4386_v24 = vmul.f32 %v4384_v22, %v4369_v61 }
0x6929   :  { %4390 = vrot.lane.b32.xlu0 %v4386_v24, %s7361_s24 }
0x6933   :  { %v286_v11 = vpop.permute.xlu1 %285 }
0x6934   :  { %v413_v14 = vmul.f32 %v8151_v13, %v286_v11  ;;  %v73_v11 = vld [vmem:[%s8848_s0 + $0x54] sm:$0x3] }
0x6936   :  { %v476_v17 = vadd.f32 %v8157_v15, %v413_v14 }
0x6938   :  { %532 = vst [vmem:[#allocation2 + $0x4e] sm:$0x3] %v476_v17  ;;  %v8499_v17 = vld [vmem:[%s8849_s1] ss:$0 sm:$0xff] }
0x693f   :  { %v4388_v20 = vld [vmem:[#allocation2 + $0x4e] sm:$0x3] }
0x699b   :  { %v4391_v19 = vpop.permute.xlu0 %4390 }
0x699c   :  { %6924 = vmatmul.mubr.msk.f32.vlgmr.msra.gmra.mxu1 %vm556_vm1, %v4391_v19 }
0x699d   :  { %6938 = vmatpush3.msra.mxu1 %v8112_v53  ;;  %6945 = vmatprep.mubr.msk.f32.mxu1 %vm7358_vm0, %v7357_v0 }
0x699e   :  { %6939 = vmatprep.subr.mxu1 %v7357_v0 }
0x699f   :  { %6940 = vmatpush3.msra.mxu1 %v8121_v10 }
0x69a0   :  { %6941 = vmatprep.subr.mxu1 %v7357_v0 }
0x69a1   :  { %6942 = vmatpush3.msra.mxu1 %v8128_v12 }
0x69a2   :  { %6943 = vmatprep.subr.mxu1 %v7357_v0 }
0x69a3   :  { %6944 = vmatpush3.msra.mxu1 %v8135_v54 }
0x69a4   :  { %6959 = vmatprep.subr.mxu1 %v7357_v0 }
0x6a5c   :  { %v4460_v21 = vpop.f32.mrf.mxu1 }
0x6a5d   :  { %v4464_v23 = vadd.f32 %v4460_v21, %v4388_v20  ;;  %v8505_v20 = vld [vmem:[%s8850_s2] ss:$0 sm:$0xff] }
0x6a5e   :  { %v6925_v25 = vpop.f32.mrf.mxu1 }
0x6a5f   :  { %7265 = vtanh.f32 %v4464_v23 }
0x6a6c   :  { %v7266_v26 = vpop.eup %7265 }
0x6a6d   :  { %v4466_v28 = vmul.f32 %v8174_v27, %v7266_v26 }
0x6a6f   :  { %v4467_v30 = vadd.f32 %v8180_v29, %v4466_v28 }
0x6a71   :  { %4470 = vrot.lane.b32.xlu0 %v4467_v30, %s7360_s23  ;;  %v4468_v33 = vmul.f32 %v4467_v30, %v4380_v16 }
0x6ae3   :  { %v4471_v31 = vpop.permute.xlu0 %4470 }
0x6ae4   :  { %v4473_v32 = vmul.f32 %v4471_v31, %v4467_v30 }
0x6ae6   :  { %4475 = vrot.lane.b32.xlu1 %v4473_v32, %s7361_s24  ;;  %v8522_v32 = vld [vmem:[%s8851_s3] ss:$0 sm:$0xff] }
0x6b58   :  { %v4476_v34 = vpop.permute.xlu1 %4475 }
0x6b59   :  { %v4478_v35 = vadd.f32 %v4476_v34, %v4468_v33  ;;  %v8528_v34 = vld [vmem:[%s8852_s4] ss:$0 sm:$0xff] }
0x6b5b   :  { %7267 = vtanh.f32 %v4478_v35 }
0x6b68   :  { %v7268_v1 = vpop.eup %7267 }
0x6b69   :  { %4481 = vrot.lane.b32.xlu0 %v7268_v1, %s7360_s23 }
0x6b6d   :  { %290 = vperm.xlu0 %7107, %v71_v36  }
0x6bdb   :  { %v4482_v37 = vpop.permute.xlu0 %4481 }
0x6bdc   :  { %v4484_v38 = vmul.f32 %v4482_v37, %v4467_v30 }
0x6bde   :  { %4488 = vrot.lane.b32.xlu1 %v4484_v38, %s7361_s24 }
0x6be8   :  { %v291_v2 = vpop.permute.xlu0 %290 }
0x6be9   :  { %v414_v50 = vmul.f32 %v8151_v13, %v291_v2 }
0x6beb   :  { %v477_v39 = vadd.f32 %v8157_v15, %v414_v50 }
0x6bed   :  { %533 = vst [vmem:[#allocation2 + $0x50] sm:$0x3] %v477_v39  ;;  %v74_v39 = vld [vmem:[%s8848_s0 + $0x56] sm:$0x3] }
0x6bf4   :  { %v4486_v40 = vld [vmem:[#allocation2 + $0x50] sm:$0x3] }
0x6c50   :  { %v4489_v5 = vpop.permute.xlu1 %4488 }
0x6c51   :  { %6935 = vmatmul.mubr.msk.f32.vlgmr.msra.gmra.mxu0 %vm556_vm1, %v4489_v5 }
0x6c52   :  { %6949 = vmatpush3.msra.mxu0 %v8112_v53  ;;  %6956 = vmatprep.mubr.msk.f32.mxu0 %vm7358_vm0, %v7357_v0 }
0x6c53   :  { %6950 = vmatprep.subr.mxu0 %v7357_v0 }
0x6c54   :  { %6951 = vmatpush3.msra.mxu0 %v8121_v10 }
0x6c55   :  { %6952 = vmatprep.subr.mxu0 %v7357_v0 }
0x6c56   :  { %6953 = vmatpush3.msra.mxu0 %v8128_v12 }
0x6c57   :  { %6954 = vmatprep.subr.mxu0 %v7357_v0 }
0x6c58   :  { %6955 = vmatpush3.msra.mxu0 %v8135_v54 }
0x6c59   :  { %6970 = vmatprep.subr.mxu0 %v7357_v0 }
0x6d11   :  { %v4558_v7 = vpop.f32.mrf.mxu0 }
0x6d12   :  { %v4562_v53 = vadd.f32 %v4558_v7, %v4486_v40 }
0x6d13   :  { %v6936_v6 = vpop.f32.mrf.mxu0 }
0x6d14   :  { %7269 = vtanh.f32 %v4562_v53 }
0x6d21   :  { %v7270_v8 = vpop.eup %7269 }
0x6d22   :  { %v4564_v41 = vmul.f32 %v8174_v27, %v7270_v8 }
0x6d24   :  { %v4565_v10 = vadd.f32 %v8180_v29, %v4564_v41 }
0x6d26   :  { %4568 = vrot.lane.b32.xlu1 %v4565_v10, %s7360_s23  ;;  %v4566_v42 = vmul.f32 %v4565_v10, %v4478_v35 }
0x6d98   :  { %v4569_v51 = vpop.permute.xlu1 %4568 }
0x6d99   :  { %v4571_v12 = vmul.f32 %v4569_v51, %v4565_v10 }
0x6d9b   :  { %4573 = vrot.lane.b32.xlu0 %v4571_v12, %s7361_s24 }
0x6e0d   :  { %v4574_v54 = vpop.permute.xlu0 %4573 }
0x6e0e   :  { %v4576_v43 = vadd.f32 %v4574_v54, %v4566_v42 }
0x6e10   :  { %7271 = vtanh.f32 %v4576_v43 }
0x6e1d   :  { %v7272_v44 = vpop.eup %7271 }
0x6e1e   :  { %4579 = vrot.lane.b32.xlu1 %v7272_v44, %s7360_s23 }
0x6e22   :  { %295 = vperm.xlu1 %7108, %v72_v45  }
0x6e90   :  { %v4580_v46 = vpop.permute.xlu1 %4579 }
0x6e91   :  { %v4582_v47 = vmul.f32 %v4580_v46, %v4565_v10 }
0x6e93   :  { %4586 = vrot.lane.b32.xlu0 %v4582_v47, %s7361_s24 }
0x6e9d   :  { %v296_v48 = vpop.permute.xlu1 %295 }
0x6e9e   :  { %v415_v49 = vmul.f32 %v8151_v13, %v296_v48  ;;  %v8469_v13 = vld [vmem:[%s8847_s5 + $0x10] sm:$0xff] }
0x6ea0   :  { %v478_v52 = vadd.f32 %v8157_v15, %v415_v49  ;;  %v8476_v15 = vld [vmem:[%s8847_s5 + $0x8] sm:$0xff] }
0x6ea2   :  { %534 = vst [vmem:[#allocation2 + $0x52] sm:$0x3] %v478_v52  ;;  %v75_v52 = vld [vmem:[%s8848_s0 + $0x58] sm:$0x3] }
0x6ea9   :  { %v4584_v58 = vld [vmem:[#allocation2 + $0x52] sm:$0x3] }
0x6f05   :  { %v4587_v55 = vpop.permute.xlu0 %4586 }
0x6f06   :  { %6946 = vmatmul.mubr.msk.f32.vlgmr.msra.gmra.mxu1 %vm556_vm1, %v4587_v55 }
0x6f07   :  { %6960 = vmatpush3.msra.mxu1 %v8460_v56  ;;  %6967 = vmatprep.mubr.msk.f32.mxu1 %vm7358_vm0, %v7357_v0 }
0x6f08   :  { %6961 = vmatprep.subr.mxu1 %v7357_v0 }
0x6f09   :  { %6962 = vmatpush3.msra.mxu1 %v8469_v13 }
0x6f0a   :  { %6963 = vmatprep.subr.mxu1 %v7357_v0 }
0x6f0b   :  { %6964 = vmatpush3.msra.mxu1 %v8476_v15 }
0x6f0c   :  { %6965 = vmatprep.subr.mxu1 %v7357_v0 }
0x6f0d   :  { %6966 = vmatpush3.msra.mxu1 %v8483_v57 }
0x6f0e   :  { %6981 = vmatprep.subr.mxu1 %v7357_v0 }
0x6fc6   :  { %v4656_v59 = vpop.f32.mrf.mxu1 }
0x6fc7   :  { %v4660_v60 = vadd.f32 %v4656_v59, %v4584_v58 }
0x6fc8   :  { %v6947_v61 = vpop.f32.mrf.mxu1 }
0x6fc9   :  { %7273 = vtanh.f32 %v4660_v60 }
0x6fd6   :  { %v7274_v62 = vpop.eup %7273 }
0x6fd7   :  { %v4662_v63 = vmul.f32 %v8174_v27, %v7274_v62 }
0x6fd9   :  { %v4663_v3 = vadd.f32 %v8180_v29, %v4662_v63 }
0x6fdb   :  { %4666 = vrot.lane.b32.xlu0 %v4663_v3, %s7360_s23  ;;  %v4664_v18 = vmul.f32 %v4663_v3, %v4576_v43 }
0x704d   :  { %v4667_v4 = vpop.permute.xlu0 %4666 }
0x704e   :  { %v4669_v16 = vmul.f32 %v4667_v4, %v4663_v3 }
0x7050   :  { %4671 = vrot.lane.b32.xlu1 %v4669_v16, %s7361_s24 }
0x70c2   :  { %v4672_v9 = vpop.permute.xlu1 %4671 }
0x70c3   :  { %v4674_v22 = vadd.f32 %v4672_v9, %v4664_v18 }
0x70c5   :  { %7275 = vtanh.f32 %v4674_v22 }
0x70d2   :  { %v7276_v24 = vpop.eup %7275 }
0x70d3   :  { %4677 = vrot.lane.b32.xlu0 %v7276_v24, %s7360_s23 }
0x70d7   :  { %300 = vperm.xlu0 %7107, %v73_v11  }
0x7145   :  { %v4678_v27 = vpop.permute.xlu0 %4677 }
0x7146   :  { %v4680_v29 = vmul.f32 %v4678_v27, %v4663_v3 }
0x7148   :  { %4684 = vrot.lane.b32.xlu1 %v4680_v29, %s7361_s24 }
0x7152   :  { %v301_v14 = vpop.permute.xlu0 %300 }
0x7153   :  { %v416_v19 = vmul.f32 %v8499_v17, %v301_v14 }
0x7155   :  { %v479_v21 = vadd.f32 %v8505_v20, %v416_v19 }
0x7157   :  { %535 = vst [vmem:[#allocation2 + $0x54] sm:$0x3] %v479_v21  ;;  %v76_v21 = vld [vmem:[%s8848_s0 + $0x5a] sm:$0x3] }
0x715e   :  { %v4682_v25 = vld [vmem:[#allocation2 + $0x54] sm:$0x3] }
0x71ba   :  { %v4685_v23 = vpop.permute.xlu1 %4684 }
0x71bb   :  { %6957 = vmatmul.mubr.msk.f32.vlgmr.msra.gmra.mxu0 %vm556_vm1, %v4685_v23 }
0x71bc   :  { %6971 = vmatpush3.msra.mxu0 %v8460_v56  ;;  %6978 = vmatprep.mubr.msk.f32.mxu0 %vm7358_vm0, %v7357_v0 }
0x71bd   :  { %6972 = vmatprep.subr.mxu0 %v7357_v0 }
0x71be   :  { %6973 = vmatpush3.msra.mxu0 %v8469_v13 }
0x71bf   :  { %6974 = vmatprep.subr.mxu0 %v7357_v0 }
0x71c0   :  { %6975 = vmatpush3.msra.mxu0 %v8476_v15 }
0x71c1   :  { %6976 = vmatprep.subr.mxu0 %v7357_v0 }
0x71c2   :  { %6977 = vmatpush3.msra.mxu0 %v8483_v57 }
0x71c3   :  { %6992 = vmatprep.subr.mxu0 %v7357_v0 }
0x727b   :  { %v4754_v26 = vpop.f32.mrf.mxu0 }
0x727c   :  { %v4758_v28 = vadd.f32 %v4754_v26, %v4682_v25 }
0x727d   :  { %v6958_v30 = vpop.f32.mrf.mxu0 }
0x727e   :  { %7277 = vtanh.f32 %v4758_v28 }
0x728b   :  { %v7278_v31 = vpop.eup %7277 }
0x728c   :  { %v4760_v33 = vmul.f32 %v8522_v32, %v7278_v31 }
0x728e   :  { %v4761_v35 = vadd.f32 %v8528_v34, %v4760_v33 }
0x7290   :  { %4764 = vrot.lane.b32.xlu1 %v4761_v35, %s7360_s23  ;;  %v4762_v37 = vmul.f32 %v4761_v35, %v4674_v22 }
0x7302   :  { %v4765_v1 = vpop.permute.xlu1 %4764 }
0x7303   :  { %v4767_v36 = vmul.f32 %v4765_v1, %v4761_v35 }
0x7305   :  { %4769 = vrot.lane.b32.xlu0 %v4767_v36, %s7361_s24 }
0x7377   :  { %v4770_v38 = vpop.permute.xlu0 %4769 }
0x7378   :  { %v4772_v2 = vadd.f32 %v4770_v38, %v4762_v37 }
0x737a   :  { %7279 = vtanh.f32 %v4772_v2 }
0x7387   :  { %v7280_v50 = vpop.eup %7279 }
0x7388   :  { %4775 = vrot.lane.b32.xlu1 %v7280_v50, %s7360_s23 }
0x738c   :  { %305 = vperm.xlu1 %7108, %v74_v39  }
0x73fa   :  { %v4776_v5 = vpop.permute.xlu1 %4775 }
0x73fb   :  { %v4778_v40 = vmul.f32 %v4776_v5, %v4761_v35 }
0x73fd   :  { %4782 = vrot.lane.b32.xlu0 %v4778_v40, %s7361_s24 }
0x7407   :  { %v306_v7 = vpop.permute.xlu1 %305 }
0x7408   :  { %v417_v53 = vmul.f32 %v8499_v17, %v306_v7 }
0x740a   :  { %v480_v6 = vadd.f32 %v8505_v20, %v417_v53 }
0x740c   :  { %536 = vst [vmem:[#allocation2 + $0x56] sm:$0x3] %v480_v6  ;;  %v77_v6 = vld [vmem:[%s8848_s0 + $0x5c] sm:$0x3] }
0x7413   :  { %v4780_v41 = vld [vmem:[#allocation2 + $0x56] sm:$0x3] }
0x746f   :  { %v4783_v8 = vpop.permute.xlu0 %4782 }
0x7470   :  { %6968 = vmatmul.mubr.msk.f32.vlgmr.msra.gmra.mxu1 %vm556_vm1, %v4783_v8 }
0x7471   :  { %6982 = vmatpush3.msra.mxu1 %v8460_v56  ;;  %6989 = vmatprep.mubr.msk.f32.mxu1 %vm7358_vm0, %v7357_v0 }
0x7472   :  { %6983 = vmatprep.subr.mxu1 %v7357_v0 }
0x7473   :  { %6984 = vmatpush3.msra.mxu1 %v8469_v13 }
0x7474   :  { %6985 = vmatprep.subr.mxu1 %v7357_v0 }
0x7475   :  { %6986 = vmatpush3.msra.mxu1 %v8476_v15 }
0x7476   :  { %6987 = vmatprep.subr.mxu1 %v7357_v0 }
0x7477   :  { %6988 = vmatpush3.msra.mxu1 %v8483_v57 }
0x7478   :  { %7003 = vmatprep.subr.mxu1 %v7357_v0 }
0x7530   :  { %v4852_v10 = vpop.f32.mrf.mxu1 }
0x7531   :  { %v4856_v51 = vadd.f32 %v4852_v10, %v4780_v41 }
0x7532   :  { %v6969_v12 = vpop.f32.mrf.mxu1 }
0x7533   :  { %7281 = vtanh.f32 %v4856_v51 }
0x7540   :  { %v7282_v42 = vpop.eup %7281 }
0x7541   :  { %v4858_v54 = vmul.f32 %v8522_v32, %v7282_v42 }
0x7543   :  { %v4859_v43 = vadd.f32 %v8528_v34, %v4858_v54 }
0x7545   :  { %4862 = vrot.lane.b32.xlu0 %v4859_v43, %s7360_s23  ;;  %v4860_v46 = vmul.f32 %v4859_v43, %v4772_v2 }
0x75b7   :  { %v4863_v44 = vpop.permute.xlu0 %4862 }
0x75b8   :  { %v4865_v45 = vmul.f32 %v4863_v44, %v4859_v43 }
0x75ba   :  { %4867 = vrot.lane.b32.xlu1 %v4865_v45, %s7361_s24 }
0x762c   :  { %v4868_v47 = vpop.permute.xlu1 %4867 }
0x762d   :  { %v4870_v48 = vadd.f32 %v4868_v47, %v4860_v46 }
0x762f   :  { %7283 = vtanh.f32 %v4870_v48 }
0x763c   :  { %v7284_v49 = vpop.eup %7283 }
0x763d   :  { %4873 = vrot.lane.b32.xlu0 %v7284_v49, %s7360_s23 }
0x7641   :  { %310 = vperm.xlu0 %7107, %v75_v52  }
0x76af   :  { %v4874_v55 = vpop.permute.xlu0 %4873 }
0x76b0   :  { %v4876_v58 = vmul.f32 %v4874_v55, %v4859_v43 }
0x76b2   :  { %4880 = vrot.lane.b32.xlu1 %v4876_v58, %s7361_s24 }
0x76bc   :  { %v311_v59 = vpop.permute.xlu0 %310 }
0x76bd   :  { %v418_v60 = vmul.f32 %v8499_v17, %v311_v59 }
0x76bf   :  { %v481_v61 = vadd.f32 %v8505_v20, %v418_v60 }
0x76c1   :  { %537 = vst [vmem:[#allocation2 + $0x58] sm:$0x3] %v481_v61  ;;  %v78_v61 = vld [vmem:[%s8848_s0 + $0x5e] sm:$0x3] }
0x76c8   :  { %v4878_v63 = vld [vmem:[#allocation2 + $0x58] sm:$0x3] }
0x7724   :  { %v4881_v62 = vpop.permute.xlu1 %4880 }
0x7725   :  { %6979 = vmatmul.mubr.msk.f32.vlgmr.msra.gmra.mxu0 %vm556_vm1, %v4881_v62 }
0x7726   :  { %6993 = vmatpush3.msra.mxu0 %v8460_v56  ;;  %7000 = vmatprep.mubr.msk.f32.mxu0 %vm7358_vm0, %v7357_v0 }
0x7727   :  { %6994 = vmatprep.subr.mxu0 %v7357_v0 }
0x7728   :  { %6995 = vmatpush3.msra.mxu0 %v8469_v13 }
0x7729   :  { %6996 = vmatprep.subr.mxu0 %v7357_v0 }
0x772a   :  { %6997 = vmatpush3.msra.mxu0 %v8476_v15 }
0x772b   :  { %6998 = vmatprep.subr.mxu0 %v7357_v0 }
0x772c   :  { %6999 = vmatpush3.msra.mxu0 %v8483_v57 }
0x772d   :  { %7014 = vmatprep.subr.mxu0 %v7357_v0 }
0x77e5   :  { %v4950_v3 = vpop.f32.mrf.mxu0 }
0x77e6   :  { %v4954_v4 = vadd.f32 %v4950_v3, %v4878_v63 }
0x77e7   :  { %v6980_v16 = vpop.f32.mrf.mxu0 }
0x77e8   :  { %7285 = vtanh.f32 %v4954_v4 }
0x77f5   :  { %v7286_v18 = vpop.eup %7285 }
0x77f6   :  { %v4956_v9 = vmul.f32 %v8522_v32, %v7286_v18 }
0x77f8   :  { %v4957_v22 = vadd.f32 %v8528_v34, %v4956_v9 }
0x77fa   :  { %4960 = vrot.lane.b32.xlu1 %v4957_v22, %s7360_s23  ;;  %v4958_v27 = vmul.f32 %v4957_v22, %v4870_v48 }
0x786c   :  { %v4961_v24 = vpop.permute.xlu1 %4960 }
0x786d   :  { %v4963_v11 = vmul.f32 %v4961_v24, %v4957_v22 }
0x786f   :  { %4965 = vrot.lane.b32.xlu0 %v4963_v11, %s7361_s24 }
0x78e1   :  { %v4966_v29 = vpop.permute.xlu0 %4965 }
0x78e2   :  { %v4968_v14 = vadd.f32 %v4966_v29, %v4958_v27 }
0x78e4   :  { %7287 = vtanh.f32 %v4968_v14 }
0x78f1   :  { %v7288_v19 = vpop.eup %7287 }
0x78f2   :  { %4971 = vrot.lane.b32.xlu1 %v7288_v19, %s7360_s23 }
0x78f6   :  { %315 = vperm.xlu1 %7108, %v76_v21  }
0x7964   :  { %v4972_v23 = vpop.permute.xlu1 %4971 }
0x7965   :  { %v4974_v25 = vmul.f32 %v4972_v23, %v4957_v22 }
0x7967   :  { %4978 = vrot.lane.b32.xlu0 %v4974_v25, %s7361_s24 }
0x7971   :  { %v316_v26 = vpop.permute.xlu1 %315 }
0x7972   :  { %v419_v28 = vmul.f32 %v8499_v17, %v316_v26 }
0x7974   :  { %v482_v30 = vadd.f32 %v8505_v20, %v419_v28 }
0x7976   :  { %538 = vst [vmem:[#allocation2 + $0x5a] sm:$0x3] %v482_v30  ;;  %v79_v30 = vld [vmem:[%s8848_s0 + $0x60] sm:$0x3] }
0x797d   :  { %v4976_v33 = vld [vmem:[#allocation2 + $0x5a] sm:$0x3] }
0x79d9   :  { %v4979_v31 = vpop.permute.xlu0 %4978 }
0x79da   :  { %6990 = vmatmul.mubr.msk.f32.vlgmr.msra.gmra.mxu1 %vm556_vm1, %v4979_v31 }
0x79db   :  { %7004 = vmatpush3.msra.mxu1 %v8460_v56  ;;  %7011 = vmatprep.mubr.msk.f32.mxu1 %vm7358_vm0, %v7357_v0 }
0x79dc   :  { %7005 = vmatprep.subr.mxu1 %v7357_v0 }
0x79dd   :  { %7006 = vmatpush3.msra.mxu1 %v8469_v13 }
0x79de   :  { %7007 = vmatprep.subr.mxu1 %v7357_v0 }
0x79df   :  { %7008 = vmatpush3.msra.mxu1 %v8476_v15 }
0x79e0   :  { %7009 = vmatprep.subr.mxu1 %v7357_v0 }
0x79e1   :  { %7010 = vmatpush3.msra.mxu1 %v8483_v57 }
0x79e2   :  { %7025 = vmatprep.subr.mxu1 %v7357_v0 }
0x7a9a   :  { %v5048_v35 = vpop.f32.mrf.mxu1 }
0x7a9b   :  { %v5052_v1 = vadd.f32 %v5048_v35, %v4976_v33 }
0x7a9c   :  { %v6991_v36 = vpop.f32.mrf.mxu1 }
0x7a9d   :  { %7289 = vtanh.f32 %v5052_v1 }
0x7aaa   :  { %v7290_v37 = vpop.eup %7289 }
0x7aab   :  { %v5054_v38 = vmul.f32 %v8522_v32, %v7290_v37 }
0x7aad   :  { %v5055_v2 = vadd.f32 %v8528_v34, %v5054_v38 }
0x7aaf   :  { %5058 = vrot.lane.b32.xlu0 %v5055_v2, %s7360_s23  ;;  %v5056_v5 = vmul.f32 %v5055_v2, %v4968_v14 }
0x7b21   :  { %v5059_v50 = vpop.permute.xlu0 %5058 }
0x7b22   :  { %v5061_v39 = vmul.f32 %v5059_v50, %v5055_v2 }
0x7b24   :  { %5063 = vrot.lane.b32.xlu1 %v5061_v39, %s7361_s24 }
0x7b96   :  { %v5064_v40 = vpop.permute.xlu1 %5063 }
0x7b97   :  { %v5066_v7 = vadd.f32 %v5064_v40, %v5056_v5 }
0x7b99   :  { %7291 = vtanh.f32 %v5066_v7 }
0x7ba6   :  { %v7292_v53 = vpop.eup %7291 }
0x7ba7   :  { %5069 = vrot.lane.b32.xlu0 %v7292_v53, %s7360_s23 }
0x7bab   :  { %320 = vperm.xlu0 %7107, %v77_v6  }
0x7c19   :  { %v5070_v8 = vpop.permute.xlu0 %5069 }
0x7c1a   :  { %v5072_v41 = vmul.f32 %v5070_v8, %v5055_v2 }
0x7c1c   :  { %5076 = vrot.lane.b32.xlu1 %v5072_v41, %s7361_s24 }
0x7c26   :  { %v321_v10 = vpop.permute.xlu0 %320 }
0x7c27   :  { %v420_v51 = vmul.f32 %v8499_v17, %v321_v10 }
0x7c29   :  { %v483_v12 = vadd.f32 %v8505_v20, %v420_v51 }
0x7c2b   :  { %539 = vst [vmem:[#allocation2 + $0x5c] sm:$0x3] %v483_v12  ;;  %v80_v12 = vld [vmem:[%s8848_s0 + $0x62] sm:$0x3] }
0x7c32   :  { %v5074_v54 = vld [vmem:[#allocation2 + $0x5c] sm:$0x3] }
0x7c8e   :  { %v5077_v42 = vpop.permute.xlu1 %5076 }
0x7c8f   :  { %7001 = vmatmul.mubr.msk.f32.vlgmr.msra.gmra.mxu0 %vm556_vm1, %v5077_v42 }
0x7c90   :  { %7015 = vmatpush3.msra.mxu0 %v8460_v56  ;;  %7022 = vmatprep.mubr.msk.f32.mxu0 %vm7358_vm0, %v7357_v0 }
0x7c91   :  { %7016 = vmatprep.subr.mxu0 %v7357_v0 }
0x7c92   :  { %7017 = vmatpush3.msra.mxu0 %v8469_v13 }
0x7c93   :  { %7018 = vmatprep.subr.mxu0 %v7357_v0 }
0x7c94   :  { %7019 = vmatpush3.msra.mxu0 %v8476_v15 }
0x7c95   :  { %7020 = vmatprep.subr.mxu0 %v7357_v0 }
0x7c96   :  { %7021 = vmatpush3.msra.mxu0 %v8483_v57 }
0x7c97   :  { %7036 = vmatprep.subr.mxu0 %v7357_v0 }
0x7d4f   :  { %v5146_v43 = vpop.f32.mrf.mxu0 }
0x7d50   :  { %v5150_v44 = vadd.f32 %v5146_v43, %v5074_v54 }
0x7d51   :  { %v7002_v45 = vpop.f32.mrf.mxu0 }
0x7d52   :  { %7293 = vtanh.f32 %v5150_v44 }
0x7d5f   :  { %v7294_v46 = vpop.eup %7293 }
0x7d60   :  { %v5152_v47 = vmul.f32 %v8522_v32, %v7294_v46 }
0x7d62   :  { %v5153_v48 = vadd.f32 %v8528_v34, %v5152_v47 }
0x7d64   :  { %5156 = vrot.lane.b32.xlu1 %v5153_v48, %s7360_s23  ;;  %v5154_v55 = vmul.f32 %v5153_v48, %v5066_v7 }
0x7dd6   :  { %v5157_v49 = vpop.permute.xlu1 %5156 }
0x7dd7   :  { %v5159_v52 = vmul.f32 %v5157_v49, %v5153_v48 }
0x7dd9   :  { %5161 = vrot.lane.b32.xlu0 %v5159_v52, %s7361_s24 }
0x7e4b   :  { %v5162_v58 = vpop.permute.xlu0 %5161 }
0x7e4c   :  { %v5164_v59 = vadd.f32 %v5162_v58, %v5154_v55 }
0x7e4e   :  { %7295 = vtanh.f32 %v5164_v59 }
0x7e5b   :  { %v7296_v60 = vpop.eup %7295 }
0x7e5c   :  { %5167 = vrot.lane.b32.xlu1 %v7296_v60, %s7360_s23 }
0x7e60   :  { %325 = vperm.xlu1 %7108, %v78_v61  }
0x7ece   :  { %v5168_v62 = vpop.permute.xlu1 %5167 }
0x7ecf   :  { %v5170_v63 = vmul.f32 %v5168_v62, %v5153_v48 }
0x7ed1   :  { %5174 = vrot.lane.b32.xlu0 %v5170_v63, %s7361_s24 }
0x7edb   :  { %v326_v3 = vpop.permute.xlu1 %325 }
0x7edc   :  { %v421_v4 = vmul.f32 %v8499_v17, %v326_v3 }
0x7ede   :  { %v484_v16 = vadd.f32 %v8505_v20, %v421_v4 }
0x7ee0   :  { %540 = vst [vmem:[#allocation2 + $0x5e] sm:$0x3] %v484_v16  ;;  %v81_v16 = vld [vmem:[%s8848_s0 + $0x64] sm:$0x3] }
0x7ee7   :  { %v5172_v9 = vld [vmem:[#allocation2 + $0x5e] sm:$0x3] }
0x7f43   :  { %v5175_v18 = vpop.permute.xlu0 %5174 }
0x7f44   :  { %7012 = vmatmul.mubr.msk.f32.vlgmr.msra.gmra.mxu1 %vm556_vm1, %v5175_v18 }
0x7f45   :  { %7026 = vmatpush3.msra.mxu1 %v8460_v56  ;;  %7033 = vmatprep.mubr.msk.f32.mxu1 %vm7358_vm0, %v7357_v0 }
0x7f46   :  { %7027 = vmatprep.subr.mxu1 %v7357_v0 }
0x7f47   :  { %7028 = vmatpush3.msra.mxu1 %v8469_v13 }
0x7f48   :  { %7029 = vmatprep.subr.mxu1 %v7357_v0 }
0x7f49   :  { %7030 = vmatpush3.msra.mxu1 %v8476_v15 }
0x7f4a   :  { %7031 = vmatprep.subr.mxu1 %v7357_v0 }
0x7f4b   :  { %7032 = vmatpush3.msra.mxu1 %v8483_v57 }
0x7f4c   :  { %7047 = vmatprep.subr.mxu1 %v7357_v0 }
0x8004   :  { %v5244_v22 = vpop.f32.mrf.mxu1 }
0x8005   :  { %v5248_v24 = vadd.f32 %v5244_v22, %v5172_v9 }
0x8006   :  { %v7013_v11 = vpop.f32.mrf.mxu1 }
0x8007   :  { %7297 = vtanh.f32 %v5248_v24 }
0x8014   :  { %v7298_v27 = vpop.eup %7297 }
0x8015   :  { %v5250_v29 = vmul.f32 %v8522_v32, %v7298_v27 }
0x8017   :  { %v5251_v14 = vadd.f32 %v8528_v34, %v5250_v29 }
0x8019   :  { %5254 = vrot.lane.b32.xlu0 %v5251_v14, %s7360_s23  ;;  %v5252_v23 = vmul.f32 %v5251_v14, %v5164_v59 }
0x808b   :  { %v5255_v19 = vpop.permute.xlu0 %5254 }
0x808c   :  { %v5257_v21 = vmul.f32 %v5255_v19, %v5251_v14 }
0x808e   :  { %5259 = vrot.lane.b32.xlu1 %v5257_v21, %s7361_s24 }
0x8100   :  { %v5260_v25 = vpop.permute.xlu1 %5259 }
0x8101   :  { %v5262_v26 = vadd.f32 %v5260_v25, %v5252_v23 }
0x8103   :  { %7299 = vtanh.f32 %v5262_v26 }
0x8110   :  { %v7300_v28 = vpop.eup %7299 }
0x8111   :  { %5265 = vrot.lane.b32.xlu0 %v7300_v28, %s7360_s23 }
0x8115   :  { %330 = vperm.xlu0 %7107, %v79_v30  }
0x8183   :  { %v5266_v31 = vpop.permute.xlu0 %5265 }
0x8184   :  { %v5268_v33 = vmul.f32 %v5266_v31, %v5251_v14 }
0x8186   :  { %5272 = vrot.lane.b32.xlu1 %v5268_v33, %s7361_s24 }
0x8190   :  { %v331_v35 = vpop.permute.xlu0 %330 }
0x8191   :  { %v422_v1 = vmul.f32 %v8499_v17, %v331_v35 }
0x8193   :  { %v485_v36 = vadd.f32 %v8505_v20, %v422_v1 }
0x8195   :  { %541 = vst [vmem:[#allocation2 + $0x60] sm:$0x3] %v485_v36  ;;  %v82_v36 = vld [vmem:[%s8848_s0 + $0x66] sm:$0x3] }
0x819c   :  { %v5270_v38 = vld [vmem:[#allocation2 + $0x60] sm:$0x3] }
0x81f8   :  { %v5273_v37 = vpop.permute.xlu1 %5272 }
0x81f9   :  { %7023 = vmatmul.mubr.msk.f32.vlgmr.msra.gmra.mxu0 %vm556_vm1, %v5273_v37 }
0x81fa   :  { %7037 = vmatpush3.msra.mxu0 %v8460_v56  ;;  %7044 = vmatprep.mubr.msk.f32.mxu0 %vm7358_vm0, %v7357_v0 }
0x81fb   :  { %7038 = vmatprep.subr.mxu0 %v7357_v0 }
0x81fc   :  { %7039 = vmatpush3.msra.mxu0 %v8469_v13 }
0x81fd   :  { %7040 = vmatprep.subr.mxu0 %v7357_v0 }
0x81fe   :  { %7041 = vmatpush3.msra.mxu0 %v8476_v15 }
0x81ff   :  { %7042 = vmatprep.subr.mxu0 %v7357_v0 }
0x8200   :  { %7043 = vmatpush3.msra.mxu0 %v8483_v57 }
0x8201   :  { %7058 = vmatprep.subr.mxu0 %v7357_v0 }
0x82b9   :  { %v5342_v2 = vpop.f32.mrf.mxu0 }
0x82ba   :  { %v5346_v50 = vadd.f32 %v5342_v2, %v5270_v38 }
0x82bb   :  { %v7024_v39 = vpop.f32.mrf.mxu0 }
0x82bc   :  { %7301 = vtanh.f32 %v5346_v50 }
0x82c9   :  { %v7302_v5 = vpop.eup %7301 }
0x82ca   :  { %v5348_v40 = vmul.f32 %v8522_v32, %v7302_v5 }
0x82cc   :  { %v5349_v7 = vadd.f32 %v8528_v34, %v5348_v40 }
0x82ce   :  { %5352 = vrot.lane.b32.xlu1 %v5349_v7, %s7360_s23  ;;  %v5350_v8 = vmul.f32 %v5349_v7, %v5262_v26 }
0x8340   :  { %v5353_v53 = vpop.permute.xlu1 %5352 }
0x8341   :  { %v5355_v6 = vmul.f32 %v5353_v53, %v5349_v7 }
0x8343   :  { %5357 = vrot.lane.b32.xlu0 %v5355_v6, %s7361_s24 }
0x83b5   :  { %v5358_v41 = vpop.permute.xlu0 %5357 }
0x83b6   :  { %v5360_v10 = vadd.f32 %v5358_v41, %v5350_v8 }
0x83b8   :  { %7303 = vtanh.f32 %v5360_v10 }
0x83c5   :  { %v7304_v51 = vpop.eup %7303 }
0x83c6   :  { %5363 = vrot.lane.b32.xlu1 %v7304_v51, %s7360_s23 }
0x83ca   :  { %335 = vperm.xlu1 %7108, %v80_v12  }
0x8438   :  { %v5364_v42 = vpop.permute.xlu1 %5363 }
0x8439   :  { %v5366_v54 = vmul.f32 %v5364_v42, %v5349_v7 }
0x843b   :  { %5370 = vrot.lane.b32.xlu0 %v5366_v54, %s7361_s24 }
0x8445   :  { %v336_v43 = vpop.permute.xlu1 %335 }
0x8446   :  { %v423_v44 = vmul.f32 %v8499_v17, %v336_v43 }
0x8448   :  { %v486_v45 = vadd.f32 %v8505_v20, %v423_v44 }
0x844a   :  { %542 = vst [vmem:[#allocation2 + $0x62] sm:$0x3] %v486_v45  ;;  %v83_v45 = vld [vmem:[%s8848_s0 + $0x68] sm:$0x3] }
0x8451   :  { %v5368_v47 = vld [vmem:[#allocation2 + $0x62] sm:$0x3] }
0x84ad   :  { %v5371_v46 = vpop.permute.xlu0 %5370 }
0x84ae   :  { %7034 = vmatmul.mubr.msk.f32.vlgmr.msra.gmra.mxu1 %vm556_vm1, %v5371_v46 }
0x84af   :  { %7048 = vmatpush3.msra.mxu1 %v8460_v56  ;;  %7055 = vmatprep.mubr.msk.f32.mxu1 %vm7358_vm0, %v7357_v0 }
0x84b0   :  { %7049 = vmatprep.subr.mxu1 %v7357_v0 }
0x84b1   :  { %7050 = vmatpush3.msra.mxu1 %v8469_v13 }
0x84b2   :  { %7051 = vmatprep.subr.mxu1 %v7357_v0 }
0x84b3   :  { %7052 = vmatpush3.msra.mxu1 %v8476_v15 }
0x84b4   :  { %7053 = vmatprep.subr.mxu1 %v7357_v0 }
0x84b5   :  { %7054 = vmatpush3.msra.mxu1 %v8483_v57 }
0x84b6   :  { %7069 = vmatprep.subr.mxu1 %v7357_v0 }
0x856e   :  { %v5440_v48 = vpop.f32.mrf.mxu1 }
0x856f   :  { %v5444_v49 = vadd.f32 %v5440_v48, %v5368_v47 }
0x8570   :  { %v7035_v52 = vpop.f32.mrf.mxu1 }
0x8571   :  { %7305 = vtanh.f32 %v5444_v49 }
0x857e   :  { %v7306_v55 = vpop.eup %7305 }
0x857f   :  { %v5446_v58 = vmul.f32 %v8522_v32, %v7306_v55 }
0x8581   :  { %v5447_v59 = vadd.f32 %v8528_v34, %v5446_v58 }
0x8583   :  { %5450 = vrot.lane.b32.xlu0 %v5447_v59, %s7360_s23  ;;  %v5448_v62 = vmul.f32 %v5447_v59, %v5360_v10 }
0x85f5   :  { %v5451_v60 = vpop.permute.xlu0 %5450 }
0x85f6   :  { %v5453_v61 = vmul.f32 %v5451_v60, %v5447_v59 }
0x85f8   :  { %5455 = vrot.lane.b32.xlu1 %v5453_v61, %s7361_s24 }
0x866a   :  { %v5456_v63 = vpop.permute.xlu1 %5455 }
0x866b   :  { %v5458_v3 = vadd.f32 %v5456_v63, %v5448_v62 }
0x866d   :  { %7307 = vtanh.f32 %v5458_v3 }
0x867a   :  { %v7308_v4 = vpop.eup %7307 }
0x867b   :  { %5461 = vrot.lane.b32.xlu0 %v7308_v4, %s7360_s23 }
0x867f   :  { %340 = vperm.xlu0 %7107, %v81_v16  }
0x86ed   :  { %v5462_v18 = vpop.permute.xlu0 %5461 }
0x86ee   :  { %v5464_v9 = vmul.f32 %v5462_v18, %v5447_v59 }
0x86f0   :  { %5466 = vrot.lane.b32.xlu1 %v5464_v9, %s7361_s24 }
0x86fa   :  { %v341_v22 = vpop.permute.xlu0 %340 }
0x86fb   :  { %v424_v24 = vmul.f32 %v8499_v17, %v341_v22 }
0x86fd   :  { %v487_v11 = vadd.f32 %v8505_v20, %v424_v24 }
0x86ff   :  { %543 = vst [vmem:[#allocation2 + $0x64] sm:$0x3] %v487_v11  ;;  %v84_v11 = vld [vmem:[%s8848_s0 + $0x6a] sm:$0x3] }
0x8706   :  { %v5472_v29 = vld [vmem:[#allocation2 + $0x64] sm:$0x3] }
0x8762   :  { %v5467_v27 = vpop.permute.xlu1 %5466 }
0x8763   :  { %5470 = vst.msk [vmem:[#allocation3] sm:$0x3] %vm5469_vm2, %v5467_v27  ;;  %7045 = vmatmul.mubr.msk.f32.vlgmr.msra.gmra.mxu0 %vm556_vm1, %v5467_v27 }
0x8764   :  { %7059 = vmatpush3.msra.mxu0 %v8460_v56  ;;  %7066 = vmatprep.mubr.msk.f32.mxu0 %vm7358_vm0, %v7357_v0 }
0x8765   :  { %7060 = vmatprep.subr.mxu0 %v7357_v0 }
0x8766   :  { %7061 = vmatpush3.msra.mxu0 %v8469_v13 }
0x8767   :  { %7062 = vmatprep.subr.mxu0 %v7357_v0 }
0x8768   :  { %7063 = vmatpush3.msra.mxu0 %v8476_v15 }
0x8769   :  { %7064 = vmatprep.subr.mxu0 %v7357_v0 }
0x876a   :  { %7065 = vmatpush3.msra.mxu0 %v8483_v57 }
0x876b   :  { %7080 = vmatprep.subr.mxu0 %v7357_v0 }
0x8823   :  { %v5541_v14 = vpop.f32.mrf.mxu0 }
0x8824   :  { %v5545_v19 = vadd.f32 %v5541_v14, %v5472_v29 }
0x8825   :  { %v7046_v21 = vpop.f32.mrf.mxu0 }
0x8826   :  { %7309 = vtanh.f32 %v5545_v19 }
0x8833   :  { %v7310_v23 = vpop.eup %7309 }
0x8834   :  { %v5547_v25 = vmul.f32 %v8522_v32, %v7310_v23 }
0x8836   :  { %v5548_v26 = vadd.f32 %v8528_v34, %v5547_v25 }
0x8838   :  { %5551 = vrot.lane.b32.xlu1 %v5548_v26, %s7360_s23  ;;  %v5549_v31 = vmul.f32 %v5548_v26, %v5458_v3 }
0x88aa   :  { %v5552_v28 = vpop.permute.xlu1 %5551 }
0x88ab   :  { %v5554_v30 = vmul.f32 %v5552_v28, %v5548_v26 }
0x88ad   :  { %5556 = vrot.lane.b32.xlu0 %v5554_v30, %s7361_s24 }
0x891f   :  { %v5557_v33 = vpop.permute.xlu0 %5556 }
0x8920   :  { %v5559_v35 = vadd.f32 %v5557_v33, %v5549_v31 }
0x8922   :  { %7311 = vtanh.f32 %v5559_v35 }
0x892f   :  { %v7312_v1 = vpop.eup %7311 }
0x8930   :  { %5562 = vrot.lane.b32.xlu1 %v7312_v1, %s7360_s23 }
0x8934   :  { %345 = vperm.xlu1 %7108, %v82_v36   ;;  %v85_v36 = vld [vmem:[%s8848_s0 + $0x6c] sm:$0x3] }
0x89a2   :  { %v5563_v37 = vpop.permute.xlu1 %5562 }
0x89a3   :  { %v5565_v38 = vmul.f32 %v5563_v37, %v5548_v26 }
0x89a5   :  { %5567 = vrot.lane.b32.xlu0 %v5565_v38, %s7361_s24 }
0x89af   :  { %v346_v2 = vpop.permute.xlu1 %345 }
0x89b0   :  { %v425_v50 = vmul.f32 %v8499_v17, %v346_v2 }
0x89b2   :  { %v488_v39 = vadd.f32 %v8505_v20, %v425_v50 }
0x89b4   :  { %544 = vst [vmem:[#allocation2 + $0x66] sm:$0x3] %v488_v39 }
0x89bb   :  { %v5573_v40 = vld [vmem:[#allocation2 + $0x66] sm:$0x3] }
0x8a17   :  { %v5568_v5 = vpop.permute.xlu0 %5567 }
0x8a18   :  { %5571 = vst.msk [vmem:[#allocation3 + $0x2] sm:$0x3] %vm5469_vm2, %v5568_v5  ;;  %7056 = vmatmul.mubr.msk.f32.vlgmr.msra.gmra.mxu1 %vm556_vm1, %v5568_v5 }
0x8a19   :  { %7070 = vmatpush3.msra.mxu1 %v8460_v56  ;;  %7077 = vmatprep.mubr.msk.f32.mxu1 %vm7358_vm0, %v7357_v0 }
0x8a1a   :  { %7071 = vmatprep.subr.mxu1 %v7357_v0 }
0x8a1b   :  { %7072 = vmatpush3.msra.mxu1 %v8469_v13 }
0x8a1c   :  { %7073 = vmatprep.subr.mxu1 %v7357_v0 }
0x8a1d   :  { %7074 = vmatpush3.msra.mxu1 %v8476_v15 }
0x8a1e   :  { %7075 = vmatprep.subr.mxu1 %v7357_v0 }
0x8a1f   :  { %7076 = vmatpush3.msra.mxu1 %v8483_v57 }
0x8a20   :  { %7091 = vmatprep.subr.mxu1 %v7357_v0 }
0x8ad8   :  { %v5642_v7 = vpop.f32.mrf.mxu1 }
0x8ad9   :  { %v5646_v53 = vadd.f32 %v5642_v7, %v5573_v40 }
0x8ada   :  { %v7057_v6 = vpop.f32.mrf.mxu1 }
0x8adb   :  { %7313 = vtanh.f32 %v5646_v53 }
0x8ae8   :  { %v7314_v8 = vpop.eup %7313 }
0x8ae9   :  { %v5648_v41 = vmul.f32 %v8522_v32, %v7314_v8 }
0x8aeb   :  { %v5649_v10 = vadd.f32 %v8528_v34, %v5648_v41 }
0x8aed   :  { %5652 = vrot.lane.b32.xlu0 %v5649_v10, %s7360_s23  ;;  %v5650_v42 = vmul.f32 %v5649_v10, %v5559_v35 }
0x8b5f   :  { %v5653_v51 = vpop.permute.xlu0 %5652 }
0x8b60   :  { %v5655_v12 = vmul.f32 %v5653_v51, %v5649_v10 }
0x8b62   :  { %5657 = vrot.lane.b32.xlu1 %v5655_v12, %s7361_s24 }
0x8bd4   :  { %v5658_v54 = vpop.permute.xlu1 %5657 }
0x8bd5   :  { %v5660_v43 = vadd.f32 %v5658_v54, %v5650_v42 }
0x8bd7   :  { %7315 = vtanh.f32 %v5660_v43 }
0x8be4   :  { %v7316_v44 = vpop.eup %7315 }
0x8be5   :  { %5663 = vrot.lane.b32.xlu0 %v7316_v44, %s7360_s23 }
0x8be9   :  { %350 = vperm.xlu0 %7107, %v83_v45   ;;  %v86_v45 = vld [vmem:[%s8848_s0 + $0x6e] sm:$0x3] }
0x8c57   :  { %v5664_v46 = vpop.permute.xlu0 %5663 }
0x8c58   :  { %v5666_v47 = vmul.f32 %v5664_v46, %v5649_v10 }
0x8c5a   :  { %5668 = vrot.lane.b32.xlu1 %v5666_v47, %s7361_s24 }
0x8c64   :  { %v351_v48 = vpop.permute.xlu0 %350 }
0x8c65   :  { %v426_v49 = vmul.f32 %v8499_v17, %v351_v48 }
0x8c67   :  { %v489_v52 = vadd.f32 %v8505_v20, %v426_v49 }
0x8c69   :  { %545 = vst [vmem:[#allocation2 + $0x68] sm:$0x3] %v489_v52 }
0x8c70   :  { %v5674_v58 = vld [vmem:[#allocation2 + $0x68] sm:$0x3] }
0x8ccc   :  { %v5669_v55 = vpop.permute.xlu1 %5668 }
0x8ccd   :  { %5672 = vst.msk [vmem:[#allocation3 + $0x4] sm:$0x3] %vm5469_vm2, %v5669_v55  ;;  %7067 = vmatmul.mubr.msk.f32.vlgmr.msra.gmra.mxu0 %vm556_vm1, %v5669_v55 }
0x8cce   :  { %7081 = vmatpush3.msra.mxu0 %v8460_v56  ;;  %7088 = vmatprep.mubr.msk.f32.mxu0 %vm7358_vm0, %v7357_v0 }
0x8ccf   :  { %7082 = vmatprep.subr.mxu0 %v7357_v0 }
0x8cd0   :  { %7083 = vmatpush3.msra.mxu0 %v8469_v13 }
0x8cd1   :  { %7084 = vmatprep.subr.mxu0 %v7357_v0 }
0x8cd2   :  { %7085 = vmatpush3.msra.mxu0 %v8476_v15 }
0x8cd3   :  { %7086 = vmatprep.subr.mxu0 %v7357_v0 }
0x8cd4   :  { %7087 = vmatpush3.msra.mxu0 %v8483_v57 }
0x8d8d   :  { %v5743_v59 = vpop.f32.mrf.mxu0 }
0x8d8e   :  { %v5747_v60 = vadd.f32 %v5743_v59, %v5674_v58 }
0x8d8f   :  { %v7068_v61 = vpop.f32.mrf.mxu0 }
0x8d90   :  { %7317 = vtanh.f32 %v5747_v60 }
0x8d9d   :  { %v7318_v62 = vpop.eup %7317 }
0x8d9e   :  { %v5749_v63 = vmul.f32 %v8522_v32, %v7318_v62 }
0x8da0   :  { %v5750_v3 = vadd.f32 %v8528_v34, %v5749_v63 }
0x8da2   :  { %5753 = vrot.lane.b32.xlu1 %v5750_v3, %s7360_s23  ;;  %v5751_v18 = vmul.f32 %v5750_v3, %v5660_v43 }
0x8e14   :  { %v5754_v4 = vpop.permute.xlu1 %5753 }
0x8e15   :  { %v5756_v16 = vmul.f32 %v5754_v4, %v5750_v3 }
0x8e17   :  { %5758 = vrot.lane.b32.xlu0 %v5756_v16, %s7361_s24 }
0x8e89   :  { %v5759_v9 = vpop.permute.xlu0 %5758 }
0x8e8a   :  { %v5761_v22 = vadd.f32 %v5759_v9, %v5751_v18 }
0x8e8c   :  { %7319 = vtanh.f32 %v5761_v22 }
0x8e99   :  { %v7320_v24 = vpop.eup %7319 }
0x8e9a   :  { %5764 = vrot.lane.b32.xlu1 %v7320_v24, %s7360_s23 }
0x8e9e   :  { %355 = vperm.xlu1 %7108, %v84_v11  }
0x8f0c   :  { %v5765_v27 = vpop.permute.xlu1 %5764 }
0x8f0d   :  { %v5767_v29 = vmul.f32 %v5765_v27, %v5750_v3 }
0x8f0f   :  { %5769 = vrot.lane.b32.xlu0 %v5767_v29, %s7361_s24  ;;  %v13_v29 = vstv %s8854_s7 }
0x8f10   :  { %14 = vst [vmem:[#allocation4] sm:$0x1] %v13_v29 }
0x8f19   :  { %v356_v14 = vpop.permute.xlu1 %355 }
0x8f1a   :  { %v427_v19 = vmul.f32 %v8499_v17, %v356_v14 }
0x8f1c   :  { %v490_v21 = vadd.f32 %v8505_v20, %v427_v19 }
0x8f1e   :  { %546 = vst [vmem:[#allocation2 + $0x6a] sm:$0x3] %v490_v21 }
0x8f25   :  { %v5775_v25 = vld [vmem:[#allocation2 + $0x6a] sm:$0x3] }
0x8f81   :  { %v5770_v23 = vpop.permute.xlu0 %5769 }
0x8f82   :  { %5773 = vst.msk [vmem:[#allocation3 + $0x6] sm:$0x3] %vm5469_vm2, %v5770_v23  ;;  %7078 = vmatmul.mubr.msk.f32.vlgmr.msra.gmra.mxu1 %vm556_vm1, %v5770_v23 }
0x8f83   :  { %7092 = vmatpush3.msra.mxu1 %v8460_v56  ;;  %7099 = vmatprep.mubr.msk.f32.mxu1 %vm7358_vm0, %v7357_v0 }
0x8f84   :  { %7093 = vmatprep.subr.mxu1 %v7357_v0 }
0x8f85   :  { %7094 = vmatpush3.msra.mxu1 %v8469_v13 }
0x8f86   :  { %7095 = vmatprep.subr.mxu1 %v7357_v0 }
0x8f87   :  { %7096 = vmatpush3.msra.mxu1 %v8476_v15 }
0x8f88   :  { %7097 = vmatprep.subr.mxu1 %v7357_v0 }
0x8f89   :  { %7098 = vmatpush3.msra.mxu1 %v8483_v57  ;;  %v6081_v14 = vld [vmem:[#allocation3 + $0x6] sm:$0x3] }
0x9042   :  { %v5844_v26 = vpop.f32.mrf.mxu1 }
0x9043   :  { %v5848_v28 = vadd.f32 %v5844_v26, %v5775_v25 }
0x9044   :  { %v7079_v30 = vpop.f32.mrf.mxu1 }
0x9045   :  { %7321 = vtanh.f32 %v5848_v28 }
0x9052   :  { %v7322_v56 = vpop.eup %7321 }
0x9053   :  { %v5850_v31 = vmul.f32 %v8522_v32, %v7322_v56 }
0x9055   :  { %v5851_v33 = vadd.f32 %v8528_v34, %v5850_v31  ;;  %v6079_v31 = vld [vmem:[#allocation3 + $0x2] sm:$0x3] }
0x9057   :  { %5854 = vrot.lane.b32.xlu0 %v5851_v33, %s7360_s23  ;;  %v5852_v15 = vmul.f32 %v5851_v33, %v5761_v22  ;;  %v6204_v22 = vld [vmem:[%s8853_s6] ss:$0 sm:$0xff] }
0x9058   :  { %v6094_v21 = vmul.f32 %v6204_v22, %v6081_v14 }
0x905a   :  { %v6107_v25 = vsel %vm5469_vm2, %v6094_v21, 0.0 }
0x90c9   :  { %v5855_v13 = vpop.permute.xlu0 %5854 }
0x90ca   :  { %v5857_v35 = vmul.f32 %v5855_v13, %v5851_v33 }
0x90cc   :  { %5859 = vrot.lane.b32.xlu1 %v5857_v35, %s7361_s24 }
0x913e   :  { %v5860_v0 = vpop.permute.xlu1 %5859 }
0x913f   :  { %v5862_v1 = vadd.f32 %v5860_v0, %v5852_v15 }
0x9141   :  { %7323 = vtanh.f32 %v5862_v1 }
0x914e   :  { %v7324_v57 = vpop.eup %7323 }
0x914f   :  { %5865 = vrot.lane.b32.xlu0 %v7324_v57, %s7360_s23 }
0x9153   :  { %360 = vperm.xlu0 %7107, %v85_v36  }
0x91c1   :  { %v5866_v37 = vpop.permute.xlu0 %5865 }
0x91c2   :  { %v5868_v38 = vmul.f32 %v5866_v37, %v5851_v33  ;;  %v6092_v33 = vmul.f32 %v6204_v22, %v6079_v31 }
0x91c4   :  { %5870 = vrot.lane.b32.xlu1 %v5868_v38, %s7361_s24  ;;  %v6101_v35 = vsel %vm5469_vm2, %v6092_v33, 0.0 }
0x91ce   :  { %v361_v2 = vpop.permute.xlu0 %360 }
0x91cf   :  { %v428_v50 = vmul.f32 %v8499_v17, %v361_v2 }
0x91d1   :  { %v491_v39 = vadd.f32 %v8505_v20, %v428_v50 }
0x91d3   :  { %547 = vst [vmem:[#allocation2 + $0x6c] sm:$0x3] %v491_v39 }
0x91da   :  { %v5876_v40 = vld [vmem:[#allocation2 + $0x6c] sm:$0x3] }
0x9236   :  { %v5871_v5 = vpop.permute.xlu1 %5870 }
0x9237   :  { %5874 = vst.msk [vmem:[#allocation3 + $0x8] sm:$0x3] %vm5469_vm2, %v5871_v5  ;;  %7089 = vmatmul.mubr.msk.f32.vlgmr.msra.gmra.mxu0 %vm556_vm1, %v5871_v5 }
0x923e   :  { %v6082_v13 = vld [vmem:[#allocation3 + $0x8] sm:$0x3] }
0x923f   :  { %v6095_v15 = vmul.f32 %v6204_v22, %v6082_v13 }
0x9241   :  { %v6110_v0 = vsel %vm5469_vm2, %v6095_v15, 0.0 }
0x92f7   :  { %v5945_v7 = vpop.f32.mrf.mxu0 }
0x92f8   :  { %v5949_v53 = vadd.f32 %v5945_v7, %v5876_v40 }
0x92f9   :  { %v7090_v6 = vpop.f32.mrf.mxu0 }
0x92fa   :  { %7325 = vtanh.f32 %v5949_v53 }
0x9307   :  { %v7326_v8 = vpop.eup %7325 }
0x9308   :  { %v5951_v41 = vmul.f32 %v8522_v32, %v7326_v8 }
0x930a   :  { %v5952_v10 = vadd.f32 %v8528_v34, %v5951_v41 }
0x930c   :  { %5955 = vrot.lane.b32.xlu1 %v5952_v10, %s7360_s23  ;;  %v5953_v42 = vmul.f32 %v5952_v10, %v5862_v1  ;;  %v6205_v1 = vld [vmem:[#allocation4] ss:$0 sm:$0xff] }
0x937e   :  { %v5956_v51 = vpop.permute.xlu1 %5955 }
0x937f   :  { %v5958_v12 = vmul.f32 %v5956_v51, %v5952_v10 }
0x9381   :  { %5960 = vrot.lane.b32.xlu0 %v5958_v12, %s7361_s24 }
0x93f3   :  { %v5961_v54 = vpop.permute.xlu0 %5960 }
0x93f4   :  { %v5963_v43 = vadd.f32 %v5961_v54, %v5953_v42 }
0x93f6   :  { %7327 = vtanh.f32 %v5963_v43 }
0x9403   :  { %v7328_v44 = vpop.eup %7327 }
0x9404   :  { %5966 = vrot.lane.b32.xlu1 %v7328_v44, %s7360_s23 }
0x9408   :  { %365 = vperm.xlu1 %7108, %v86_v45  }
0x9476   :  { %v5967_v46 = vpop.permute.xlu1 %5966 }
0x9477   :  { %v5969_v47 = vmul.f32 %v5967_v46, %v5952_v10 }
0x9479   :  { %5971 = vrot.lane.b32.xlu0 %v5969_v47, %s7361_s24 }
0x9483   :  { %v366_v48 = vpop.permute.xlu1 %365 }
0x9484   :  { %v429_v49 = vmul.f32 %v8499_v17, %v366_v48 }
0x9486   :  { %v492_v52 = vadd.f32 %v8505_v20, %v429_v49 }
0x9488   :  { %548 = vst [vmem:[#allocation2 + $0x6e] sm:$0x3] %v492_v52 }
0x948f   :  { %v5977_v58 = vld [vmem:[#allocation2 + $0x6e] sm:$0x3] }
0x94eb   :  { %v5972_v55 = vpop.permute.xlu0 %5971 }
0x94ec   :  { %5975 = vst.msk [vmem:[#allocation3 + $0xa] sm:$0x3] %vm5469_vm2, %v5972_v55  ;;  %7100 = vmatmul.mubr.msk.f32.vlgmr.msra.gmra.mxu1 %vm556_vm1, %v5972_v55 }
0x94f3   :  { %v6083_v23 = vld [vmem:[#allocation3 + $0xa] sm:$0x3] }
0x94f4   :  { %v6096_v26 = vmul.f32 %v6204_v22, %v6083_v23 }
0x94f6   :  { %v6113_v28 = vsel %vm5469_vm2, %v6096_v26, 0.0 }
0x95ac   :  { %v6046_v59 = vpop.f32.mrf.mxu1 }
0x95ad   :  { %v6050_v60 = vadd.f32 %v6046_v59, %v5977_v58 }
0x95ae   :  { %v7101_v61 = vpop.f32.mrf.mxu1 }
0x95af   :  { %7329 = vtanh.f32 %v6050_v60 }
0x95bc   :  { %v7330_v62 = vpop.eup %7329 }
0x95bd   :  { %v6052_v63 = vmul.f32 %v8522_v32, %v7330_v62  ;;  %v6078_v32 = vld [vmem:[#allocation3] sm:$0x3] }
0x95be   :  { %v6091_v24 = vmul.f32 %v6204_v22, %v6078_v32 }
0x95bf   :  { %v6053_v3 = vadd.f32 %v8528_v34, %v6052_v63  ;;  %v6080_v34 = vld [vmem:[#allocation3 + $0x4] sm:$0x3] }
0x95c0   :  { %v6098_v11 = vsel %vm5469_vm2, %v6091_v24, 0.0  ;;  %v6093_v27 = vmul.f32 %v6204_v22, %v6080_v34 }
0x95c1   :  { %6056 = vrot.lane.b32.xlu0 %v6053_v3, %s7360_s23  ;;  %v6054_v4 = vmul.f32 %v6053_v3, %v5963_v43 }
0x95c2   :  { %v6104_v19 = vsel %vm5469_vm2, %v6093_v27, 0.0 }
0x9633   :  { %v6057_v17 = vpop.permute.xlu0 %6056 }
0x9634   :  { %v6059_v20 = vmul.f32 %v6057_v17, %v6053_v3 }
0x9636   :  { %6061 = vrot.lane.b32.xlu1 %v6059_v20, %s7361_s24 }
0x96a8   :  { %v6062_v16 = vpop.permute.xlu1 %6061 }
0x96a9   :  { %v6064_v18 = vadd.f32 %v6062_v16, %v6054_v4 }
0x96ab   :  { %7331 = vtanh.f32 %v6064_v18 }
0x96b8   :  { %v7332_v9 = vpop.eup %7331 }
0x96b9   :  { %6067 = vrot.lane.b32.xlu0 %v7332_v9, %s7360_s23 }
0x96d8   :  { %6099 = vadd.xlane.f32.xlu0 %v6098_v11 }
0x96dc   :  { %6105 = vadd.xlane.f32.xlu0 %v6104_v19 }
0x96e0   :  { %6108 = vadd.xlane.f32.xlu0 %v6107_v25 }
0x96e4   :  { %6114 = vadd.xlane.f32.xlu0 %v6113_v28 }
0x972b   :  { %v6068_v30 = vpop.permute.xlu0 %6067 }
0x972c   :  { %v6070_v56 = vmul.f32 %v6068_v30, %v6053_v3 }
0x972e   :  { %6072 = vrot.lane.b32.xlu1 %v6070_v56, %s7361_s24 }
0x9752   :  { %6102 = vadd.xlane.f32.xlu1 %v6101_v35 }
0x9756   :  { %6111 = vadd.xlane.f32.xlu1 %v6110_v0 }
0x9761   :  { %v6100_v57 = vpop.xlane.xlu0 %6099 }
0x9762   :  { %v6126_v36 = vadd.f32 %v6205_v1, %v6100_v57 }
0x9764   :  { %6134 = vst.msk [vmem:[%s8855_s8] sm:$0x3] %vm6133_vm3, %v6126_v36 }
0x9765   :  { %v6106_v37 = vpop.xlane.xlu0 %6105 }
0x9766   :  { %v6128_v38 = vadd.f32 %v6205_v1, %v6106_v37 }
0x9768   :  { %6136 = vst.msk [vmem:[%s8855_s8 + $0x4] sm:$0x3] %vm6133_vm3, %v6128_v38 }
0x9769   :  { %v6109_v2 = vpop.xlane.xlu0 %6108 }
0x976a   :  { %v6129_v50 = vadd.f32 %v6205_v1, %v6109_v2 }
0x976c   :  { %6137 = vst.msk [vmem:[%s8855_s8 + $0x6] sm:$0x3] %vm6133_vm3, %v6129_v50 }
0x976d   :  { %v6115_v39 = vpop.xlane.xlu0 %6114 }
0x976e   :  { %v6131_v5 = vadd.f32 %v6205_v1, %v6115_v39 }
0x9770   :  { %6139 = vst.msk [vmem:[%s8855_s8 + $0xa] sm:$0x3] %vm6133_vm3, %v6131_v5 }
0x97a0   :  { %v6073_v40 = vpop.permute.xlu1 %6072 }
0x97a1   :  { %6076 = vst.msk [vmem:[#allocation3 + $0xc] sm:$0x3] %vm5469_vm2, %v6073_v40 }
0x97a8   :  { %v6084_v7 = vld [vmem:[#allocation3 + $0xc] sm:$0x3] }
0x97a9   :  { %v6097_v53 = vmul.f32 %v6204_v22, %v6084_v7 }
0x97ab   :  { %v6116_v6 = vsel %vm5469_vm2, %v6097_v53, 0.0 }
0x97ac   :  { %6117 = vadd.xlane.f32.xlu1 %v6116_v6 }
0x97db   :  { %v6103_v8 = vpop.xlane.xlu1 %6102 }
0x97dc   :  { %v6127_v41 = vadd.f32 %v6205_v1, %v6103_v8 }
0x97de   :  { %6135 = vst.msk [vmem:[%s8855_s8 + $0x2] sm:$0x3] %vm6133_vm3, %v6127_v41 }
0x97df   :  { %v6112_v10 = vpop.xlane.xlu1 %6111 }
0x97e0   :  { %v6130_v51 = vadd.f32 %v6205_v1, %v6112_v10 }
0x97e2   :  { %6138 = vst.msk [vmem:[%s8855_s8 + $0x8] sm:$0x3] %vm6133_vm3, %v6130_v51 }
0x9835   :  { %v6118_v12 = vpop.xlane.xlu1 %6117 }
0x9836   :  { %v6132_v42 = vadd.f32 %v6205_v1, %v6118_v12 }
0x9838   :  { %6140 = vst.msk [vmem:[%s8855_s8 + $0xc] sm:$0x3] %vm6133_vm3, %v6132_v42 }

</bundles_post_ra>
